<compile_context>
chip_gen: v5e
topology: v5e:2x2
jax: 0.10.0
libtpu: 0.0.40
codegen_flags: <defaults>
</compile_context>

<pallas_src>
import functools
import math

import jax
import jax.numpy as jnp
from jax import lax
from jax.experimental import pallas as pl
from jax.experimental.pallas import tpu as pltpu


# ----------------------------------------------------------------------------
# In-kernel helpers
# ----------------------------------------------------------------------------
def _zero_border(pad_ref):
    """Zero only the 1-pixel halo of the padded-activation scratch.

    The interior is fully overwritten before every conv, so re-zeroing the
    whole scratch per conv (previous version) is wasted VPU/vst work."""
    Hp, Wp, C = pad_ref.shape
    zrow = jnp.zeros((1, Wp, C), pad_ref.dtype)
    zcol = jnp.zeros((Hp, 1, C), pad_ref.dtype)
    pad_ref[0:1, :, :] = zrow
    pad_ref[Hp - 1:Hp, :, :] = zrow
    pad_ref[:, 0:1, :] = zcol
    pad_ref[:, Wp - 1:Wp, :] = zcol


def _conv3x3(pad_ref, x_hwc, w, b):
    """One 3x3 'same' conv as a single wide-K MXU matmul (K = 9*Cin).

    pad_ref : (H+2, W+2, Cin) bf16 scratch whose border is already zero.
    x_hwc   : (H, W, Cin) activation value (stored into the scratch interior).
    w       : (9*Cin, Cout) bf16, packed as [(dy*3 + dx)*Cin + cin, cout].
    b       : (1, Cout) f32.
    Returns (H*W, Cout) f32 accumulator.
    """
    H, W, Cin = x_hwc.shape
    pad_ref[1:H + 1, 1:W + 1, :] = x_hwc.astype(pad_ref.dtype)
    patch = jnp.concatenate(
        [pad_ref[dy:dy + H, dx:dx + W, :].reshape(H * W, Cin)
         for dy in range(3) for dx in range(3)],
        axis=1)                                            # (H*W, 9*Cin) bf16
    return jnp.dot(patch, w, preferred_element_type=jnp.float32) + b


# ----------------------------------------------------------------------------
# Pallas kernels
# ----------------------------------------------------------------------------
def _conv3x3_kernel(x_ref, w_ref, b_ref, o_ref, pad_ref):
    H, W, _ = x_ref.shape
    Cout = o_ref.shape[-1]
    _zero_border(pad_ref)
    acc = _conv3x3(pad_ref, x_ref[...], w_ref[...], b_ref[...])
    o_ref[...] = acc.reshape(H, W, Cout).astype(o_ref.dtype)


def _trunk_kernel(feat_ref, w1_ref, b1_ref, w2_ref, b2_ref, wab_ref, bab_ref,
                  o_ref, pad_ref, *, num_blocks, res_scale):
    """Fused EDSR trunk: num_blocks x ResidualBlockNoBN, then conv_after_body
    with the long skip (+feat).  `feat` / `res` stay on-chip for the whole
    trunk; a single bf16 pad scratch is reused by every conv."""
    H, W, C = feat_ref.shape
    _zero_border(pad_ref)

    feat = feat_ref[...]                                   # bf16 (H, W, C)
    res = feat.reshape(H * W, C).astype(jnp.float32)       # f32 running residual

    for i in range(num_blocks):                            # unrolled; blocks are few here
        x_in = res.astype(jnp.bfloat16).reshape(H, W, C)
        mid = jnp.maximum(_conv3x3(pad_ref, x_in, w1_ref[i], b1_ref[i]), 0.0)
        out = _conv3x3(pad_ref, mid.astype(jnp.bfloat16).reshape(H, W, C),
                       w2_ref[i], b2_ref[i])
        res = res + res_scale * out

    out = _conv3x3(pad_ref, res.astype(jnp.bfloat16).reshape(H, W, C),
                   wab_ref[...], bab_ref[...])
    y = out + feat.reshape(H * W, C).astype(jnp.float32)   # long skip fused
    o_ref[...] = y.reshape(H, W, C).astype(o_ref.dtype)


# ----------------------------------------------------------------------------
# Wrappers (one batch element per grid step, whole image per block)
# ----------------------------------------------------------------------------
def _compiler_params(vmem_est_bytes):
    try:
        cap = int(pltpu.get_tpu_info().vmem_capacity_bytes)
    except Exception:                                      # interpret / CPU fallback
        cap = 64 * 1024 * 1024                             # conservative (v7x per-TC)
    lim = int(min(max(2 * vmem_est_bytes, 32 * 1024 * 1024),
                  cap - 16 * 1024 * 1024))
    return pltpu.CompilerParams(dimension_semantics=("parallel",),
                                vmem_limit_bytes=lim)


def conv3x3(x, wp, bp, *, out_dtype=None):
    """3x3 'same' conv.  x: (N,H,W,Cin) NHWC bf16, wp: (9*Cin, Cout) bf16."""
    N, H, W, Cin = x.shape
    K, Cout = wp.shape
    assert K == 9 * Cin
    out_dtype = out_dtype or x.dtype
    bp = jnp.asarray(bp, jnp.float32).reshape(1, Cout)
    est = (2 * 2 * H * W * Cin + 2 * 2 * H * W * Cout      # bf16 in/out blocks, 2-buf
           + 2 * (H + 2) * (W + 2) * Cin                   # bf16 pad scratch
           + 2 * H * W * 9 * Cin + 4 * H * W * Cout        # im2col patch + f32 acc
           + 2 * 2 * K * Cout)                             # bf16 weights, 2-buf
    return pl.pallas_call(
        _conv3x3_kernel,
        out_shape=jax.ShapeDtypeStruct((N, H, W, Cout), out_dtype),
        grid_spec=pltpu.PrefetchScalarGridSpec(
            num_scalar_prefetch=0,
            grid=(N,),
            in_specs=[
                pl.BlockSpec((None, H, W, Cin), lambda n: (n, 0, 0, 0)),
                pl.BlockSpec((K, Cout), lambda n: (0, 0)),
                pl.BlockSpec((1, Cout), lambda n: (0, 0)),
            ],
            out_specs=pl.BlockSpec((None, H, W, Cout), lambda n: (n, 0, 0, 0)),
            scratch_shapes=[pltpu.VMEM((H + 2, W + 2, Cin), jnp.bfloat16)],
        ),
        compiler_params=_compiler_params(est),
    )(x, wp, bp)


def trunk(feat, eff, res_scale):
    """Fused residual trunk (all resblocks + conv_after_body + long skip)."""
    N, H, W, C = feat.shape
    w1s, b1s = eff["body_w1"], eff["body_b1"]
    w2s, b2s = eff["body_w2"], eff["body_b2"]
    wab, bab = eff["conv_after_body"]
    nb = w1s.shape[0]
    est = (2 * 2 * H * W * C * 2                           # bf16 in/out blocks, 2-buf
           + 2 * (H + 2) * (W + 2) * C                     # bf16 pad scratch
           + 2 * H * W * 9 * C                             # im2col patch
           + 3 * 4 * H * W * C                             # f32 res/acc/feat
           + 2 * (2 * nb + 1) * (2 * 9 * C * C + 4 * C))   # weights + biases, 2-buf
    kern = functools.partial(_trunk_kernel, num_blocks=nb,
                             res_scale=float(res_scale))
    return pl.pallas_call(
        kern,
        out_shape=jax.ShapeDtypeStruct((N, H, W, C), feat.dtype),
        grid_spec=pltpu.PrefetchScalarGridSpec(
            num_scalar_prefetch=0,
            grid=(N,),
            in_specs=[
                pl.BlockSpec((None, H, W, C), lambda n: (n, 0, 0, 0)),
                pl.BlockSpec((nb, 9 * C, C), lambda n: (0, 0, 0)),
                pl.BlockSpec((nb, 1, C), lambda n: (0, 0, 0)),
                pl.BlockSpec((nb, 9 * C, C), lambda n: (0, 0, 0)),
                pl.BlockSpec((nb, 1, C), lambda n: (0, 0, 0)),
                pl.BlockSpec((9 * C, C), lambda n: (0, 0)),
                pl.BlockSpec((1, C), lambda n: (0, 0)),
            ],
            out_specs=pl.BlockSpec((None, H, W, C), lambda n: (n, 0, 0, 0)),
            scratch_shapes=[pltpu.VMEM((H + 2, W + 2, C), jnp.bfloat16)],
        ),
        compiler_params=_compiler_params(est),
    )(feat, w1s, b1s, w2s, b2s, wab, bab)


# ----------------------------------------------------------------------------
# Glue ops (plain JAX; pure data movement)
# ----------------------------------------------------------------------------
def pixel_shuffle_nhwc(x, r):
    """NHWC equivalent of torch.pixel_shuffle (same channel ordering)."""
    N, H, W, C = x.shape
    Cout = C // (r * r)
    x = x.reshape(N, H, W, Cout, r, r)
    x = x.transpose(0, 1, 4, 2, 5, 3)
    return x.reshape(N, H * r, W * r, Cout)


# ----------------------------------------------------------------------------
# Parameter construction (deterministic, synthetic) and packing
# ----------------------------------------------------------------------------
def _init_conv(key, cin, cout, scale=0.05):
    kw, kb = jax.random.split(key)
    w = scale * jax.random.normal(kw, (3, 3, cin, cout), jnp.float32)
    b = scale * jax.random.normal(kb, (cout,), jnp.float32)
    return w, b


def init_edsr_params(key, in_channels, out_channels, mid_channels, num_blocks,
                     upscale_factor):
    keys = jax.random.split(key, 4 + 2 * num_blocks + 4)
    ki = iter(keys)
    params = {}
    params["conv_first"] = _init_conv(next(ki), in_channels, mid_channels)
    params["body"] = []
    for _ in range(num_blocks):
        params["body"].append({
            "conv1": _init_conv(next(ki), mid_channels, mid_channels),
            "conv2": _init_conv(next(ki), mid_channels, mid_channels),
        })
    params["conv_after_body"] = _init_conv(next(ki), mid_channels, mid_channels)
    params["upsample"] = []
    if (upscale_factor & (upscale_factor - 1)) == 0:
        for _ in range(int(math.log(upscale_factor, 2))):
            w, b = _init_conv(next(ki), mid_channels, mid_channels * 4)
            params["upsample"].append((w, b, 2))
    elif upscale_factor == 3:
        w, b = _init_conv(next(ki), mid_channels, mid_channels * 9)
        params["upsample"].append((w, b, 3))
    else:
        raise ValueError("unsupported scale")
    params["conv_last"] = _init_conv(next(ki), mid_channels, out_channels)
    return params


def prepare_params(params, rgb_mean, rgb_std):
    """Pack all weights to (9*Cin, Cout) bf16 for the wide-K kernels, stack the
    trunk weights for the fused trunk kernel, pad conv_first's Cin to a
    multiple of 8, and fold the output de-normalization into conv_last."""
    mean = jnp.asarray(rgb_mean, jnp.float32)
    std = jnp.asarray(rgb_std, jnp.float32)

    def pack(w, b):
        cin, cout = w.shape[2], w.shape[3]
        wp = jnp.asarray(w, jnp.float32).reshape(9 * cin, cout).astype(jnp.bfloat16)
        bp = jnp.asarray(b, jnp.float32).reshape(1, cout)
        return wp, bp

    eff = {"mean": mean, "std": std}

    # conv_first: zero-pad Cin (3 -> 8) so the wide-K path applies (K=72).
    w, b = params["conv_first"]
    cin = w.shape[2]
    cin_pad = -(-cin // 8) * 8
    w = jnp.pad(w, ((0, 0), (0, 0), (0, cin_pad - cin), (0, 0)))
    eff["cin_pad"] = cin_pad
    eff["conv_first"] = pack(w, b)

    w1, b1, w2, b2 = [], [], [], []
    for blk in params["body"]:
        wp, bp = pack(*blk["conv1"]); w1.append(wp); b1.append(bp)
        wp, bp = pack(*blk["conv2"]); w2.append(wp); b2.append(bp)
    eff["body_w1"] = jnp.stack(w1); eff["body_b1"] = jnp.stack(b1)
    eff["body_w2"] = jnp.stack(w2); eff["body_b2"] = jnp.stack(b2)

    eff["conv_after_body"] = pack(*params["conv_after_body"])
    eff["upsample"] = [(*pack(w, b), r) for (w, b, r) in params["upsample"]]

    # Output de-normalization folded into conv_last: exact (no padding interplay).
    w, b = params["conv_last"]
    eff["conv_last"] = pack(w * std[None, None, None, :], b * std + mean)
    return eff


# ----------------------------------------------------------------------------
# EDSR forward (Pallas kernels for every conv; trunk fully fused)
# ----------------------------------------------------------------------------
def edsr_forward(x_nchw, eff, res_scale):
    mean, std = eff["mean"], eff["std"]
    x = jnp.transpose(x_nchw, (0, 2, 3, 1)).astype(jnp.float32)   # NCHW -> NHWC
    x = (x - mean) / std               # explicit normalization: zero padding then
    cin = x.shape[-1]                  # sees 0 in the normalized domain (PyTorch-exact)
    if eff["cin_pad"] > cin:
        x = jnp.pad(x, ((0, 0), (0, 0), (0, 0), (0, eff["cin_pad"] - cin)))
    x = x.astype(jnp.bfloat16)

    feat = conv3x3(x, *eff["conv_first"])
    res = trunk(feat, eff, res_scale)                 # fused trunk + long skip
    up = res
    for (wp, bp, r) in eff["upsample"]:
        up = conv3x3(up, wp, bp)
        up = pixel_shuffle_nhwc(up, r)                # TODO(synk): fuse into conv output write
    out = conv3x3(up, *eff["conv_last"], out_dtype=jnp.float32)   # denorm folded in
    return jnp.transpose(out, (0, 3, 1, 2))           # back to NCHW


# ----------------------------------------------------------------------------
# Reference for verification (fp32, PyTorch semantics, un-folded params)
# ----------------------------------------------------------------------------
def _ref_conv(x, w, b, relu=False):
    y = lax.conv_general_dilated(
        x, w, (1, 1), "SAME",
        dimension_numbers=("NHWC", "HWIO", "NHWC"),
        preferred_element_type=jnp.float32) + b
    return jnp.maximum(y, 0.0) if relu else y


def edsr_reference_f32(x_nchw, params, rgb_mean, rgb_std, res_scale):
    mean = jnp.asarray(rgb_mean, jnp.float32)
    std = jnp.asarray(rgb_std, jnp.float32)
    x = jnp.transpose(x_nchw, (0, 2, 3, 1))
    x = (x - mean) / std
    feat = _ref_conv(x, *params["conv_first"])
    res = feat
    for blk in params["body"]:
        out = _ref_conv(res, *blk["conv1"], relu=True)
        out = _ref_conv(out, *blk["conv2"])
        res = res + res_scale * out
    res = _ref_conv(res, *params["conv_after_body"]) + feat
    up = res
    for (w, b, r) in params["upsample"]:
        up = _ref_conv(up, w, b)
        up = pixel_shuffle_nhwc(up, r)
    out = _ref_conv(up, *params["conv_last"])
    out = out * std + mean
    return jnp.transpose(out, (0, 3, 1, 2))


# ----------------------------------------------------------------------------
if __name__ == "__main__":
    # Small but faithful EDSR configuration.
    N, in_ch, out_ch, Himg, Wimg = 2, 3, 3, 16, 16
    mid_channels, num_blocks, upscale_factor, res_scale = 32, 2, 2, 1.0
    rgb_mean = [0.4488, 0.4371, 0.404]
    rgb_std = [1.0, 1.0, 1.0]

    key = jax.random.PRNGKey(0)
    k_params, k_x = jax.random.split(key)
    params = init_edsr_params(k_params, in_ch, out_ch, mid_channels,
                              num_blocks, upscale_factor)
    x = jax.random.normal(k_x, (N, in_ch, Himg, Wimg), jnp.float32)

    eff = prepare_params(params, rgb_mean, rgb_std)

    y = edsr_forward(x, eff, res_scale)
    y = jax.block_until_ready(y)

    assert y.shape == (N, out_ch, Himg * upscale_factor, Wimg * upscale_factor)
    assert y.dtype == jnp.float32

    # PyTorch-semantics fp32 reference (un-folded params, explicit (de)norm).
    y_ref = edsr_reference_f32(x, params, rgb_mean, rgb_std, res_scale)
    assert jnp.allclose(y, y_ref, atol=5e-2, rtol=5e-2), "mismatch vs fp32 reference"

    print("KERNEL_OK")
</pallas_src>

<mosaic_0001>
module attributes {stable_mosaic.version = 11 : i64} {
  func.func @_conv3x3_kernel(%arg0: i32, %arg1: memref<1x16x16x8xbf16, #tpu.memory_space<vmem>>, %arg2: memref<72x32xbf16, #tpu.memory_space<vmem>>, %arg3: memref<1x32xf32, #tpu.memory_space<vmem>>, %arg4: memref<1x16x16x32xbf16, #tpu.memory_space<vmem>>, %arg5: memref<18x18x8xbf16, #tpu.memory_space<vmem>>) attributes {dimension_semantics = [#tpu.dimension_semantics<parallel>], iteration_bounds = array<i64: 2>, scalar_prefetch = 0 : i64, scratch_operands = 1 : i64, tpu.core_type = #tpu.core_type<tc>, window_params = [{transform_indices = @transform_0, window_bounds = array<i64: 1, 16, 16, 8>}, {pipeline_mode = #tpu.pipeline_mode<synchronous>, transform_indices = @transform_1, window_bounds = array<i64: 72, 32>}, {pipeline_mode = #tpu.pipeline_mode<synchronous>, transform_indices = @transform_2, window_bounds = array<i64: 1, 32>}, {transform_indices = @transform_3, window_bounds = array<i64: 1, 16, 16, 32>}]} {
    %cst = arith.constant 0.000000e+00 : bf16
    %0 = vector.broadcast %cst : bf16 to vector<1x18x8xbf16>
    %cst_0 = arith.constant 0.000000e+00 : bf16
    %1 = vector.broadcast %cst_0 : bf16 to vector<18x1x8xbf16>
    %c0 = arith.constant 0 : index
    %c0_1 = arith.constant 0 : index
    %c0_2 = arith.constant 0 : index
    %2 = vector.load %arg5[%c0, %c0_1, %c0_2] : memref<18x18x8xbf16, #tpu.memory_space<vmem>>, vector<1x18x8xbf16>
    tpu.vector_store %arg5[%c0, %c0_1, %c0_2], %0 {strides = array<i32>} : memref<18x18x8xbf16, #tpu.memory_space<vmem>>, vector<1x18x8xbf16>,
    %c17 = arith.constant 17 : index
    %c0_3 = arith.constant 0 : index
    %c0_4 = arith.constant 0 : index
    %3 = vector.load %arg5[%c17, %c0_3, %c0_4] : memref<18x18x8xbf16, #tpu.memory_space<vmem>>, vector<1x18x8xbf16>
    tpu.vector_store %arg5[%c17, %c0_3, %c0_4], %0 {strides = array<i32>} : memref<18x18x8xbf16, #tpu.memory_space<vmem>>, vector<1x18x8xbf16>,
    %c0_5 = arith.constant 0 : index
    %c0_6 = arith.constant 0 : index
    %c0_7 = arith.constant 0 : index
    %4 = vector.load %arg5[%c0_5, %c0_6, %c0_7] : memref<18x18x8xbf16, #tpu.memory_space<vmem>>, vector<18x1x8xbf16>
    tpu.vector_store %arg5[%c0_5, %c0_6, %c0_7], %1 {strides = array<i32>} : memref<18x18x8xbf16, #tpu.memory_space<vmem>>, vector<18x1x8xbf16>,
    %c0_8 = arith.constant 0 : index
    %c17_9 = arith.constant 17 : index
    %c0_10 = arith.constant 0 : index
    %5 = vector.load %arg5[%c0_8, %c17_9, %c0_10] : memref<18x18x8xbf16, #tpu.memory_space<vmem>>, vector<18x1x8xbf16>
    tpu.vector_store %arg5[%c0_8, %c17_9, %c0_10], %1 {strides = array<i32>} : memref<18x18x8xbf16, #tpu.memory_space<vmem>>, vector<18x1x8xbf16>,
    %c0_11 = arith.constant 0 : index
    %c0_12 = arith.constant 0 : index
    %c0_13 = arith.constant 0 : index
    %c0_14 = arith.constant 0 : index
    %6 = vector.load %arg1[%c0_11, %c0_12, %c0_13, %c0_14] : memref<1x16x16x8xbf16, #tpu.memory_space<vmem>>, vector<1x16x16x8xbf16>
    %7 = vector.shape_cast %6 : vector<1x16x16x8xbf16> to vector<16x16x8xbf16>
    %c0_15 = arith.constant 0 : index
    %c0_16 = arith.constant 0 : index
    %8 = vector.load %arg2[%c0_15, %c0_16] : memref<72x32xbf16, #tpu.memory_space<vmem>>, vector<72x32xbf16>
    %c0_17 = arith.constant 0 : index
    %c0_18 = arith.constant 0 : index
    %9 = vector.load %arg3[%c0_17, %c0_18] : memref<1x32xf32, #tpu.memory_space<vmem>>, vector<1x32xf32>
    %c1 = arith.constant 1 : index
    %c1_19 = arith.constant 1 : index
    %c0_20 = arith.constant 0 : index
    %10 = vector.load %arg5[%c1, %c1_19, %c0_20] : memref<18x18x8xbf16, #tpu.memory_space<vmem>>, vector<16x16x8xbf16>
    tpu.vector_store %arg5[%c1, %c1_19, %c0_20], %7 {strides = array<i32>} : memref<18x18x8xbf16, #tpu.memory_space<vmem>>, vector<16x16x8xbf16>,
    %c0_21 = arith.constant 0 : index
    %c0_22 = arith.constant 0 : index
    %c0_23 = arith.constant 0 : index
    %11 = vector.load %arg5[%c0_21, %c0_22, %c0_23] : memref<18x18x8xbf16, #tpu.memory_space<vmem>>, vector<16x16x8xbf16>
    %12 = vector.shape_cast %11 : vector<16x16x8xbf16> to vector<256x8xbf16>
    %c0_24 = arith.constant 0 : index
    %c1_25 = arith.constant 1 : index
    %c0_26 = arith.constant 0 : index
    %13 = vector.load %arg5[%c0_24, %c1_25, %c0_26] : memref<18x18x8xbf16, #tpu.memory_space<vmem>>, vector<16x16x8xbf16>
    %14 = vector.shape_cast %13 : vector<16x16x8xbf16> to vector<256x8xbf16>
    %c0_27 = arith.constant 0 : index
    %c2 = arith.constant 2 : index
    %c0_28 = arith.constant 0 : index
    %15 = vector.load %arg5[%c0_27, %c2, %c0_28] : memref<18x18x8xbf16, #tpu.memory_space<vmem>>, vector<16x16x8xbf16>
    %16 = vector.shape_cast %15 : vector<16x16x8xbf16> to vector<256x8xbf16>
    %c1_29 = arith.constant 1 : index
    %c0_30 = arith.constant 0 : index
    %c0_31 = arith.constant 0 : index
    %17 = vector.load %arg5[%c1_29, %c0_30, %c0_31] : memref<18x18x8xbf16, #tpu.memory_space<vmem>>, vector<16x16x8xbf16>
    %18 = vector.shape_cast %17 : vector<16x16x8xbf16> to vector<256x8xbf16>
    %c1_32 = arith.constant 1 : index
    %c1_33 = arith.constant 1 : index
    %c0_34 = arith.constant 0 : index
    %19 = vector.load %arg5[%c1_32, %c1_33, %c0_34] : memref<18x18x8xbf16, #tpu.memory_space<vmem>>, vector<16x16x8xbf16>
    %20 = vector.shape_cast %19 : vector<16x16x8xbf16> to vector<256x8xbf16>
    %c1_35 = arith.constant 1 : index
    %c2_36 = arith.constant 2 : index
    %c0_37 = arith.constant 0 : index
    %21 = vector.load %arg5[%c1_35, %c2_36, %c0_37] : memref<18x18x8xbf16, #tpu.memory_space<vmem>>, vector<16x16x8xbf16>
    %22 = vector.shape_cast %21 : vector<16x16x8xbf16> to vector<256x8xbf16>
    %c2_38 = arith.constant 2 : index
    %c0_39 = arith.constant 0 : index
    %c0_40 = arith.constant 0 : index
    %23 = vector.load %arg5[%c2_38, %c0_39, %c0_40] : memref<18x18x8xbf16, #tpu.memory_space<vmem>>, vector<16x16x8xbf16>
    %24 = vector.shape_cast %23 : vector<16x16x8xbf16> to vector<256x8xbf16>
    %c2_41 = arith.constant 2 : index
    %c1_42 = arith.constant 1 : index
    %c0_43 = arith.constant 0 : index
    %25 = vector.load %arg5[%c2_41, %c1_42, %c0_43] : memref<18x18x8xbf16, #tpu.memory_space<vmem>>, vector<16x16x8xbf16>
    %26 = vector.shape_cast %25 : vector<16x16x8xbf16> to vector<256x8xbf16>
    %c2_44 = arith.constant 2 : index
    %c2_45 = arith.constant 2 : index
    %c0_46 = arith.constant 0 : index
    %27 = vector.load %arg5[%c2_44, %c2_45, %c0_46] : memref<18x18x8xbf16, #tpu.memory_space<vmem>>, vector<16x16x8xbf16>
    %28 = vector.shape_cast %27 : vector<16x16x8xbf16> to vector<256x8xbf16>
    %29 = tpu.concatenate %12, %14, %16, %18, %20, %22, %24, %26, %28 in 1 : vector<256x8xbf16>, vector<256x8xbf16>, vector<256x8xbf16>, vector<256x8xbf16>, vector<256x8xbf16>, vector<256x8xbf16>, vector<256x8xbf16>, vector<256x8xbf16>, vector<256x8xbf16> -> vector<256x72xbf16>
    %cst_47 = arith.constant dense<0.000000e+00> : vector<256x32xf32>
    %30 = tpu.matmul %29, %8, %cst_47 {dimension_numbers = #tpu.dot_dimension_numbers<[1], [0], [0], [1], [0, 0, 1, 1], [], []>} : vector<256x72xbf16>, vector<72x32xbf16>, vector<256x32xf32> -> vector<256x32xf32>
    %31 = vector.broadcast %9 : vector<1x32xf32> to vector<256x32xf32>
    %32 = arith.addf %30, %31 : vector<256x32xf32>
    %33 = vector.shape_cast %32 : vector<256x32xf32> to vector<16x16x32xf32>
    %34 = arith.truncf %33 : vector<16x16x32xf32> to vector<16x16x32xbf16>
    %c0_48 = arith.constant 0 : index
    %c0_49 = arith.constant 0 : index
    %c0_50 = arith.constant 0 : index
    %c0_51 = arith.constant 0 : index
    %35 = vector.load %arg4[%c0_48, %c0_49, %c0_50, %c0_51] : memref<1x16x16x32xbf16, #tpu.memory_space<vmem>>, vector<1x16x16x32xbf16>
    %36 = vector.shape_cast %35 : vector<1x16x16x32xbf16> to vector<16x16x32xbf16>
    %37 = vector.shape_cast %34 : vector<16x16x32xbf16> to vector<1x16x16x32xbf16>
    tpu.vector_store %arg4[%c0_48, %c0_49, %c0_50, %c0_51], %37 {strides = array<i32>} : memref<1x16x16x32xbf16, #tpu.memory_space<vmem>>, vector<1x16x16x32xbf16>,
    return
  }
  func.func @transform_0(%arg0: i32) -> (i32, i32, i32, i32) {
    %c0_i32 = arith.constant 0 : i32
    %c0_i32_0 = arith.constant 0 : i32
    %c0_i32_1 = arith.constant 0 : i32
    %c0_i32_2 = arith.constant 0 : i32
    return %arg0, %c0_i32, %c0_i32_0, %c0_i32_1 : i32, i32, i32, i32
  }
  func.func @transform_1(%arg0: i32) -> (i32, i32) {
    %c0_i32 = arith.constant 0 : i32
    %c0_i32_0 = arith.constant 0 : i32
    %c0_i32_1 = arith.constant 0 : i32
    return %c0_i32, %c0_i32_0 : i32, i32
  }
  func.func @transform_2(%arg0: i32) -> (i32, i32) {
    %c0_i32 = arith.constant 0 : i32
    %c0_i32_0 = arith.constant 0 : i32
    %c0_i32_1 = arith.constant 0 : i32
    return %c0_i32, %c0_i32_0 : i32, i32
  }
  func.func @transform_3(%arg0: i32) -> (i32, i32, i32, i32) {
    %c0_i32 = arith.constant 0 : i32
    %c0_i32_0 = arith.constant 0 : i32
    %c0_i32_1 = arith.constant 0 : i32
    %c0_i32_2 = arith.constant 0 : i32
    return %arg0, %c0_i32, %c0_i32_0, %c0_i32_1 : i32, i32, i32, i32
  }
}

</mosaic_0001>

<bundles_post_ra>
// kernel: tpu_custom_call.1
= control target key start
LH: loop header
LB: loop body
LE: loop exit
PB: predicated region body
PF: predicated region fallthrough
CT: control target
= control target key end

     0   :  { %8 = vsyncpa [#allocation4], 0  ;;  %s6371_s0 = inlined_call_operand.vmem [shape: bf16[2,16,16,8], index: 0, kind: input, shape index: {}]   ;;  %s6372_s1 = inlined_call_operand.vmem [shape: bf16[72,32], index: 1, kind: input, shape index: {}]   ;;  %s6373_s2 = inlined_call_operand.vmem [shape: f32[1,32], index: 2, kind: input, shape index: {}]   ;;  %s6374_s3 = inlined_call_operand.hbm [shape: bf16[2,16,16,32], index: 3, kind: output, shape index: {}]  }
   0x1   :  { %10 = vsyncpa [#allocation4 + $0x1], 0  ;;  %s4425_s12 = smov 0   ;;  %s4427_s13 = smov 0  }
   0x2   :  { %s4429_s14 = smov 0   ;;  %s4431_s15 = smov 0  }
   0x3 LB: > { %s4446_s16 = sadd.s32 4294967295, %s4393_s15   ;;  %s3917_s17 = sadd.s32 4294967294, %s4393_s15   ;;  %s4393_s15 = sphi %s4431_s15, %s6392_s15   ;;  %s4389_s14 = sphi %s4429_s14, %s6391_s14   ;;  %s4385_s13 = sphi %s4427_s13, %s6390_s13   ;;  %s4381_s12 = sphi %s4425_s12, %s6389_s12  }
   0x4   : > { %s4450_s18 = sadd.s32 1, %s4393_s15   ;;  %s91_s19 = sadd.s32 1, %s4389_s14 }
   0x5   : > { %s88_s20 = ssub.s32 %s4393_s15, %s4450_s18  ;;  %p101_p0 = scmp.ne.s32.totalorder %s4389_s14, %s4385_s13 }
   0x6   : > { %p89_p1 = scmp.eq.s32.totalorder %s88_s20, 0  ;;  %p102_p2 = scmp.eq.s32.totalorder %s4446_s16, 1 }
   0x7   : > { %p107_p3 = scmp.ne.s32.totalorder %s4385_s13, %s4381_s12  ;;  %p108_p4 = scmp.eq.s32.totalorder %s3917_s17, 1 }
   0x8   : > { %s4461_s21 = scalar_select %p89_p1, %s4389_s14, %s91_s19  }
   0x9   : > { %p4463_p5 = por %p102_p2, %p101_p0  ;;  %p4467_p6 = por %p108_p4, %p107_p3 }
   0xa   : > { %p3920_p7 = scmp.ge.s32.totalorder %s4393_s15, 1  ;;  %p140_p8 = scmp.lt.s32.totalorder %s4393_s15, 3 }
   0xc   : > { %p141_p9 = pnand %p3920_p7, %p140_p8 }
   0xd   : > { %p164_p10 = scmp.lt.s32.totalorder (!%p141_p9), %s4446_s16, 1  ;;  %s4396_s29 = smov (!%p141_p9), 8  }
   0xe   : > { %144 = sbr.rel (%p141_p9) target bundleno = 738 (0x2e2), region = 32  ;;  %s4397_s30 = smov (!%p141_p9), 16  }
   0xf   : > { %s4398_s4 = smov (!%p141_p9), 24   ;;  %s4399_s5 = smov (!%p141_p9), 32  }
  0x10   : > { %s4400_s6 = smov (!%p141_p9), 48   ;;  %s4401_s7 = smov (!%p141_p9), 40  }
  0x11   : > { %s4402_s8 = smov (!%p141_p9), 56   ;;  %s4403_s9 = smov (!%p141_p9), 64  }
  0x12   : > { %s4351_s27 = scalar_lea.hbm (!%p141_p9), %s6374_s3, 256 }
  0x13   : > { %vm170_vm0 = vcmask 60416   ;;  %vm173_vm1 = vcmask 57344   ;;  %vm180_vm2 = vsmask.f32 256  ;;  %v4395_v0 = vmov 0   ;;  %s165_s24 = scalar_select %p164_p10, %s4446_s16, 1 }
  0x14   : > { %171 = vst.msk [vmem:[#allocation2] sm:$0xf] %vm170_vm0, %v4395_v0  ;;  %vm4476_vm3 = vmand %vm173_vm1, %vm180_vm2  ;;  %vm236_vm4 = vsmask.f32 7938  ;;  %v194_v3 = vld [vmem:[#allocation2 + $0x30] sm:$0x1] }
  0x15   : > { %172 = vst.msk [vmem:[#allocation2 + $0x4] sm:$0xf] %vm170_vm0, %v4395_v0  ;;  %vm4483_vm5 = vmand %vm173_vm1, %vm236_vm4  ;;  %v250_v4 = vld [vmem:[#allocation2 + $0x38] sm:$0x1]  ;;  %v195_v5 = vsel %vm4476_vm3, 0, %v194_v3  ;;  %s4201_s25 = sshll.u32 %s165_s24, 7 }
  0x16   : > { %174 = vst.msk [vmem:[#allocation2 + $0x8] sm:$0x1] %vm173_vm1, %v4395_v0  ;;  %v251_v6 = vsel %vm4483_vm5, 0, %v250_v4  ;;  %vm334_vm6 = vsmask.f32 4368  ;;  %s4500_s28 = scalar_lea.vmem %s6371_s0, %s4201_s25  ;;  %vm4514_vm8 = vmand %vm170_vm0, %vm236_vm4  ;;  %vm1270_vm12 = vcmask 1042432  }
  0x17   : > { %176 = vst.msk [vmem:[#allocation2 + $0xcc] sm:$0xf] %vm170_vm0, %v4395_v0  ;;  %v188_v7 = vld [vmem:[#allocation2 + $0x18] sm:$0x1]  ;;  %v244_v8 = vld [vmem:[#allocation2 + $0x20] sm:$0x1]  ;;  %vm4525_vm9 = vmor %vm180_vm2, %vm334_vm6 }
  0x18   : > { %177 = vst.msk [vmem:[#allocation2 + $0xd0] sm:$0xf] %vm170_vm0, %v4395_v0  ;;  %v189_v9 = vsel %vm4476_vm3, 0, %v188_v7  ;;  %v245_v10 = vsel %vm4483_vm5, 0, %v244_v8  ;;  %v185_v11 = vld [vmem:[#allocation2 + $0xc] sm:$0x1] }
  0x19   : > { %178 = vst.msk [vmem:[#allocation2 + $0xd4] sm:$0x1] %vm173_vm1, %v4395_v0  ;;  %v298_v13 = vld [vmem:[%s4500_s28 + $0x18] sm:$0xf]  ;;  %v299_v16 = vld [vmem:[%s4500_s28 + $0x1c] sm:$0xf] }
  0x1a   : > { %196 = vst [vmem:[#allocation2 + $0x30] sm:$0x1] %v195_v5  ;;  %v388_v17 = vshrl.u32 %v298_v13, 16  ;;  %vm819_vm7 = vsmask.f32 3328  ;;  %v391_v23 = vshll.u32 %v298_v13, 16 }
  0x1b   : > { %v182_v12 = vld [vmem:[#allocation2] sm:$0x1]  ;;  %252 = vst [vmem:[#allocation2 + $0x38] sm:$0x1] %v251_v6  ;;  %v396_v24 = vshrl.u32 %v299_v16, 16  ;;  %v399_v28 = vshll.u32 %v299_v16, 16 }
  0x1c   : > { %v183_v14 = vsel %vm4476_vm3, 0, %v182_v12  ;;  %v772_v15 = vld [vmem:[#allocation2 + $0x4] sm:$0xf]  ;;  %v390_v22 = vrot.slane %v388_v17, 7  ;;  %190 = vst [vmem:[#allocation2 + $0x18] sm:$0x1] %v189_v9 }
  0x1d   : > { %184 = vst [vmem:[#allocation2] sm:$0x1] %v183_v14  ;;  %v238_v18 = vld [vmem:[#allocation2 + $0x8] sm:$0x1]  ;;  %v832_v19 = vshll.u32 %v772_v15, 16  ;;  %v836_v20 = vshrl.u32 %v772_v15, 16 }
  0x1e   : > { %v239_v21 = vsel %vm4483_vm5, 0, %v238_v18  ;;  %v186_v29 = vsel %vm4476_vm3, 0, %v185_v11  ;;  %v393_v30 = vor.u32 %v391_v23, %v390_v22  ;;  %v394_v31 = vrot.slane %v390_v22, 4  ;;  %246 = vst [vmem:[#allocation2 + $0x20] sm:$0x1] %v245_v10 }
  0x1f   : > { %240 = vst [vmem:[#allocation2 + $0x8] sm:$0x1] %v239_v21  ;;  %v4518_v26 = vrot.slane %v832_v19, 5  ;;  %v838_v27 = vrot.slane %v836_v20, 4  ;;  %v398_v32 = vrot.slane %v396_v24, 7  ;;  %vm1271_vm13 = vcmask 1046532  }
  0x20   : > { %v294_v33 = vld [vmem:[%s4500_s28 + $0x8] sm:$0xf]  ;;  %v295_v36 = vld [vmem:[%s4500_s28 + $0xc] sm:$0xf]  ;;  %187 = vst [vmem:[#allocation2 + $0xc] sm:$0x1] %v186_v29  ;;  %vm4859_vm14 = vmor %vm1270_vm12, %vm1271_vm13 }
  0x21   : > { %v680_v35 = vld [vmem:[#allocation2 + $0x30] sm:$0xf]  ;;  %v354_v37 = vshrl.u32 %v294_v33, 16  ;;  %v357_v38 = vshll.u32 %v294_v33, 16  ;;  %v401_v39 = vor.u32 %v399_v28, %v398_v32  ;;  %v403_v40 = vrot.slane %v398_v32, 4 }
  0x22   : > { %v681_v41 = vsel %vm4514_vm8, %v393_v30, %v680_v35  ;;  %v684_v42 = vld [vmem:[#allocation2 + $0x38] sm:$0x1]  ;;  %v362_v43 = vshrl.u32 %v295_v36, 16  ;;  %vm820_vm10 = vsmask.f32 7440  ;;  %v839_v44 = vor.u32 %v838_v27, %v4518_v26 }
  0x23   : > { %682 = vst [vmem:[#allocation2 + $0x30] sm:$0xf] %v681_v41  ;;  %v356_v45 = vrot.slane %v354_v37, 7  ;;  %v365_v46 = vshll.u32 %v295_v36, 16  ;;  %v402_v48 = vsel %vm4525_vm9, %v394_v31, %v401_v39  ;;  %v685_v49 = vsel %vm4476_vm3, %v403_v40, %v684_v42  ;;  %v241_v51 = vld [vmem:[#allocation2 + $0x14] sm:$0x1]  ;;  %vm4542_vm11 = vmor %vm819_vm7, %vm820_vm10 }
  0x24   : > { %v771_v47 = vld [vmem:[#allocation2] sm:$0xf]  ;;  %v364_v50 = vrot.slane %v362_v43, 7  ;;  %683 = vst.msk [vmem:[#allocation2 + $0x34] sm:$0xf] %vm170_vm0, %v402_v48  ;;  %v242_v59 = vsel %vm4483_vm5, 0, %v241_v51 }
  0x25   : > { %v823_v52 = vshrl.u32 %v771_v47, 16  ;;  %v826_v53 = vshll.u32 %v771_v47, 16  ;;  %v359_v54 = vor.u32 %v357_v38, %v356_v45  ;;  %v360_v55 = vrot.slane %v356_v45, 4  ;;  %686 = vst [vmem:[#allocation2 + $0x38] sm:$0x1] %v685_v49 }
  0x26   : > { %v803_v56 = vld [vmem:[#allocation2 + $0x8] sm:$0x1]  ;;  %v367_v57 = vor.u32 %v365_v46, %v364_v50  ;;  %v369_v58 = vrot.slane %v364_v50, 4  ;;  %v840_v62 = vrot.slane %v839_v44, 4  ;;  %v666_v0 = vld [vmem:[#allocation2 + $0x18] sm:$0xf] }
  0x27   : > { %v825_v60 = vrot.slane %v823_v52, 4  ;;  %v828_v61 = vrot.slane %v826_v53, 5  ;;  %v842_v63 = vshll.u32 %v803_v56, 16  ;;  %v667_v5 = vsel %vm4514_vm8, %v359_v54, %v666_v0  ;;  %v670_v6 = vld [vmem:[#allocation2 + $0x20] sm:$0x1] }
  0x28   : > { %v368_v4 = vsel %vm4525_vm9, %v360_v55, %v367_v57  ;;  %243 = vst [vmem:[#allocation2 + $0x14] sm:$0x1] %v242_v59  ;;  %v292_v7 = vld [vmem:[%s4500_s28] sm:$0xf]  ;;  %v671_v10 = vsel %vm4476_vm3, %v369_v58, %v670_v6  ;;  %v293_v11 = vld [vmem:[%s4500_s28 + $0x4] sm:$0xf] }
  0x29   : > { %v829_v8 = vor.u32 %v828_v61, %v825_v60  ;;  %v844_v9 = vrot.slane %v842_v63, 5  ;;  %668 = vst [vmem:[#allocation2 + $0x18] sm:$0xf] %v667_v5  ;;  %v337_v12 = vshrl.u32 %v292_v7, 16  ;;  %v340_v14 = vshll.u32 %v292_v7, 16 }
  0x2a   : > { %v779_v13 = vld [vmem:[#allocation2 + $0x30] sm:$0xf]  ;;  %669 = vst.msk [vmem:[#allocation2 + $0x1c] sm:$0xf] %vm170_vm0, %v368_v4  ;;  %v345_v15 = vshrl.u32 %v293_v11, 16  ;;  %v348_v24 = vshll.u32 %v293_v11, 16 }
  0x2b   : > { %v830_v16 = vrot.slane %v829_v8, 4  ;;  %v845_v17 = vsel %vm4542_vm11, %v840_v62, %v844_v9  ;;  %v919_v18 = vshrl.u32 %v779_v13, 16  ;;  %v922_v19 = vshll.u32 %v779_v13, 16  ;;  %672 = vst [vmem:[#allocation2 + $0x20] sm:$0x1] %v671_v10 }
  0x2c   : > { %v2667_v20 = vunpack.c.l.b16 %v845_v17  ;;  %v780_v21 = vld [vmem:[#allocation2 + $0x34] sm:$0xf]  ;;  %v339_v22 = vrot.slane %v337_v12, 7  ;;  %v347_v23 = vrot.slane %v345_v15, 7  ;;  %v807_v28 = vld [vmem:[#allocation2 + $0x38] sm:$0x1] }
  0x2d   : > { %v835_v27 = vsel %vm4542_vm11, %v830_v16, %v4518_v26  ;;  %v921_v29 = vrot.slane %v919_v18, 4  ;;  %v924_v30 = vrot.slane %v922_v19, 5  ;;  %v928_v31 = vshll.u32 %v780_v21, 16  ;;  %v659_v41 = vld [vmem:[#allocation2 + $0xc] sm:$0xf] }
  0x2e   : > { %v2666_v32 = vunpack.c.l.b16 %v835_v27  ;;  %v932_v33 = vshrl.u32 %v780_v21, 16  ;;  %v938_v35 = vshll.u32 %v807_v28, 16  ;;  %v342_v36 = vor.u32 %v340_v14, %v339_v22  ;;  %v197_v26 = vld [vmem:[#allocation2 + $0x3c] sm:$0x1]  ;;  %v253_v53 = vld [vmem:[#allocation2 + $0x44] sm:$0x1] }
  0x2f   : > { %v925_v37 = vor.u32 %v924_v30, %v921_v29  ;;  %v930_v38 = vrot.slane %v928_v31, 5  ;;  %v343_v39 = vrot.slane %v339_v22, 4  ;;  %v350_v40 = vor.u32 %v348_v24, %v347_v23  ;;  %v663_v47 = vld [vmem:[#allocation2 + $0x14] sm:$0x1]  ;;  %v300_v6 = vld [vmem:[%s4500_s28 + $0x20] sm:$0xf] }
  0x30   : > { %v2698_v42 = vpack.c.b16 %v2667_v20, %v2666_v32  ;;  %v934_v43 = vrot.slane %v932_v33, 4  ;;  %v940_v44 = vrot.slane %v938_v35, 5  ;;  %v775_v45 = vld [vmem:[#allocation2 + $0x18] sm:$0xf]  ;;  %v352_v46 = vrot.slane %v347_v23, 4 }
  0x31   : > { %v926_v48 = vrot.slane %v925_v37, 4  ;;  %v776_v49 = vld [vmem:[#allocation2 + $0x1c] sm:$0xf]  ;;  %v871_v50 = vshrl.u32 %v775_v45, 16  ;;  %v874_v51 = vshll.u32 %v775_v45, 16  ;;  %v351_v52 = vsel %vm4525_vm9, %v343_v39, %v350_v40 }
  0x32   : > { %2714 = vrot.lane.b32.xlu0 %v2698_v42, %s4396_s29  ;;  %v935_v54 = vor.u32 %v934_v43, %v930_v38  ;;  %v805_v55 = vld [vmem:[#allocation2 + $0x20] sm:$0x1]  ;;  %v880_v56 = vshll.u32 %v776_v49, 16  ;;  %v884_v57 = vshrl.u32 %v776_v49, 16  ;;  %v660_v58 = vsel %vm4514_vm8, %v342_v36, %v659_v41  ;;  %662 = vst.msk [vmem:[#allocation2 + $0x10] sm:$0xf] %vm170_vm0, %v351_v52 }
  0x33   : > { %v931_v59 = vsel %vm4542_vm11, %v926_v48, %v930_v38  ;;  %v873_v60 = vrot.slane %v871_v50, 4  ;;  %v876_v61 = vrot.slane %v874_v51, 5  ;;  %v890_v62 = vshll.u32 %v805_v55, 16  ;;  %661 = vst [vmem:[#allocation2 + $0xc] sm:$0xf] %v660_v58 }
  0x34   : > { %v936_v63 = vrot.slane %v935_v54, 4  ;;  %v2674_v0 = vunpack.c.l.b16 %v931_v59  ;;  %v882_v4 = vrot.slane %v880_v56, 5  ;;  %v886_v5 = vrot.slane %v884_v57, 4  ;;  %v301_v11 = vld [vmem:[%s4500_s28 + $0x24] sm:$0xf] }
  0x35   : > { %v877_v7 = vor.u32 %v876_v61, %v873_v60  ;;  %v892_v8 = vrot.slane %v890_v62, 5  ;;  %v664_v9 = vsel %vm4476_vm3, %v352_v46, %v663_v47  ;;  %v198_v10 = vsel %vm4476_vm3, 0, %v197_v26  ;;  %v191_v12 = vld [vmem:[#allocation2 + $0x24] sm:$0x1]  ;;  %v247_v17 = vld [vmem:[#allocation2 + $0x2c] sm:$0x1] }
  0x36   : > { %v941_v13 = vsel %vm4542_vm11, %v936_v63, %v940_v44  ;;  %v887_v14 = vor.u32 %v886_v5, %v882_v4  ;;  %665 = vst [vmem:[#allocation2 + $0x14] sm:$0x1] %v664_v9  ;;  %v254_v15 = vsel %vm4483_vm5, 0, %v253_v53  ;;  %v405_v16 = vshrl.u32 %v300_v6, 16  ;;  %v296_v43 = vld [vmem:[%s4500_s28 + $0x10] sm:$0xf] }
  0x37   : > { %v2675_v18 = vunpack.c.l.b16 %v941_v13  ;;  %v878_v19 = vrot.slane %v877_v7, 4  ;;  %199 = vst [vmem:[#allocation2 + $0x3c] sm:$0x1] %v198_v10  ;;  %v408_v20 = vshll.u32 %v300_v6, 16  ;;  %v413_v21 = vshrl.u32 %v301_v11, 16 }
  0x38   : > { %v888_v22 = vrot.slane %v887_v14, 4  ;;  %255 = vst [vmem:[#allocation2 + $0x44] sm:$0x1] %v254_v15  ;;  %v407_v23 = vrot.slane %v405_v16, 7  ;;  %v416_v24 = vshll.u32 %v301_v11, 16  ;;  %v192_v27 = vsel %vm4476_vm3, 0, %v191_v12 }
  0x39   : > { %v2702_v28 = vpack.c.b16 %v2675_v18, %v2674_v0  ;;  %v883_v29 = vsel %vm4542_vm11, %v878_v19, %v882_v4  ;;  %v774_v30 = vld [vmem:[#allocation2 + $0x10] sm:$0xf]  ;;  %v415_v31 = vrot.slane %v413_v21, 7  ;;  %193 = vst [vmem:[#allocation2 + $0x24] sm:$0x1] %v192_v27  ;;  %v248_v32 = vsel %vm4483_vm5, 0, %v247_v17 }
  0x3a   : > { %v893_v33 = vsel %vm4542_vm11, %v888_v22, %v892_v8  ;;  %v2670_v35 = vunpack.c.l.b16 %v883_v29  ;;  %v773_v36 = vld [vmem:[#allocation2 + $0xc] sm:$0xf]  ;;  %v856_v37 = vshll.u32 %v774_v30, 16  ;;  %v860_v38 = vshrl.u32 %v774_v30, 16  ;;  %249 = vst [vmem:[#allocation2 + $0x2c] sm:$0x1] %v248_v32 }
  0x3b   : > { %2722 = vrot.lane.b32.xlu2 %v2702_v28, %s4396_s29  ;;  %v2671_v39 = vunpack.c.l.b16 %v893_v33  ;;  %v847_v40 = vshrl.u32 %v773_v36, 16  ;;  %v850_v41 = vshll.u32 %v773_v36, 16  ;;  %v410_v42 = vor.u32 %v408_v20, %v407_v23  ;;  %v297_v44 = vld [vmem:[%s4500_s28 + $0x14] sm:$0xf]  ;;  %v200_v48 = vld [vmem:[#allocation2 + $0x48] sm:$0x1] }
  0x3c   : > { %v858_v45 = vrot.slane %v856_v37, 5  ;;  %v862_v46 = vrot.slane %v860_v38, 4  ;;  %v411_v47 = vrot.slane %v407_v23, 4  ;;  %v418_v26 = vor.u32 %v416_v24, %v415_v31  ;;  %v256_v59 = vld [vmem:[#allocation2 + $0x50] sm:$0x1] }
  0x3d   : > { %v2700_v49 = vpack.c.b16 %v2671_v39, %v2670_v35  ;;  %v804_v50 = vld [vmem:[#allocation2 + $0x14] sm:$0x1]  ;;  %v849_v51 = vrot.slane %v847_v40, 4  ;;  %v852_v52 = vrot.slane %v850_v41, 5  ;;  %v420_v53 = vrot.slane %v415_v31, 4 }
  0x3e   : > { %v863_v54 = vor.u32 %v862_v46, %v858_v45  ;;  %v866_v55 = vshll.u32 %v804_v50, 16  ;;  %v419_v56 = vsel %vm4525_vm9, %v411_v47, %v418_v26  ;;  %v687_v57 = vld [vmem:[#allocation2 + $0x3c] sm:$0xf]  ;;  %v371_v58 = vshrl.u32 %v296_v43, 16  ;;  %v302_v22 = vld [vmem:[%s4500_s28 + $0x28] sm:$0xf] }
  0x3f   : > { %2718 = vrot.lane.b32.xlu1 %v2700_v49, %s4396_s29  ;;  %v853_v60 = vor.u32 %v852_v52, %v849_v51  ;;  %v688_v61 = vsel %vm4514_vm8, %v410_v42, %v687_v57  ;;  %690 = vst.msk [vmem:[#allocation2 + $0x40] sm:$0xf] %vm170_vm0, %v419_v56  ;;  %v691_v62 = vld [vmem:[#allocation2 + $0x44] sm:$0x1]  ;;  %v374_v63 = vshll.u32 %v296_v43, 16  ;;  %v379_v0 = vshrl.u32 %v297_v44, 16 }
  0x40   : > { %v864_v4 = vrot.slane %v863_v54, 4  ;;  %v868_v5 = vrot.slane %v866_v55, 5  ;;  %689 = vst [vmem:[#allocation2 + $0x3c] sm:$0xf] %v688_v61  ;;  %v692_v6 = vsel %vm4476_vm3, %v420_v53, %v691_v62  ;;  %v373_v7 = vrot.slane %v371_v58, 7 }
  0x41   : > { %v854_v8 = vrot.slane %v853_v60, 4  ;;  %693 = vst [vmem:[#allocation2 + $0x44] sm:$0x1] %v692_v6  ;;  %v381_v9 = vrot.slane %v379_v0, 7  ;;  %v382_v10 = vshll.u32 %v297_v44, 16  ;;  %v201_v11 = vsel %vm4476_vm3, 0, %v200_v48 }
  0x42   : > { %v869_v12 = vsel %vm4542_vm11, %v864_v4, %v868_v5  ;;  %v376_v13 = vor.u32 %v374_v63, %v373_v7  ;;  %v377_v14 = vrot.slane %v373_v7, 4  ;;  %v673_v15 = vld [vmem:[#allocation2 + $0x24] sm:$0xf]  ;;  %v677_v16 = vld [vmem:[#allocation2 + $0x2c] sm:$0x1]  ;;  %v257_v17 = vsel %vm4483_vm5, 0, %v256_v59 }
  0x43   : > { %v859_v18 = vsel %vm4542_vm11, %v854_v8, %v858_v45  ;;  %v2669_v19 = vunpack.c.l.b16 %v869_v12  ;;  %v384_v20 = vor.u32 %v382_v10, %v381_v9  ;;  %v386_v21 = vrot.slane %v381_v9, 4  ;;  %202 = vst [vmem:[#allocation2 + $0x48] sm:$0x1] %v201_v11  ;;  %v303_v27 = vld [vmem:[%s4500_s28 + $0x2c] sm:$0xf] }
  0x44   : > { %v2668_v23 = vunpack.c.l.b16 %v859_v18  ;;  %v674_v24 = vsel %vm4514_vm8, %v376_v13, %v673_v15  ;;  %258 = vst [vmem:[#allocation2 + $0x50] sm:$0x1] %v257_v17  ;;  %v422_v28 = vshrl.u32 %v302_v22, 16  ;;  %v425_v29 = vshll.u32 %v302_v22, 16  ;;  %v206_v35 = vld [vmem:[#allocation2 + $0x60] sm:$0x1] }
  0x45   : > { %v385_v30 = vsel %vm4525_vm9, %v377_v14, %v384_v20  ;;  %675 = vst [vmem:[#allocation2 + $0x24] sm:$0xf] %v674_v24  ;;  %v678_v31 = vsel %vm4476_vm3, %v386_v21, %v677_v16  ;;  %v430_v32 = vshrl.u32 %v303_v27, 16  ;;  %v433_v33 = vshll.u32 %v303_v27, 16  ;;  %v262_v54 = vld [vmem:[#allocation2 + $0x68] sm:$0x1] }
  0x46   : > { %v2699_v36 = vpack.c.b16 %v2669_v19, %v2668_v23  ;;  %v782_v37 = vld [vmem:[#allocation2 + $0x40] sm:$0xf]  ;;  %676 = vst.msk [vmem:[#allocation2 + $0x28] sm:$0xf] %vm170_vm0, %v385_v30  ;;  %v424_v38 = vrot.slane %v422_v28, 7  ;;  %v207_v39 = vsel %vm4476_vm3, 0, %v206_v35 }
  0x47   : > { %v781_v40 = vld [vmem:[#allocation2 + $0x3c] sm:$0xf]  ;;  %v952_v41 = vshll.u32 %v782_v37, 16  ;;  %v956_v42 = vshrl.u32 %v782_v37, 16  ;;  %679 = vst [vmem:[#allocation2 + $0x2c] sm:$0x1] %v678_v31 }
  0x48   : > { %2716 = vrot.lane.b32.xlu0 %v2699_v36, %s4396_s29  ;;  %v808_v43 = vld [vmem:[#allocation2 + $0x44] sm:$0x1]  ;;  %v943_v44 = vshrl.u32 %v781_v40, 16  ;;  %v946_v45 = vshll.u32 %v781_v40, 16  ;;  %v427_v46 = vor.u32 %v425_v29, %v424_v38  ;;  %v428_v47 = vrot.slane %v424_v38, 4 }
  0x49   : > { %v954_v26 = vrot.slane %v952_v41, 5  ;;  %v958_v48 = vrot.slane %v956_v42, 4  ;;  %v962_v49 = vshll.u32 %v808_v43, 16  ;;  %v432_v50 = vrot.slane %v430_v32, 7  ;;  %208 = vst [vmem:[#allocation2 + $0x60] sm:$0x1] %v207_v39 }
  0x4a   : > { %v945_v51 = vrot.slane %v943_v44, 4  ;;  %v948_v52 = vrot.slane %v946_v45, 5  ;;  %v694_v53 = vld [vmem:[#allocation2 + $0x48] sm:$0xf]  ;;  %v306_v60 = vld [vmem:[%s4500_s28 + $0x38] sm:$0xf] }
  0x4b   : > { %v959_v55 = vor.u32 %v958_v48, %v954_v26  ;;  %v964_v56 = vrot.slane %v962_v49, 5  ;;  %v435_v57 = vor.u32 %v433_v33, %v432_v50  ;;  %v437_v58 = vrot.slane %v432_v50, 4  ;;  %v698_v59 = vld [vmem:[#allocation2 + $0x50] sm:$0x1]  ;;  %v307_v10 = vld [vmem:[%s4500_s28 + $0x3c] sm:$0xf] }
  0x4c   : > { %v949_v61 = vor.u32 %v948_v52, %v945_v51  ;;  %v777_v62 = vld [vmem:[#allocation2 + $0x24] sm:$0xf]  ;;  %v695_v63 = vsel %vm4514_vm8, %v427_v46, %v694_v53  ;;  %v263_v0 = vsel %vm4483_vm5, 0, %v262_v54  ;;  %v456_v4 = vshrl.u32 %v306_v60, 16  ;;  %v203_v30 = vld [vmem:[#allocation2 + $0x54] sm:$0x1] }
  0x4d   : > { %v960_v5 = vrot.slane %v959_v55, 4  ;;  %v4622_v6 = vld [vmem:[#allocation2 + $0x28] sm:$0xf]  ;;  %v895_v7 = vshrl.u32 %v777_v62, 16  ;;  %v898_v8 = vshll.u32 %v777_v62, 16  ;;  %v436_v9 = vsel %vm4525_vm9, %v428_v47, %v435_v57 }
  0x4e   : > { %v950_v11 = vrot.slane %v949_v61, 4  ;;  %v806_v12 = vld [vmem:[#allocation2 + $0x2c] sm:$0x1]  ;;  %v904_v13 = vshll.u32 %v4622_v6, 16  ;;  %v908_v14 = vshrl.u32 %v4622_v6, 16  ;;  %v699_v15 = vsel %vm4476_vm3, %v437_v58, %v698_v59 }
  0x4f   : > { %v965_v16 = vsel %vm4542_vm11, %v960_v5, %v964_v56  ;;  %v897_v17 = vrot.slane %v895_v7, 4  ;;  %v900_v18 = vrot.slane %v898_v8, 5  ;;  %v914_v19 = vshll.u32 %v806_v12, 16  ;;  %696 = vst [vmem:[#allocation2 + $0x48] sm:$0xf] %v695_v63 }
  0x50   : > { %v955_v20 = vsel %vm4542_vm11, %v950_v11, %v954_v26  ;;  %v2677_v21 = vunpack.c.l.b16 %v965_v16  ;;  %v906_v22 = vrot.slane %v904_v13, 5  ;;  %v910_v23 = vrot.slane %v908_v14, 4  ;;  %697 = vst.msk [vmem:[#allocation2 + $0x4c] sm:$0xf] %vm170_vm0, %v436_v9  ;;  %v708_v36 = vld [vmem:[#allocation2 + $0x60] sm:$0xf] }
  0x51   : > { %v2676_v24 = vunpack.c.l.b16 %v955_v20  ;;  %v901_v27 = vor.u32 %v900_v18, %v897_v17  ;;  %v916_v28 = vrot.slane %v914_v19, 5  ;;  %700 = vst [vmem:[#allocation2 + $0x50] sm:$0x1] %v699_v15  ;;  %v458_v29 = vrot.slane %v456_v4, 7  ;;  %v259_v41 = vld [vmem:[#allocation2 + $0x5c] sm:$0x1] }
  0x52   : > { %v911_v31 = vor.u32 %v910_v23, %v906_v22  ;;  %264 = vst [vmem:[#allocation2 + $0x68] sm:$0x1] %v263_v0  ;;  %v459_v32 = vshll.u32 %v306_v60, 16  ;;  %v464_v33 = vshrl.u32 %v307_v10, 16  ;;  %v467_v35 = vshll.u32 %v307_v10, 16 }
  0x53   : > { %v2703_v37 = vpack.c.b16 %v2677_v21, %v2676_v24  ;;  %v902_v38 = vrot.slane %v901_v27, 4  ;;  %v462_v39 = vrot.slane %v458_v29, 4  ;;  %v204_v40 = vsel %vm4476_vm3, 0, %v203_v30  ;;  %v304_v51 = vld [vmem:[%s4500_s28 + $0x30] sm:$0xf] }
  0x54   : > { %v912_v42 = vrot.slane %v911_v31, 4  ;;  %v461_v43 = vor.u32 %v459_v32, %v458_v29  ;;  %v466_v44 = vrot.slane %v464_v33, 7  ;;  %205 = vst [vmem:[#allocation2 + $0x54] sm:$0x1] %v204_v40  ;;  %v260_v45 = vsel %vm4483_vm5, 0, %v259_v41 }
  0x55   : > { %2724 = vrot.lane.b32.xlu2 %v2703_v37, %s4396_s29  ;;  %v907_v46 = vsel %vm4542_vm11, %v902_v38, %v906_v22  ;;  %261 = vst [vmem:[#allocation2 + $0x5c] sm:$0x1] %v260_v45  ;;  %v305_v57 = vld [vmem:[%s4500_s28 + $0x34] sm:$0xf]  ;;  %v209_v62 = vld [vmem:[#allocation2 + $0x6c] sm:$0x1] }
  0x56   : > { %v917_v47 = vsel %vm4542_vm11, %v912_v42, %v916_v28  ;;  %v2672_v26 = vunpack.c.l.b16 %v907_v46  ;;  %v783_v48 = vld [vmem:[#allocation2 + $0x48] sm:$0xf]  ;;  %v469_v49 = vor.u32 %v467_v35, %v466_v44  ;;  %v471_v50 = vrot.slane %v466_v44, 4  ;;  %v265_v63 = vld [vmem:[#allocation2 + $0x74] sm:$0x1] }
  0x57   : > { %v2673_v52 = vunpack.c.l.b16 %v917_v47  ;;  %v4646_v53 = vld [vmem:[#allocation2 + $0x4c] sm:$0xf]  ;;  %v967_v54 = vshrl.u32 %v783_v48, 16  ;;  %v970_v55 = vshll.u32 %v783_v48, 16  ;;  %v709_v56 = vsel %vm4514_vm8, %v461_v43, %v708_v36  ;;  %v308_v16 = vld [vmem:[%s4500_s28 + $0x40] sm:$0xf] }
  0x58   : > { %v4651_v58 = vld [vmem:[#allocation2 + $0x50] sm:$0x1]  ;;  %v976_v59 = vshll.u32 %v4646_v53, 16  ;;  %v980_v60 = vshrl.u32 %v4646_v53, 16  ;;  %v470_v61 = vsel %vm4525_vm9, %v462_v39, %v469_v49  ;;  %710 = vst [vmem:[#allocation2 + $0x60] sm:$0xf] %v709_v56 }
  0x59   : > { %v2701_v0 = vpack.c.b16 %v2673_v52, %v2672_v26  ;;  %v969_v4 = vrot.slane %v967_v54, 4  ;;  %v972_v5 = vrot.slane %v970_v55, 5  ;;  %v986_v7 = vshll.u32 %v4651_v58, 16  ;;  %711 = vst.msk [vmem:[#allocation2 + $0x64] sm:$0xf] %vm170_vm0, %v470_v61 }
  0x5a   : > { %v978_v8 = vrot.slane %v976_v59, 5  ;;  %v982_v9 = vrot.slane %v980_v60, 4  ;;  %v712_v10 = vld [vmem:[#allocation2 + $0x68] sm:$0x1]  ;;  %v439_v11 = vshrl.u32 %v304_v51, 16  ;;  %v442_v12 = vshll.u32 %v304_v51, 16 }
  0x5b   : > { %2720 = vrot.lane.b32.xlu1 %v2701_v0, %s4396_s29  ;;  %v973_v13 = vor.u32 %v972_v5, %v969_v4  ;;  %v713_v14 = vsel %vm4476_vm3, %v471_v50, %v712_v10  ;;  %v447_v15 = vshrl.u32 %v305_v57, 16  ;;  %v988_v18 = vrot.slane %v986_v7, 5  ;;  %v701_v23 = vld [vmem:[#allocation2 + $0x54] sm:$0xf]  ;;  %v309_v44 = vld [vmem:[%s4500_s28 + $0x44] sm:$0xf] }
  0x5c   : > { %v983_v17 = vor.u32 %v982_v9, %v978_v8  ;;  %714 = vst [vmem:[#allocation2 + $0x68] sm:$0x1] %v713_v14  ;;  %v441_v19 = vrot.slane %v439_v11, 7  ;;  %v450_v20 = vshll.u32 %v305_v57, 16  ;;  %v705_v24 = vld [vmem:[#allocation2 + $0x5c] sm:$0x1] }
  0x5d   : > { %v974_v21 = vrot.slane %v973_v13, 4  ;;  %v449_v22 = vrot.slane %v447_v15, 7  ;;  %v210_v27 = vsel %vm4476_vm3, 0, %v209_v62  ;;  %v266_v28 = vsel %vm4483_vm5, 0, %v265_v63  ;;  %v215_v48 = vld [vmem:[#allocation2 + $0x84] sm:$0x1] }
  0x5e   : > { %v984_v29 = vrot.slane %v983_v17, 4  ;;  %v444_v30 = vor.u32 %v442_v12, %v441_v19  ;;  %v445_v31 = vrot.slane %v441_v19, 4  ;;  %211 = vst [vmem:[#allocation2 + $0x6c] sm:$0x1] %v210_v27  ;;  %v473_v32 = vshrl.u32 %v308_v16, 16 }
  0x5f   : > { %v979_v33 = vsel %vm4542_vm11, %v974_v21, %v978_v8  ;;  %v787_v35 = vld [vmem:[#allocation2 + $0x60] sm:$0xf]  ;;  %v452_v36 = vor.u32 %v450_v20, %v449_v22  ;;  %v454_v37 = vrot.slane %v449_v22, 4  ;;  %267 = vst [vmem:[#allocation2 + $0x74] sm:$0x1] %v266_v28  ;;  %v476_v38 = vshll.u32 %v308_v16, 16 }
  0x60   : > { %v989_v39 = vsel %vm4542_vm11, %v984_v29, %v988_v18  ;;  %v2678_v40 = vunpack.c.l.b16 %v979_v33  ;;  %v4671_v41 = vld [vmem:[#allocation2 + $0x64] sm:$0xf]  ;;  %v1015_v42 = vshrl.u32 %v787_v35, 16  ;;  %v1018_v43 = vshll.u32 %v787_v35, 16  ;;  %v271_v49 = vld [vmem:[#allocation2 + $0x8c] sm:$0x1] }
  0x61   : > { %v2679_v45 = vunpack.c.l.b16 %v989_v39  ;;  %v1024_v46 = vshll.u32 %v4671_v41, 16  ;;  %v1028_v47 = vshrl.u32 %v4671_v41, 16  ;;  %v453_v26 = vsel %vm4525_vm9, %v445_v31, %v452_v36  ;;  %v312_v55 = vld [vmem:[%s4500_s28 + $0x50] sm:$0xf]  ;;  %v4687_v61 = vld [vmem:[%s4500_s28 + $0x54] sm:$0xf] }
  0x62   : > { %v1017_v50 = vrot.slane %v1015_v42, 4  ;;  %v1020_v51 = vrot.slane %v1018_v43, 5  ;;  %v702_v52 = vsel %vm4514_vm8, %v444_v30, %v701_v23  ;;  %704 = vst.msk [vmem:[#allocation2 + $0x58] sm:$0xf] %vm170_vm0, %v453_v26  ;;  %v706_v54 = vsel %vm4476_vm3, %v454_v37, %v705_v24  ;;  %v212_v31 = vld [vmem:[#allocation2 + $0x78] sm:$0x1] }
  0x63   : > { %v2704_v56 = vpack.c.b16 %v2679_v45, %v2678_v40  ;;  %v4684_v57 = vld [vmem:[#allocation2 + $0x68] sm:$0x1]  ;;  %v1026_v59 = vrot.slane %v1024_v46, 5  ;;  %v1030_v60 = vrot.slane %v1028_v47, 4  ;;  %703 = vst [vmem:[#allocation2 + $0x54] sm:$0xf] %v702_v52 }
  0x64   : > { %v1021_v62 = vor.u32 %v1020_v51, %v1017_v50  ;;  %v1034_v63 = vshll.u32 %v4684_v57, 16  ;;  %707 = vst [vmem:[#allocation2 + $0x5c] sm:$0x1] %v706_v54  ;;  %v475_v0 = vrot.slane %v473_v32, 7  ;;  %v481_v4 = vshrl.u32 %v309_v44, 16 }
  0x65   : > { %2726 = vrot.lane.b32.xlu0 %v2704_v56, %s4396_s29  ;;  %v1031_v5 = vor.u32 %v1030_v60, %v1026_v59  ;;  %v484_v7 = vshll.u32 %v309_v44, 16  ;;  %v715_v8 = vld [vmem:[#allocation2 + $0x6c] sm:$0xf]  ;;  %v216_v9 = vsel %vm4476_vm3, 0, %v215_v48  ;;  %v272_v10 = vsel %vm4483_vm5, 0, %v271_v49 }
  0x66   : > { %v1022_v11 = vrot.slane %v1021_v62, 4  ;;  %v1036_v12 = vrot.slane %v1034_v63, 5  ;;  %v478_v13 = vor.u32 %v476_v38, %v475_v0  ;;  %v479_v14 = vrot.slane %v475_v0, 4  ;;  %217 = vst [vmem:[#allocation2 + $0x84] sm:$0x1] %v216_v9 }
  0x67   : > { %v1032_v15 = vrot.slane %v1031_v5, 4  ;;  %v483_v16 = vrot.slane %v481_v4, 7  ;;  %v507_v17 = vshrl.u32 %v312_v55, 16  ;;  %v510_v18 = vshll.u32 %v312_v55, 16  ;;  %v719_v21 = vld [vmem:[#allocation2 + $0x74] sm:$0x1] }
  0x68   : > { %v1027_v19 = vsel %vm4542_vm11, %v1022_v11, %v1026_v59  ;;  %v716_v20 = vsel %vm4514_vm8, %v478_v13, %v715_v8  ;;  %273 = vst [vmem:[#allocation2 + $0x8c] sm:$0x1] %v272_v10  ;;  %v515_v22 = vshrl.u32 %v4687_v61, 16  ;;  %v518_v23 = vshll.u32 %v4687_v61, 16  ;;  %v268_v44 = vld [vmem:[#allocation2 + $0x80] sm:$0x1] }
  0x69   : > { %v1037_v24 = vsel %vm4542_vm11, %v1032_v15, %v1036_v12  ;;  %v2682_v27 = vunpack.c.l.b16 %v1027_v19  ;;  %v4703_v28 = vld [vmem:[#allocation2 + $0x58] sm:$0xf]  ;;  %v486_v29 = vor.u32 %v484_v7, %v483_v16  ;;  %v488_v30 = vrot.slane %v483_v16, 4  ;;  %717 = vst [vmem:[#allocation2 + $0x6c] sm:$0xf] %v716_v20 }
  0x6a   : > { %v2683_v32 = vunpack.c.l.b16 %v1037_v24  ;;  %v785_v33 = vld [vmem:[#allocation2 + $0x54] sm:$0xf]  ;;  %v1000_v35 = vshll.u32 %v4703_v28, 16  ;;  %v1004_v36 = vshrl.u32 %v4703_v28, 16  ;;  %v509_v37 = vrot.slane %v507_v17, 7 }
  0x6b   : > { %v4707_v38 = vld [vmem:[#allocation2 + $0x5c] sm:$0x1]  ;;  %v991_v39 = vshrl.u32 %v785_v33, 16  ;;  %v994_v40 = vshll.u32 %v785_v33, 16  ;;  %v487_v42 = vsel %vm4525_vm9, %v479_v14, %v486_v29  ;;  %v720_v43 = vsel %vm4476_vm3, %v488_v30, %v719_v21  ;;  %v310_v14 = vld [vmem:[%s4500_s28 + $0x48] sm:$0xf] }
  0x6c   : > { %v2706_v45 = vpack.c.b16 %v2683_v32, %v2682_v27  ;;  %v1002_v46 = vrot.slane %v1000_v35, 5  ;;  %v1006_v47 = vrot.slane %v1004_v36, 4  ;;  %v1010_v26 = vshll.u32 %v4707_v38, 16  ;;  %718 = vst.msk [vmem:[#allocation2 + $0x70] sm:$0xf] %vm170_vm0, %v487_v42 }
  0x6d   : > { %v993_v48 = vrot.slane %v991_v39, 4  ;;  %v996_v49 = vrot.slane %v994_v40, 5  ;;  %721 = vst [vmem:[#allocation2 + $0x74] sm:$0x1] %v720_v43  ;;  %v512_v50 = vor.u32 %v510_v18, %v509_v37  ;;  %v513_v51 = vrot.slane %v509_v37, 4 }
  0x6e   : > { %2730 = vrot.lane.b32.xlu2 %v2706_v45, %s4396_s29  ;;  %v1007_v52 = vor.u32 %v1006_v47, %v1002_v46  ;;  %v1012_v54 = vrot.slane %v1010_v26, 5  ;;  %v517_v55 = vrot.slane %v515_v22, 7  ;;  %v729_v56 = vld [vmem:[#allocation2 + $0x84] sm:$0xf]  ;;  %v213_v59 = vsel %vm4476_vm3, 0, %v212_v31 }
  0x6f   : > { %v997_v60 = vor.u32 %v996_v49, %v993_v48  ;;  %v730_v61 = vsel %vm4514_vm8, %v512_v50, %v729_v56  ;;  %v733_v62 = vld [vmem:[#allocation2 + $0x8c] sm:$0x1]  ;;  %214 = vst [vmem:[#allocation2 + $0x78] sm:$0x1] %v213_v59  ;;  %v269_v63 = vsel %vm4483_vm5, 0, %v268_v44  ;;  %v490_v30 = vshrl.u32 %v310_v14, 16 }
  0x70   : > { %v1008_v0 = vrot.slane %v1007_v52, 4  ;;  %v789_v4 = vld [vmem:[#allocation2 + $0x6c] sm:$0xf]  ;;  %v520_v5 = vor.u32 %v518_v23, %v517_v55  ;;  %v522_v7 = vrot.slane %v517_v55, 4  ;;  %731 = vst [vmem:[#allocation2 + $0x84] sm:$0xf] %v730_v61 }
  0x71   : > { %v998_v8 = vrot.slane %v997_v60, 4  ;;  %v1039_v9 = vshrl.u32 %v789_v4, 16  ;;  %v1042_v10 = vshll.u32 %v789_v4, 16  ;;  %270 = vst [vmem:[#allocation2 + $0x80] sm:$0x1] %v269_v63  ;;  %v493_v31 = vshll.u32 %v310_v14, 16 }
  0x72   : > { %v1013_v11 = vsel %vm4542_vm11, %v1008_v0, %v1012_v54  ;;  %v521_v12 = vsel %vm4525_vm9, %v513_v51, %v520_v5  ;;  %v734_v13 = vsel %vm4476_vm3, %v522_v7, %v733_v62  ;;  %v311_v15 = vld [vmem:[%s4500_s28 + $0x4c] sm:$0xf]  ;;  %v218_v37 = vld [vmem:[#allocation2 + $0x90] sm:$0x1]  ;;  %v492_v43 = vrot.slane %v490_v30, 7 }
  0x73   : > { %v1003_v16 = vsel %vm4542_vm11, %v998_v8, %v1002_v46  ;;  %v2681_v17 = vunpack.c.l.b16 %v1013_v11  ;;  %v4732_v18 = vld [vmem:[#allocation2 + $0x70] sm:$0xf]  ;;  %v1041_v19 = vrot.slane %v1039_v9, 4  ;;  %v1044_v20 = vrot.slane %v1042_v10, 5  ;;  %732 = vst.msk [vmem:[#allocation2 + $0x88] sm:$0xf] %vm170_vm0, %v521_v12 }
  0x74   : > { %v2680_v21 = vunpack.c.l.b16 %v1003_v16  ;;  %v4735_v22 = vld [vmem:[#allocation2 + $0x74] sm:$0x1]  ;;  %v1048_v23 = vshll.u32 %v4732_v18, 16  ;;  %v1052_v24 = vshrl.u32 %v4732_v18, 16  ;;  %735 = vst [vmem:[#allocation2 + $0x8c] sm:$0x1] %v734_v13  ;;  %v495_v49 = vor.u32 %v493_v31, %v492_v43 }
  0x75   : > { %v1045_v27 = vor.u32 %v1044_v20, %v1041_v19  ;;  %v1058_v29 = vshll.u32 %v4735_v22, 16  ;;  %v498_v36 = vshrl.u32 %v311_v15, 16  ;;  %v501_v44 = vshll.u32 %v311_v15, 16  ;;  %v274_v55 = vld [vmem:[#allocation2 + $0x98] sm:$0x1] }
  0x76   : > { %v2705_v32 = vpack.c.b16 %v2681_v17, %v2680_v21  ;;  %v1050_v33 = vrot.slane %v1048_v23, 5  ;;  %v1054_v35 = vrot.slane %v1052_v24, 4  ;;  %v496_v50 = vrot.slane %v492_v43, 4  ;;  %v722_v51 = vld [vmem:[#allocation2 + $0x78] sm:$0xf] }
  0x77   : > { %v1046_v39 = vrot.slane %v1045_v27, 4  ;;  %v1060_v40 = vrot.slane %v1058_v29, 5  ;;  %v793_v42 = vld [vmem:[#allocation2 + $0x84] sm:$0xf]  ;;  %v500_v26 = vrot.slane %v498_v36, 7  ;;  %v219_v54 = vsel %vm4476_vm3, 0, %v218_v37 }
  0x78   : > { %2728 = vrot.lane.b32.xlu1 %v2705_v32, %s4396_s29  ;;  %v1055_v45 = vor.u32 %v1054_v35, %v1050_v33  ;;  %v1087_v46 = vshrl.u32 %v793_v42, 16  ;;  %v1090_v47 = vshll.u32 %v793_v42, 16  ;;  %v726_v52 = vld [vmem:[#allocation2 + $0x80] sm:$0x1]  ;;  %v314_v63 = vld [vmem:[%s4500_s28 + $0x58] sm:$0xf]  ;;  %v723_v13 = vsel %vm4514_vm8, %v495_v49, %v722_v51 }
  0x79   : > { %v1051_v48 = vsel %vm4542_vm11, %v1046_v39, %v1050_v33  ;;  %v503_v7 = vor.u32 %v501_v44, %v500_v26  ;;  %v505_v8 = vrot.slane %v500_v26, 4  ;;  %v315_v9 = vld [vmem:[%s4500_s28 + $0x5c] sm:$0xf]  ;;  %220 = vst [vmem:[#allocation2 + $0x90] sm:$0x1] %v219_v54  ;;  %v275_v27 = vsel %vm4483_vm5, 0, %v274_v55 }
  0x7a   : > { %v1056_v56 = vrot.slane %v1055_v45, 4  ;;  %v2684_v59 = vunpack.c.l.b16 %v1051_v48  ;;  %v4745_v60 = vld [vmem:[#allocation2 + $0x88] sm:$0xf]  ;;  %v1089_v61 = vrot.slane %v1087_v46, 4  ;;  %v1092_v62 = vrot.slane %v1090_v47, 5 }
  0x7b   : > { %v4748_v0 = vld [vmem:[#allocation2 + $0x8c] sm:$0x1]  ;;  %v1096_v4 = vshll.u32 %v4745_v60, 16  ;;  %v1100_v5 = vshrl.u32 %v4745_v60, 16  ;;  %v224_v14 = vld [vmem:[#allocation2 + $0xa8] sm:$0x1]  ;;  %v504_v19 = vsel %vm4525_vm9, %v496_v50, %v503_v7  ;;  %v727_v24 = vsel %vm4476_vm3, %v505_v8, %v726_v52 }
  0x7c   : > { %v1061_v10 = vsel %vm4542_vm11, %v1056_v56, %v1060_v40  ;;  %v1093_v11 = vor.u32 %v1092_v62, %v1089_v61  ;;  %v1106_v12 = vshll.u32 %v4748_v0, 16  ;;  %724 = vst [vmem:[#allocation2 + $0x78] sm:$0xf] %v723_v13  ;;  %v280_v20 = vld [vmem:[#allocation2 + $0xb0] sm:$0x1]  ;;  %v524_v31 = vshrl.u32 %v314_v63, 16 }
  0x7d   : > { %v2685_v15 = vunpack.c.l.b16 %v1061_v10  ;;  %v1098_v16 = vrot.slane %v1096_v4, 5  ;;  %v1102_v17 = vrot.slane %v1100_v5, 4  ;;  %725 = vst.msk [vmem:[#allocation2 + $0x7c] sm:$0xf] %vm170_vm0, %v504_v19  ;;  %v527_v32 = vshll.u32 %v314_v63, 16 }
  0x7e   : > { %v1094_v21 = vrot.slane %v1093_v11, 4  ;;  %v1108_v23 = vrot.slane %v1106_v12, 5  ;;  %728 = vst [vmem:[#allocation2 + $0x80] sm:$0x1] %v727_v24  ;;  %v318_v33 = vld [vmem:[%s4500_s28 + $0x68] sm:$0xf] }
  0x7f   : > { %v2707_v29 = vpack.c.b16 %v2685_v15, %v2684_v59  ;;  %v1103_v30 = vor.u32 %v1102_v17, %v1098_v16  ;;  %276 = vst [vmem:[#allocation2 + $0x98] sm:$0x1] %v275_v27  ;;  %v532_v36 = vshrl.u32 %v315_v9, 16  ;;  %v535_v37 = vshll.u32 %v315_v9, 16  ;;  %v319_v46 = vld [vmem:[%s4500_s28 + $0x6c] sm:$0xf] }
  0x80   : > { %v1099_v35 = vsel %vm4542_vm11, %v1094_v21, %v1098_v16  ;;  %v225_v39 = vsel %vm4476_vm3, 0, %v224_v14  ;;  %v526_v42 = vrot.slane %v524_v31, 7  ;;  %v281_v43 = vsel %vm4483_vm5, 0, %v280_v20  ;;  %v736_v50 = vld [vmem:[#allocation2 + $0x90] sm:$0xf] }
  0x81   : > { %2732 = vrot.lane.b32.xlu0 %v2707_v29, %s4396_s29  ;;  %v1104_v40 = vrot.slane %v1103_v30, 4  ;;  %226 = vst [vmem:[#allocation2 + $0xa8] sm:$0x1] %v225_v39  ;;  %v2688_v44 = vunpack.c.l.b16 %v1099_v35  ;;  %v534_v45 = vrot.slane %v532_v36, 7  ;;  %v558_v47 = vshrl.u32 %v318_v33, 16 }
  0x82   : > { %282 = vst [vmem:[#allocation2 + $0xb0] sm:$0x1] %v281_v43  ;;  %v529_v48 = vor.u32 %v527_v32, %v526_v42  ;;  %v530_v49 = vrot.slane %v526_v42, 4  ;;  %v561_v51 = vshll.u32 %v318_v33, 16  ;;  %v566_v5 = vshrl.u32 %v319_v46, 16 }
  0x83   : > { %v1109_v26 = vsel %vm4542_vm11, %v1104_v40, %v1108_v23  ;;  %v791_v54 = vld [vmem:[#allocation2 + $0x78] sm:$0xf]  ;;  %v537_v55 = vor.u32 %v535_v37, %v534_v45  ;;  %v539_v56 = vrot.slane %v534_v45, 4  ;;  %v560_v59 = vrot.slane %v558_v47, 7  ;;  %v221_v7 = vld [vmem:[#allocation2 + $0x9c] sm:$0x1] }
  0x84   : > { %v2689_v52 = vunpack.c.l.b16 %v1109_v26  ;;  %v4776_v61 = vld [vmem:[#allocation2 + $0x7c] sm:$0xf]  ;;  %v1063_v62 = vshrl.u32 %v791_v54, 16  ;;  %v1066_v63 = vshll.u32 %v791_v54, 16  ;;  %v737_v4 = vsel %vm4514_vm8, %v529_v48, %v736_v50  ;;  %v277_v13 = vld [vmem:[#allocation2 + $0xa4] sm:$0x1] }
  0x85   : > { %v4780_v9 = vld [vmem:[#allocation2 + $0x80] sm:$0x1]  ;;  %v1072_v10 = vshll.u32 %v4776_v61, 16  ;;  %v1076_v11 = vshrl.u32 %v4776_v61, 16  ;;  %v538_v12 = vsel %vm4525_vm9, %v530_v49, %v537_v55  ;;  %738 = vst [vmem:[#allocation2 + $0x90] sm:$0xf] %v737_v4  ;;  %v563_v17 = vor.u32 %v561_v51, %v560_v59 }
  0x86   : > { %v2709_v8 = vpack.c.b16 %v2689_v52, %v2688_v44  ;;  %v1065_v14 = vrot.slane %v1063_v62, 4  ;;  %v1068_v15 = vrot.slane %v1066_v63, 5  ;;  %v1082_v16 = vshll.u32 %v4780_v9, 16  ;;  %739 = vst.msk [vmem:[#allocation2 + $0x94] sm:$0xf] %vm170_vm0, %v538_v12 }
  0x87   : > { %v1074_v19 = vrot.slane %v1072_v10, 5  ;;  %v1078_v20 = vrot.slane %v1076_v11, 4  ;;  %v740_v21 = vld [vmem:[#allocation2 + $0x98] sm:$0x1]  ;;  %v564_v23 = vrot.slane %v560_v59, 4  ;;  %v568_v24 = vrot.slane %v566_v5, 7 }
  0x88   : > { %2736 = vrot.lane.b32.xlu2 %v2709_v8, %s4396_s29  ;;  %v1069_v27 = vor.u32 %v1068_v15, %v1065_v14  ;;  %v1084_v29 = vrot.slane %v1082_v16, 5  ;;  %v741_v30 = vsel %vm4476_vm3, %v539_v56, %v740_v21  ;;  %v569_v31 = vshll.u32 %v319_v46, 16  ;;  %v750_v32 = vld [vmem:[#allocation2 + $0xa8] sm:$0xf]  ;;  %v316_v40 = vld [vmem:[%s4500_s28 + $0x60] sm:$0xf] }
  0x89   : > { %v754_v33 = vld [vmem:[#allocation2 + $0xb0] sm:$0x1]  ;;  %v1079_v35 = vor.u32 %v1078_v20, %v1074_v19  ;;  %742 = vst [vmem:[#allocation2 + $0x98] sm:$0x1] %v741_v30  ;;  %v573_v36 = vrot.slane %v568_v24, 4  ;;  %v751_v37 = vsel %vm4514_vm8, %v563_v17, %v750_v32  ;;  %v222_v39 = vsel %vm4476_vm3, 0, %v221_v7 }
  0x8a   : > { %v1070_v42 = vrot.slane %v1069_v27, 4  ;;  %v571_v43 = vor.u32 %v569_v31, %v568_v24  ;;  %752 = vst [vmem:[#allocation2 + $0xa8] sm:$0xf] %v751_v37  ;;  %v278_v44 = vsel %vm4483_vm5, 0, %v277_v13  ;;  %v317_v45 = vld [vmem:[%s4500_s28 + $0x64] sm:$0xf] }
  0x8b   : > { %v1080_v46 = vrot.slane %v1079_v35, 4  ;;  %v755_v47 = vsel %vm4476_vm3, %v573_v36, %v754_v33  ;;  %223 = vst [vmem:[#allocation2 + $0x9c] sm:$0x1] %v222_v39  ;;  %v541_v26 = vshrl.u32 %v316_v40, 16  ;;  %v544_v48 = vshll.u32 %v316_v40, 16 }
  0x8c   : > { %v1075_v49 = vsel %vm4542_vm11, %v1070_v42, %v1074_v19  ;;  %v795_v50 = vld [vmem:[#allocation2 + $0x90] sm:$0xf]  ;;  %v572_v51 = vsel %vm4525_vm9, %v564_v23, %v571_v43  ;;  %756 = vst [vmem:[#allocation2 + $0xb0] sm:$0x1] %v755_v47  ;;  %v549_v52 = vshrl.u32 %v317_v45, 16  ;;  %v552_v54 = vshll.u32 %v317_v45, 16 }
  0x8d   : > { %v1085_v55 = vsel %vm4542_vm11, %v1080_v46, %v1084_v29  ;;  %v2686_v56 = vunpack.c.l.b16 %v1075_v49  ;;  %v4807_v59 = vld [vmem:[#allocation2 + $0x94] sm:$0xf]  ;;  %v1111_v62 = vshrl.u32 %v795_v50, 16  ;;  %v1114_v63 = vshll.u32 %v795_v50, 16  ;;  %753 = vst.msk [vmem:[#allocation2 + $0xac] sm:$0xf] %vm170_vm0, %v572_v51 }
  0x8e   : > { %v2687_v4 = vunpack.c.l.b16 %v1085_v55  ;;  %v1120_v5 = vshll.u32 %v4807_v59, 16  ;;  %v1124_v7 = vshrl.u32 %v4807_v59, 16  ;;  %279 = vst [vmem:[#allocation2 + $0xa4] sm:$0x1] %v278_v44  ;;  %v543_v8 = vrot.slane %v541_v26, 7 }
  0x8f   : > { %v1113_v10 = vrot.slane %v1111_v62, 4  ;;  %v1116_v11 = vrot.slane %v1114_v63, 5  ;;  %v551_v12 = vrot.slane %v549_v52, 7  ;;  %v227_v40 = vld [vmem:[#allocation2 + $0xb4] sm:$0x1]  ;;  %vm3338_vm15 = vcmask 64512  }
  0x90   : > { %v2708_v13 = vpack.c.b16 %v2687_v4, %v2686_v56  ;;  %v4812_v14 = vld [vmem:[#allocation2 + $0x98] sm:$0x1]  ;;  %v1122_v15 = vrot.slane %v1120_v5, 5  ;;  %v1126_v16 = vrot.slane %v1124_v7, 4  ;;  %v546_v17 = vor.u32 %v544_v48, %v543_v8  ;;  %v283_v42 = vld [vmem:[#allocation2 + $0xbc] sm:$0x1] }
  0x91   : > { %v1117_v19 = vor.u32 %v1116_v11, %v1113_v10  ;;  %v1130_v20 = vshll.u32 %v4812_v14, 16  ;;  %v799_v21 = vld [vmem:[#allocation2 + $0xa8] sm:$0xf]  ;;  %v547_v23 = vrot.slane %v543_v8, 4  ;;  %v554_v24 = vor.u32 %v552_v54, %v551_v12  ;;  %v320_v43 = vld [vmem:[%s4500_s28 + $0x70] sm:$0xf] }
  0x92   : > { %2734 = vrot.lane.b32.xlu1 %v2708_v13, %s4396_s29  ;;  %v1127_v27 = vor.u32 %v1126_v16, %v1122_v15  ;;  %v1159_v29 = vshrl.u32 %v799_v21, 16  ;;  %v1162_v30 = vshll.u32 %v799_v21, 16  ;;  %v556_v31 = vrot.slane %v551_v12, 4  ;;  %v743_v32 = vld [vmem:[#allocation2 + $0x9c] sm:$0xf] }
  0x93   : > { %v1118_v33 = vrot.slane %v1117_v19, 4  ;;  %v1132_v35 = vrot.slane %v1130_v20, 5  ;;  %v4816_v36 = vld [vmem:[#allocation2 + $0xb0] sm:$0x1]  ;;  %v555_v37 = vsel %vm4525_vm9, %v547_v23, %v554_v24  ;;  %v744_v39 = vsel %vm4514_vm8, %v546_v17, %v743_v32  ;;  %v321_v62 = vld [vmem:[%s4500_s28 + $0x74] sm:$0xf] }
  0x94   : > { %v1128_v44 = vrot.slane %v1127_v27, 4  ;;  %v4823_v45 = vld [vmem:[#allocation2 + $0xac] sm:$0xf]  ;;  %v1161_v46 = vrot.slane %v1159_v29, 4  ;;  %v1164_v47 = vrot.slane %v1162_v30, 5  ;;  %v1178_v26 = vshll.u32 %v4816_v36, 16 }
  0x95   : > { %v1123_v48 = vsel %vm4542_vm11, %v1118_v33, %v1122_v15  ;;  %v1168_v49 = vshll.u32 %v4823_v45, 16  ;;  %v1172_v50 = vshrl.u32 %v4823_v45, 16  ;;  %745 = vst [vmem:[#allocation2 + $0x9c] sm:$0xf] %v744_v39  ;;  %v747_v51 = vld [vmem:[#allocation2 + $0xa4] sm:$0x1] }
  0x96   : > { %v1133_v52 = vsel %vm4542_vm11, %v1128_v44, %v1132_v35  ;;  %v2690_v54 = vunpack.c.l.b16 %v1123_v48  ;;  %v1165_v55 = vor.u32 %v1164_v47, %v1161_v46  ;;  %v1180_v56 = vrot.slane %v1178_v26, 5  ;;  %746 = vst.msk [vmem:[#allocation2 + $0xa0] sm:$0xf] %vm170_vm0, %v555_v37  ;;  %v1206_v29 = vld [vmem:[#allocation2] sm:$0xe] }
  0x97   : > { %v2691_v63 = vunpack.c.l.b16 %v1133_v52  ;;  %v1170_v4 = vrot.slane %v1168_v49, 5  ;;  %v1174_v5 = vrot.slane %v1172_v50, 4  ;;  %v748_v7 = vsel %vm4476_vm3, %v556_v31, %v747_v51  ;;  %v4320_v33 = vld [vmem:[#allocation2 + $0x4] sm:$0xf]  ;;  %v1207_v48 = vld [vmem:[#allocation2 + $0xc] sm:$0xe] }
  0x98   : > { %v1166_v8 = vrot.slane %v1165_v55, 4  ;;  %749 = vst [vmem:[#allocation2 + $0xa4] sm:$0x1] %v748_v7  ;;  %v228_v10 = vsel %vm4476_vm3, 0, %v227_v40  ;;  %v284_v11 = vsel %vm4483_vm5, 0, %v283_v42  ;;  %v575_v12 = vshrl.u32 %v320_v43, 16 }
  0x99   : > { %v2710_v13 = vpack.c.b16 %v2691_v63, %v2690_v54  ;;  %v1175_v15 = vor.u32 %v1174_v5, %v1170_v4  ;;  %229 = vst [vmem:[#allocation2 + $0xb4] sm:$0x1] %v228_v10  ;;  %v578_v16 = vshll.u32 %v320_v43, 16  ;;  %v583_v17 = vshrl.u32 %v321_v62, 16 }
  0x9a   : > { %v1171_v19 = vsel %vm4542_vm11, %v1166_v8, %v1170_v4  ;;  %285 = vst [vmem:[#allocation2 + $0xbc] sm:$0x1] %v284_v11  ;;  %v577_v20 = vrot.slane %v575_v12, 7  ;;  %v586_v21 = vshll.u32 %v321_v62, 16  ;;  %v1275_v35 = vrot.slane %v4320_v33, 5 }
  0x9b   : > { %2738 = vrot.lane.b32.xlu0 %v2710_v13, %s4396_s29  ;;  %v1176_v23 = vrot.slane %v1175_v15, 4  ;;  %v2694_v24 = vunpack.c.l.b16 %v1171_v19  ;;  %v585_v27 = vrot.slane %v583_v17, 7  ;;  %v3924_v54 = vrot.slane %v1206_v29, 9  ;;  %v4321_v12 = vld [vmem:[#allocation2 + $0x8] sm:$0x1] }
  0x9c   : > { %v797_v30 = vld [vmem:[#allocation2 + $0x9c] sm:$0xf]  ;;  %v580_v31 = vor.u32 %v578_v16, %v577_v20  ;;  %v581_v32 = vrot.slane %v577_v20, 4  ;;  %v1277_v11 = vrot.slane %v1275_v35, 4  ;;  %v1278_v13 = vrot.slane %v4321_v12, 5 }
  0x9d   : > { %v1181_v37 = vsel %vm4542_vm11, %v1176_v23, %v1180_v56  ;;  %v4845_v39 = vld [vmem:[#allocation2 + $0xa0] sm:$0xf]  ;;  %v1135_v40 = vshrl.u32 %v797_v30, 16  ;;  %v1138_v42 = vshll.u32 %v797_v30, 16  ;;  %v588_v43 = vor.u32 %v586_v21, %v585_v27  ;;  %v1208_v19 = vld [vmem:[#allocation2 + $0x18] sm:$0xe] }
  0x9e   : > { %v2695_v44 = vunpack.c.l.b16 %v1181_v37  ;;  %v1144_v46 = vshll.u32 %v4845_v39, 16  ;;  %v1148_v47 = vshrl.u32 %v4845_v39, 16  ;;  %v590_v26 = vrot.slane %v585_v27, 4  ;;  %v4322_v23 = vld [vmem:[#allocation2 + $0x10] sm:$0xf]  ;;  %v4249_v2 = vld [vmem:[#allocation2 + $0x9c] sm:$0xff] }
  0x9f   : > { %v4849_v49 = vld [vmem:[#allocation2 + $0xa4] sm:$0x1]  ;;  %v1137_v50 = vrot.slane %v1135_v40, 4  ;;  %v1140_v51 = vrot.slane %v1138_v42, 5  ;;  %v589_v52 = vsel %vm4525_vm9, %v581_v32, %v588_v43  ;;  %v3925_v21 = vrot.slane %v1207_v48, 9 }
  0xa0   : > { %v2712_v55 = vpack.c.b16 %v2695_v44, %v2694_v24  ;;  %v1146_v56 = vrot.slane %v1144_v46, 5  ;;  %v1150_v62 = vrot.slane %v1148_v47, 4  ;;  %v1154_v63 = vshll.u32 %v4849_v49, 16  ;;  %v757_v4 = vld [vmem:[#allocation2 + $0xb4] sm:$0xf] }
  0xa1   : > { %v1141_v5 = vor.u32 %v1140_v51, %v1137_v50  ;;  %v758_v7 = vsel %vm4514_vm8, %v580_v31, %v757_v4  ;;  %760 = vst.msk [vmem:[#allocation2 + $0xb8] sm:$0xf] %vm170_vm0, %v589_v52  ;;  %v761_v8 = vld [vmem:[#allocation2 + $0xbc] sm:$0x1]  ;;  %v1282_v24 = vrot.slane %v4322_v23, 5  ;;  %v1276_v29 = vsel %vm4859_vm14, %v3924_v54, %v1275_v35 }
  0xa2   : > { %2742 = vrot.lane.b32.xlu2 %v2712_v55, %s4396_s29  ;;  %v1151_v15 = vor.u32 %v1150_v62, %v1146_v56  ;;  %v1156_v16 = vrot.slane %v1154_v63, 5  ;;  %759 = vst [vmem:[#allocation2 + $0xb4] sm:$0xf] %v758_v7  ;;  %v762_v17 = vsel %vm4476_vm3, %v590_v26, %v761_v8  ;;  %v4323_v30 = vld [vmem:[#allocation2 + $0x14] sm:$0x1]  ;;  %v1279_v33 = vsel %vm4859_vm14, %v1277_v11, %v1278_v13 }
  0xa3   : > { %v1142_v20 = vrot.slane %v1141_v5, 4  ;;  %763 = vst [vmem:[#allocation2 + $0xbc] sm:$0x1] %v762_v17  ;;  %v1285_v31 = vrot.slane %v4323_v30, 5  ;;  %v1283_v37 = vsel %vm4859_vm14, %v3925_v21, %v1282_v24  ;;  %v1284_v40 = vrot.slane %v1282_v24, 4 }
  0xa4   : > { %v1152_v27 = vrot.slane %v1151_v15, 4  ;;  %v2748_v44 = vunpack.c.l.b16 %v1283_v37  ;;  %v3926_v46 = vrot.slane %v1208_v19, 9  ;;  %v2746_v48 = vunpack.c.l.b16 %v1276_v29  ;;  %v4324_v52 = vld [vmem:[#allocation2 + $0x1c] sm:$0xf]  ;;  %v1209_v55 = vld [vmem:[#allocation2 + $0x24] sm:$0xe] }
  0xa5   : > { %v1147_v32 = vsel %vm4542_vm11, %v1142_v20, %v1146_v56  ;;  %v1286_v35 = vsel %vm4859_vm14, %v1284_v40, %v1285_v31  ;;  %v2747_v50 = vunpack.c.l.b16 %v1279_v33  ;;  %v1289_v54 = vrot.slane %v4324_v52, 5  ;;  %v1210_v20 = vld [vmem:[#allocation2 + $0x30] sm:$0xe]  ;;  %v4325_v30 = vld [vmem:[#allocation2 + $0x20] sm:$0x1] }
  0xa6   : > { %v1157_v42 = vsel %vm4542_vm11, %v1152_v27, %v1156_v16  ;;  %v2692_v43 = vunpack.c.l.b16 %v1147_v32  ;;  %v2749_v51 = vunpack.c.l.b16 %v1286_v35  ;;  %v1296_v5 = vrot.slane %v4622_v6, 5  ;;  %v4326_v32 = vld [vmem:[#allocation2 + $0x2c] sm:$0x1]  ;;  %v4328_v52 = vld [vmem:[#allocation2 + $0x38] sm:$0x1] }
  0xa7   : > { %v2693_v47 = vunpack.c.l.b16 %v1157_v42  ;;  %v4887_v13 = vsel %vm4859_vm14, %v3926_v46, %v1289_v54  ;;  %v3927_v19 = vrot.slane %v1209_v55, 9  ;;  %v1291_v6 = vrot.slane %v1289_v54, 4  ;;  %v1211_v46 = vld [vmem:[#allocation2 + $0x3c] sm:$0xe] }
  0xa8   : > { %v4878_v26 = vld [vmem:[#allocation2 + $0xb8] sm:$0xf]  ;;  %v2779_v12 = vpack.c.b16 %v2749_v51, %v2748_v44  ;;  %v1298_v24 = vrot.slane %v1296_v5, 4  ;;  %v1292_v31 = vrot.slane %v4325_v30, 5  ;;  %v1299_v33 = vrot.slane %v4326_v32, 5 }
  0xa9   : > { %v2711_v56 = vpack.c.b16 %v2693_v47, %v2692_v43  ;;  %v801_v62 = vld [vmem:[#allocation2 + $0xb4] sm:$0xf]  ;;  %v1192_v63 = vshll.u32 %v4878_v26, 16  ;;  %v1196_v4 = vshrl.u32 %v4878_v26, 16  ;;  %v2778_v40 = vpack.c.b16 %v2747_v50, %v2746_v48  ;;  %v4330_v32 = vld [vmem:[#allocation2 + $0x44] sm:$0x1] }
  0xaa   : > { %v4883_v7 = vld [vmem:[#allocation2 + $0xbc] sm:$0x1]  ;;  %v1183_v8 = vshrl.u32 %v801_v62, 16  ;;  %v1186_v11 = vshll.u32 %v801_v62, 16  ;;  %2796 = vrot.lane.b32.xlu2 %v2779_v12, %s4397_s30  ;;  %v3928_v42 = vrot.slane %v1210_v20, 9  ;;  %v2750_v35 = vunpack.c.l.b16 %v4887_v13 }
  0xab   : > { %2740 = vrot.lane.b32.xlu1 %v2711_v56, %s4396_s29  ;;  %v1194_v15 = vrot.slane %v1192_v63, 5  ;;  %v1198_v16 = vrot.slane %v1196_v4, 4  ;;  %v1202_v17 = vshll.u32 %v4883_v7, 16  ;;  %v4327_v43 = vld [vmem:[#allocation2 + $0x34] sm:$0xf]  ;;  %v1297_v51 = vsel %vm4859_vm14, %v3927_v19, %v1296_v5 }
  0xac   : > { %v1185_v21 = vrot.slane %v1183_v8, 4  ;;  %v1188_v23 = vrot.slane %v1186_v11, 5  ;;  %v1303_v44 = vrot.slane %v4327_v43, 5  ;;  %v1306_v54 = vrot.slane %v4328_v52, 5  ;;  %v1212_v11 = vld [vmem:[#allocation2 + $0x48] sm:$0xe] }
  0xad   : > { %v1199_v27 = vor.u32 %v1198_v16, %v1194_v15  ;;  %v1204_v29 = vrot.slane %v1202_v17, 5  ;;  %v1300_v56 = vsel %vm4859_vm14, %v1298_v24, %v1299_v33  ;;  %v1293_v63 = vsel %vm4859_vm14, %v1291_v6, %v1292_v31  ;;  %v4329_v16 = vld [vmem:[#allocation2 + $0x40] sm:$0xf]  ;;  %v1213_v19 = vld [vmem:[#allocation2 + $0x54] sm:$0xe] }
  0xae   : > { %v1189_v37 = vor.u32 %v1188_v23, %v1185_v21  ;;  %v1304_v62 = vsel %vm4859_vm14, %v3928_v42, %v1303_v44  ;;  %v1305_v48 = vrot.slane %v1303_v44, 4  ;;  %v3929_v8 = vrot.slane %v1211_v46, 9 }
  0xaf   : > { %v1200_v47 = vrot.slane %v1199_v27, 4  ;;  %v2754_v4 = vunpack.c.l.b16 %v1304_v62  ;;  %v1310_v17 = vrot.slane %v4329_v16, 5  ;;  %v2752_v21 = vunpack.c.l.b16 %v1297_v51  ;;  %v1216_v62 = vld [vmem:[#allocation2 + $0x78] sm:$0xe] }
  0xb0   : > { %v1190_v55 = vrot.slane %v1189_v37, 4  ;;  %v1307_v13 = vsel %vm4859_vm14, %v1305_v48, %v1306_v54  ;;  %v2753_v23 = vunpack.c.l.b16 %v1300_v56  ;;  %v2751_v6 = vunpack.c.l.b16 %v1293_v63  ;;  %v1215_v54 = vld [vmem:[#allocation2 + $0x6c] sm:$0xe] }
  0xb1   : > { %v1205_v50 = vsel %vm4542_vm11, %v1200_v47, %v1204_v29  ;;  %v2755_v24 = vunpack.c.l.b16 %v1307_v13  ;;  %v3930_v27 = vrot.slane %v1212_v11, 9  ;;  %v1317_v29 = vrot.slane %v4646_v53, 5 }
  0xb2   : > { %v1195_v5 = vsel %vm4542_vm11, %v1190_v55, %v1194_v15  ;;  %v2697_v12 = vunpack.c.l.b16 %v1205_v50  ;;  %v1320_v30 = vrot.slane %v4651_v58, 5  ;;  %v1313_v33 = vrot.slane %v4330_v32, 5 }
  0xb3   : > { %v2696_v20 = vunpack.c.l.b16 %v1195_v5  ;;  %2794 = vrot.lane.b32.xlu1 %v2778_v40, %s4397_s30  ;;  %v2782_v31 = vpack.c.b16 %v2755_v24, %v2754_v4  ;;  %v3931_v37 = vrot.slane %v1213_v19, 9  ;;  %v1311_v42 = vsel %vm4859_vm14, %v3929_v8, %v1310_v17 }
  0xb4   : > { %v1312_v43 = vrot.slane %v1310_v17, 4  ;;  %v1319_v44 = vrot.slane %v1317_v29, 4  ;;  %v1324_v40 = vrot.slane %v4703_v28, 5  ;;  %v2781_v46 = vpack.c.b16 %v2753_v23, %v2752_v21 }
  0xb5   : > { %v2713_v15 = vpack.c.b16 %v2697_v12, %v2696_v20  ;;  %2802 = vrot.lane.b32.xlu2 %v2782_v31, %s4397_s30  ;;  %v1318_v53 = vsel %vm4859_vm14, %v3930_v27, %v1317_v29  ;;  %v1327_v58 = vrot.slane %v4707_v38, 5  ;;  %v2780_v55 = vpack.c.b16 %v2751_v6, %v2750_v35  ;;  %v1214_v38 = vld [vmem:[#allocation2 + $0x60] sm:$0xe] }
  0xb6   : > { %v1321_v47 = vsel %vm4859_vm14, %v1319_v44, %v1320_v30  ;;  %v1325_v51 = vsel %vm4859_vm14, %v3931_v37, %v1324_v40  ;;  %v1326_v52 = vrot.slane %v1324_v40, 4  ;;  %v2756_v28 = vunpack.c.l.b16 %v1311_v42  ;;  %v1218_v30 = vld [vmem:[#allocation2 + $0x90] sm:$0xe] }
  0xb7   : > { %2744 = vrot.lane.b32.xlu0 %v2713_v15, %s4396_s29  ;;  %v2760_v56 = vunpack.c.l.b16 %v1325_v51  ;;  %v1314_v48 = vsel %vm4859_vm14, %v1312_v43, %v1313_v33  ;;  %v2758_v50 = vunpack.c.l.b16 %v1318_v53  ;;  %v1331_v4 = vrot.slane %v4671_v41, 5  ;;  %s161_s29 = sand.u32 1, %s4385_s13  }
  0xb8   : > { %v1328_v63 = vsel %vm4859_vm14, %v1326_v52, %v1327_v58  ;;  %v2759_v8 = vunpack.c.l.b16 %v1321_v47  ;;  %v3933_v5 = vrot.slane %v1215_v54, 9  ;;  %v1338_v35 = vrot.slane %v4732_v18, 5 }
  0xb9   : > { %v2761_v11 = vunpack.c.l.b16 %v1328_v63  ;;  %v1341_v12 = vrot.slane %v4735_v22, 5  ;;  %v3934_v13 = vrot.slane %v1216_v62, 9  ;;  %v1345_v16 = vrot.slane %v4776_v61, 5 }
  0xba   : > { %v1348_v17 = vrot.slane %v4780_v9, 5  ;;  %v2757_v19 = vunpack.c.l.b16 %v1314_v48  ;;  %v3932_v21 = vrot.slane %v1214_v38, 9  ;;  %v1340_v23 = vrot.slane %v1338_v35, 4  ;;  %v1219_v9 = vld [vmem:[#allocation2 + $0x9c] sm:$0xe] }
  0xbb   : > { %2800 = vrot.lane.b32.xlu1 %v2781_v46, %s4397_s30  ;;  %v2785_v20 = vpack.c.b16 %v2761_v11, %v2760_v56  ;;  %v1333_v24 = vrot.slane %v1331_v4, 4  ;;  %v1334_v41 = vrot.slane %v4684_v57, 5  ;;  %v1346_v6 = vsel %vm4859_vm14, %v3934_v13, %v1345_v16  ;;  %v1217_v46 = vld [vmem:[#allocation2 + $0x84] sm:$0xe] }
  0xbc   : > { %v1347_v27 = vrot.slane %v1345_v16, 4  ;;  %v2784_v18 = vpack.c.b16 %v2759_v8, %v2758_v50  ;;  %v1339_v22 = vsel %vm4859_vm14, %v3933_v5, %v1338_v35  ;;  %v2766_v61 = vunpack.c.l.b16 %v1346_v6  ;;  %v1221_v8 = vld [vmem:[#allocation2 + $0xb4] sm:$0xe]  ;;  %v1220_v16 = vld [vmem:[#allocation2 + $0xa8] sm:$0xe] }
  0xbd   : > { %2808 = vrot.lane.b32.xlu2 %v2785_v20, %s4397_s30  ;;  %v1342_v29 = vsel %vm4859_vm14, %v1340_v23, %v1341_v12  ;;  %v2783_v15 = vpack.c.b16 %v2757_v19, %v2756_v28  ;;  %v1359_v32 = vrot.slane %v4807_v59, 5  ;;  %v1332_v33 = vsel %vm4859_vm14, %v3932_v21, %v1331_v4 }
  0xbe   : > { %v1349_v57 = vsel %vm4859_vm14, %v1347_v27, %v1348_v17  ;;  %v1335_v37 = vsel %vm4859_vm14, %v1333_v24, %v1334_v41  ;;  %v2764_v42 = vunpack.c.l.b16 %v1339_v22  ;;  %v3937_v43 = vrot.slane %v1219_v9, 9  ;;  %v4979_v22 = vpop.permute.xlu2 %2722 }
  0xbf   : > { %2798 = vrot.lane.b32.xlu0 %v2780_v55, %s4397_s30  ;;  %v2767_v31 = vunpack.c.l.b16 %v1349_v57  ;;  %v2765_v44 = vunpack.c.l.b16 %v1342_v29  ;;  %v1352_v53 = vrot.slane %v4745_v60, 5  ;;  %v3936_v58 = vrot.slane %v1218_v30, 9  ;;  %v4222_v29 = vld [vmem:[#allocation2 + $0xc] sm:$0xff] }
  0xc0   : > { %v1361_v47 = vrot.slane %v1359_v32, 4  ;;  %v1362_v51 = vrot.slane %v4812_v14, 5  ;;  %v1366_v59 = vrot.slane %v4845_v39, 5  ;;  %v1369_v52 = vrot.slane %v4849_v49, 5 }
  0xc1   : > { %v2788_v40 = vpack.c.b16 %v2767_v31, %v2766_v61  ;;  %v2762_v54 = vunpack.c.l.b16 %v1332_v33  ;;  %v2763_v55 = vunpack.c.l.b16 %v1335_v37  ;;  %v3935_v28 = vrot.slane %v1217_v46, 9 }
  0xc2   : > { %v1367_v56 = vsel %vm4859_vm14, %v3937_v43, %v1366_v59  ;;  %v1368_v62 = vrot.slane %v1366_v59, 4  ;;  %v2787_v48 = vpack.c.b16 %v2765_v44, %v2764_v42  ;;  %v1354_v60 = vrot.slane %v1352_v53, 4  ;;  %v322_v42 = vld [vmem:[%s4500_s28 + $0x78] sm:$0xf]  ;;  %v323_v43 = vld [vmem:[%s4500_s28 + $0x7c] sm:$0xf] }
  0xc3   : > { %2806 = vrot.lane.b32.xlu1 %v2784_v18, %s4397_s30  ;;  %v1355_v50 = vrot.slane %v4748_v0, 5  ;;  %v2772_v14 = vunpack.c.l.b16 %v1367_v56  ;;  %v1360_v39 = vsel %vm4859_vm14, %v3936_v58, %v1359_v32  ;;  %v1363_v49 = vsel %vm4859_vm14, %v1361_v47, %v1362_v51  ;;  %v230_v32 = vld [vmem:[#allocation2 + $0xc0] sm:$0x1] }
  0xc4   : > { %v1370_v63 = vsel %vm4859_vm14, %v1368_v62, %v1369_v52  ;;  %v1380_v38 = vrot.slane %v4878_v26, 5  ;;  %v2786_v11 = vpack.c.b16 %v2763_v55, %v2762_v54  ;;  %v1353_v5 = vsel %vm4859_vm14, %v3935_v28, %v1352_v53  ;;  %v4224_v52 = vld [vmem:[#allocation2 + $0x24] sm:$0xff]  ;;  %v4999_v54 = vpop.permute.xlu1 %2718  ;;  %v2715_v62 = vpop.permute.xlu0 %2714 }
  0xc5   : > { %2814 = vrot.lane.b32.xlu2 %v2788_v40, %s4397_s30  ;;  %v2773_v4 = vunpack.c.l.b16 %v1370_v63  ;;  %v1356_v0 = vsel %vm4859_vm14, %v1354_v60, %v1355_v50  ;;  %v2770_v35 = vunpack.c.l.b16 %v1360_v39  ;;  %v2771_v12 = vunpack.c.l.b16 %v1363_v49  ;;  %v4225_v40 = vld [vmem:[#allocation2 + $0x30] sm:$0xff]  ;;  %v1385_v50 = vld [vmem:[#allocation2 + $0xc] sm:$0xf]  ;;  %v4223_v39 = vld [vmem:[#allocation2 + $0x18] sm:$0xff] }
  0xc6   : > { %v1373_v17 = vrot.slane %v4823_v45, 5  ;;  %v3939_v19 = vrot.slane %v1221_v8, 9  ;;  %v1382_v20 = vrot.slane %v1380_v38, 4  ;;  %v1383_v26 = vrot.slane %v4883_v7, 5  ;;  %v4990_v37 = vpop.permute.xlu2 %2724 }
  0xc7   : > { %2804 = vrot.lane.b32.xlu0 %v2783_v15, %s4397_s30  ;;  %v2791_v13 = vpack.c.b16 %v2773_v4, %v2772_v14  ;;  %v2768_v21 = vunpack.c.l.b16 %v1353_v5  ;;  %v2769_v23 = vunpack.c.l.b16 %v1356_v0  ;;  %v2790_v24 = vpack.c.b16 %v2771_v12, %v2770_v35  ;;  %v5004_v14 = vld [vmem:[#allocation2 + $0x10] sm:$0xf]  ;;  %v5012_v0 = vld [vmem:[#allocation2 + $0x14] sm:$0x1] }
  0xc8   : > { %v3938_v41 = vrot.slane %v1220_v16, 9  ;;  %v1375_v6 = vrot.slane %v1373_v17, 4  ;;  %v1376_v27 = vrot.slane %v4816_v36, 5  ;;  %v1381_v18 = vsel %vm4859_vm14, %v3939_v19, %v1380_v38  ;;  %v4228_v38 = vld [vmem:[#allocation2 + $0x54] sm:$0xff]  ;;  %v5017_v19 = vld [vmem:[#allocation2 + $0x70] sm:$0xf] }
  0xc9   : > { %v1384_v45 = vsel %vm4859_vm14, %v1382_v20, %v1383_v26  ;;  %v2789_v7 = vpack.c.b16 %v2769_v23, %v2768_v21  ;;  %v2776_v61 = vunpack.c.l.b16 %v1381_v18  ;;  %v231_v33 = vsel %vm4476_vm3, 0, %v230_v32  ;;  %v4227_v20 = vld [vmem:[#allocation2 + $0x48] sm:$0xff]  ;;  %v4211_v26 = vld [vmem:[#allocation2 + $0x3c] sm:$0xff] }
  0xca   : > { %v2777_v9 = vunpack.c.l.b16 %v1384_v45  ;;  %v1374_v57 = vsel %vm4859_vm14, %v3938_v41, %v1373_v17  ;;  %v1377_v36 = vsel %vm4859_vm14, %v1375_v6, %v1376_v27  ;;  %232 = vst [vmem:[#allocation2 + $0xc0] sm:$0x1] %v231_v33  ;;  %v592_v46 = vshrl.u32 %v322_v42, 16  ;;  %v1401_v17 = vld [vmem:[#allocation2 + $0x6c] sm:$0xf]  ;;  %v4214_v21 = vld [vmem:[#allocation2 + $0x60] sm:$0xff] }
  0xcb   : > { %2812 = vrot.lane.b32.xlu1 %v2787_v48, %s4397_s30  ;;  %v2774_v30 = vunpack.c.l.b16 %v1374_v57  ;;  %v2775_v15 = vunpack.c.l.b16 %v1377_v36  ;;  %v600_v53 = vshrl.u32 %v323_v43, 16  ;;  %v595_v47 = vshll.u32 %v322_v42, 16  ;;  %v4206_v6 = vld [vmem:[#allocation2] sm:$0xff]  ;;  %v5026_v57 = vld [vmem:[#allocation2 + $0x74] sm:$0x1] }
  0xcc   : > { %v2793_v31 = vpack.c.b16 %v2777_v9, %v2776_v61  ;;  %v594_v58 = vrot.slane %v592_v46, 7  ;;  %v603_v59 = vshll.u32 %v323_v43, 16  ;;  %v1434_v63 = vshrl.u32 %v1385_v50, 16  ;;  %v1409_v43 = vld [vmem:[#allocation2 + $0x9c] sm:$0xf] }
  0xcd   : > { %2820 = vrot.lane.b32.xlu2 %v2791_v13, %s4397_s30  ;;  %v2792_v44 = vpack.c.b16 %v2775_v15, %v2774_v30  ;;  %v4995_v51 = vrot.slane %v600_v53, 7  ;;  %v1437_v4 = vshll.u32 %v1385_v50, 16  ;;  %v1443_v8 = vshll.u32 %v5004_v14, 16  ;;  %v4210_v13 = vld [vmem:[#allocation2 + $0x30] sm:$0xff]  ;;  %v4226_v15 = vld [vmem:[#allocation2 + $0x3c] sm:$0xff]  ;;  %v4217_v53 = vld [vmem:[#allocation2 + $0x84] sm:$0xff] }
  0xce   : > { %v597_v55 = vor.u32 %v595_v47, %v594_v58  ;;  %v598_v28 = vrot.slane %v594_v58, 4  ;;  %v1447_v34 = vshrl.u32 %v5004_v14, 16  ;;  %v1436_v5 = vrot.slane %v1434_v63, 4  ;;  %v5043_v58 = vld [vmem:[#allocation2 + $0xa0] sm:$0xf] }
  0xcf   : > { %2810 = vrot.lane.b32.xlu0 %v2786_v11, %s4397_s30  ;;  %v605_v56 = vor.u32 %v603_v59, %v4995_v51  ;;  %v2731_v11 = vpop.permute.xlu2 %2730  ;;  %v1439_v35 = vrot.slane %v1437_v4, 5  ;;  %v5014_v12 = vrot.slane %v1443_v8, 5  ;;  %v1453_v16 = vshll.u32 %v5012_v0, 16 }
  0xd0   : > { %v1449_v25 = vrot.slane %v1447_v34, 4  ;;  %v1626_v41 = vshrl.u32 %v1401_v17, 16  ;;  %v1629_v27 = vshll.u32 %v1401_v17, 16  ;;  %v1635_v18 = vshll.u32 %v5017_v19, 16  ;;  %v4230_v34 = vld [vmem:[#allocation2 + $0x6c] sm:$0xff] }
  0xd1   : > { %v606_v48 = vsel %vm4525_vm9, %v598_v28, %v605_v56  ;;  %v764_v60 = vld [vmem:[#allocation2 + $0xc0] sm:$0xf]  ;;  %v1440_v23 = vor.u32 %v1439_v35, %v1436_v5  ;;  %v1639_v45 = vshrl.u32 %v5017_v19, 16  ;;  %v5030_v30 = vsel %vm3338_vm15, %v4210_v13, %v4979_v22  ;;  %v5052_v56 = vld [vmem:[#allocation2 + $0xa4] sm:$0x1] }
  0xd2   : > { %v765_v49 = vsel %vm4514_vm8, %v597_v55, %v764_v60  ;;  %767 = vst.msk [vmem:[#allocation2 + $0xc4] sm:$0xf] %vm170_vm0, %v606_v48  ;;  %v1628_v36 = vrot.slane %v1626_v41, 4  ;;  %v1631_v32 = vrot.slane %v1629_v27, 5  ;;  %v5032_v33 = vrot.slane %v1635_v18, 5  ;;  %v4207_v48 = vld [vmem:[#allocation2 + $0xc] sm:$0xff] }
  0xd3   : > { %2818 = vrot.lane.b32.xlu1 %v2790_v24, %s4397_s30  ;;  %766 = vst [vmem:[#allocation2 + $0xc0] sm:$0xf] %v765_v49  ;;  %v1450_v24 = vor.u32 %v1449_v25, %v5014_v12  ;;  %v1441_v61 = vrot.slane %v1440_v23, 4  ;;  %v1641_v42 = vrot.slane %v1639_v45, 4  ;;  %v5040_v46 = vsel %vm3338_vm15, %v4214_v21, %v2731_v11  ;;  %v4212_v41 = vld [vmem:[#allocation2 + $0x48] sm:$0xff]  ;;  %v4229_v27 = vld [vmem:[#allocation2 + $0x60] sm:$0xff] }
  0xd4   : > { %v1645_v22 = vshll.u32 %v5026_v57, 16  ;;  %v1722_v47 = vshrl.u32 %v1409_v43, 16  ;;  %v5046_v59 = vsel %vm3338_vm15, %v4206_v6, %v2715_v62  ;;  %v1731_v49 = vshll.u32 %v5043_v58, 16  ;;  %v4234_v18 = vld [vmem:[#allocation2 + $0x9c] sm:$0xff] }
  0xd5   : > { %2890 = vrot.lane.b32.xlu2 %v4222_v29, %s4398_s4  ;;  %v1451_v9 = vrot.slane %v1450_v24, 4  ;;  %v1455_v29 = vrot.slane %v1453_v16, 5  ;;  %v1446_v55 = vsel %vm4542_vm11, %v1441_v61, %v5014_v12  ;;  %v1642_v28 = vor.u32 %v1641_v42, %v5032_v33  ;;  %v4209_v16 = vld [vmem:[#allocation2 + $0x24] sm:$0xff]  ;;  %v1829_v42 = vld [vmem:[#allocation2 + $0x9c] sm:$0xe] }
  0xd6   : > { %v1724_v50 = vrot.slane %v1722_v47, 4  ;;  %v1647_v4 = vrot.slane %v1645_v22, 5  ;;  %v1735_v8 = vshrl.u32 %v5043_v58, 16  ;;  %v1733_v35 = vrot.slane %v1731_v49, 5 }
  0xd7   : > { %2816 = vrot.lane.b32.xlu0 %v2789_v7, %s4397_s30  ;;  %v5024_v7 = vpop.permute.xlu1 %2720  ;;  %v1456_v60 = vsel %vm4542_vm11, %v1451_v9, %v1455_v29  ;;  %v1741_v12 = vshll.u32 %v5052_v56, 16  ;;  %v607_v13 = vrot.slane %v4995_v51, 4  ;;  %v5073_v23 = vunpack.c.l.b16 %v1446_v55 }
  0xd8   : > { %v1737_v17 = vrot.slane %v1735_v8, 4  ;;  %v5075_v24 = vunpack.c.l.b16 %v1456_v60  ;;  %v1967_v22 = vrot.slane %v5043_v58, 5  ;;  %v3952_v55 = vrot.slane %v1829_v42, 9 }
  0xd9   : > { %vm3387_vm0 = vcmask 130048   ;;  %vm3420_vm1 = vcmask 195584   ;;  %vm3453_vm2 = vcmask 261120   ;;  %vm3681_vm4 = vcmask 1043456  }
  0xda   : > { %v1738_v61 = vor.u32 %v1737_v17, %v1733_v35  ;;  %v2954_v47 = vpack.c.b16 %v5075_v24, %v5073_v23  ;;  %v5128_v17 = vsel %vm4859_vm14, %v3952_v55, %v1967_v22  ;;  %v2002_v23 = vld [vmem:[#allocation2 + $0x48] sm:$0xf]  ;;  %vm3486_vm6 = vcmask 326656  }
  0xdb   : > { %2824 = vrot.lane.b32.xlu1 %v2793_v31, %s4397_s30  ;;  %v2717_v31 = vpop.permute.xlu0 %2716  ;;  %vm3519_vm7 = vcmask 392192   ;;  %vm3552_vm8 = vcmask 457728   ;;  %vm3585_vm9 = vcmask 523264   ;;  %vm3648_vm10 = vcmask 588800  }
  0xdc   : > { %v5071_v21 = vsel %vm3338_vm15, %v4207_v48, %v2717_v31 }
  0xdd   : > { %2896 = vrot.lane.b32.xlu2 %v4225_v40, %s4398_s4  ;;  %v4231_v40 = vld [vmem:[#allocation2 + $0x78] sm:$0xff] }
  0xdf   : > { %2822 = vrot.lane.b32.xlu0 %v2792_v44, %s4397_s30  ;;  %v5037_v44 = vsel %vm3338_vm15, %v4211_v26, %v4990_v37  ;;  %v1632_v37 = vor.u32 %v1631_v32, %v1628_v36  ;;  %v1939_v26 = vrot.slane %v5017_v19, 5  ;;  %v4213_v19 = vld [vmem:[#allocation2 + $0x54] sm:$0xff]  ;;  %v1743_v36 = vrot.slane %v1741_v12, 5 }
  0xe0   : > { %v1942_v32 = vrot.slane %v5026_v57, 5 }
  0xe1   : > { %v1633_v63 = vrot.slane %v1632_v37, 4  ;;  %v1941_v31 = vrot.slane %v1939_v26, 4  ;;  %v2010_v37 = vld [vmem:[#allocation2 + $0x78] sm:$0xf] }
  0xe2   : > { %v2737_v62 = vpop.permute.xlu2 %2736  ;;  %v2238_v8 = vshll.u32 %v2010_v37, 16 }
  0xe3   : > { %2894 = vrot.lane.b32.xlu1 %v4224_v52, %s4398_s4  ;;  %v4208_v52 = vld [vmem:[#allocation2 + $0x18] sm:$0xff]  ;;  %v5061_v11 = vsel %vm3338_vm15, %v4217_v53, %v2737_v62  ;;  %v5111_v58 = vsel %vm4859_vm14, %v1941_v31, %v1942_v32  ;;  %v1970_v62 = vrot.slane %v5052_v56, 5  ;;  %v5139_v32 = vld [vmem:[#allocation2 + $0xb0] sm:$0x1] }
  0xe4   : > { %v5066_v25 = vsel %vm3338_vm15, %v4208_v52, %v4999_v54  ;;  %v1638_v54 = vsel %vm4542_vm11, %v1633_v63, %v5032_v33  ;;  %v2727_v33 = vpop.permute.xlu0 %2726  ;;  %v2235_v63 = vshrl.u32 %v2010_v37, 16 }
  0xe5   : > { %2902 = vrot.lane.b32.xlu2 %v4228_v38, %s4398_s4  ;;  %v1643_v38 = vrot.slane %v1642_v28, 4  ;;  %v5096_v52 = vsel %vm3338_vm15, %v4212_v41, %v2727_v33  ;;  %v5098_v57 = vunpack.c.l.b16 %v1638_v54  ;;  %v2240_v41 = vrot.slane %v2238_v8, 5  ;;  %v4237_v54 = vld [vmem:[#allocation2 + $0xc0] sm:$0xff] }
  0xe6   : > { %v2237_v56 = vrot.slane %v2235_v63, 4  ;;  %v3026_v33 = vunpack.c.l.b16 %v5128_v17 }
  0xe7   : > { %2892 = vrot.lane.b32.xlu0 %v4223_v39, %s4398_s4  ;;  %v1725_v39 = vshll.u32 %v1409_v43, 16  ;;  %v1648_v45 = vsel %vm4542_vm11, %v1643_v38, %v1647_v4  ;;  %v5086_v43 = vsel %vm3338_vm15, %v4209_v16, %v5024_v7  ;;  %v5100_v7 = vld [vmem:[#allocation2 + $0x7c] sm:$0xf]  ;;  %v2018_v38 = vld [vmem:[#allocation2 + $0xa8] sm:$0xf]  ;;  %v1969_v4 = vrot.slane %v1967_v22, 4 }
  0xe8   : > { %v5102_v28 = vunpack.c.l.b16 %v1648_v45  ;;  %v3019_v16 = vunpack.c.l.b16 %v5111_v58  ;;  %v2548_v8 = vrot.slane %v5100_v7, 5 }
  0xe9   : > { %v1727_v5 = vrot.slane %v1725_v39, 5 }
  0xeb   : > { %2900 = vrot.lane.b32.xlu1 %v4227_v20, %s4398_s4  ;;  %v1825_v20 = vld [vmem:[#allocation2 + $0x6c] sm:$0xe]  ;;  %v1728_v6 = vor.u32 %v1727_v5, %v1724_v50  ;;  %v4233_v50 = vld [vmem:[#allocation2 + $0x90] sm:$0xff]  ;;  %v2248_v5 = vshrl.u32 %v5100_v7, 16 }
  0xec   : > { %v3948_v9 = vrot.slane %v1825_v20, 9  ;;  %v5130_v20 = vld [vmem:[#allocation2 + $0x80] sm:$0x1] }
  0xed   : > { %2908 = vrot.lane.b32.xlu2 %v4231_v40, %s4398_s4  ;;  %v1729_v29 = vrot.slane %v1728_v6, 4  ;;  %v1739_v40 = vrot.slane %v1738_v61, 4  ;;  %v2254_v45 = vshll.u32 %v5130_v20, 16  ;;  %v2331_v61 = vshrl.u32 %v2018_v38, 16 }
  0xee   : > { %v5090_v53 = vsel %vm4859_vm14, %v3948_v9, %v1939_v26 }
  0xef   : > { %2898 = vrot.lane.b32.xlu0 %v4226_v15, %s4398_s4  ;;  %v2729_v15 = vpop.permute.xlu1 %2728  ;;  %v1734_v48 = vsel %vm4542_vm11, %v1729_v29, %v1733_v35  ;;  %v1744_v39 = vsel %vm4542_vm11, %v1739_v40, %v1743_v36  ;;  %v3018_v49 = vunpack.c.l.b16 %v5090_v53  ;;  %v5121_v35 = vld [vmem:[#allocation2 + $0xac] sm:$0xf]  ;;  %v1971_v36 = vsel %vm4859_vm14, %v1969_v4, %v1970_v62  ;;  %v2434_v4 = vld [vmem:[#allocation2 + $0x78] sm:$0xe] }
  0xf0   : > { %v5107_v60 = vsel %vm3338_vm15, %v4213_v19, %v2729_v15  ;;  %v5123_v12 = vunpack.c.l.b16 %v1734_v48  ;;  %v5132_v26 = vunpack.c.l.b16 %v1744_v39  ;;  %v2334_v19 = vshll.u32 %v2018_v38, 16  ;;  %v4236_v39 = vld [vmem:[#allocation2 + $0xb4] sm:$0xff] }
  0xf1   : > { %v2340_v9 = vshll.u32 %v5121_v35, 16  ;;  %v2241_v15 = vor.u32 %v2240_v41, %v2237_v56  ;;  %v2344_v42 = vshrl.u32 %v5121_v35, 16  ;;  %v2256_v40 = vrot.slane %v2254_v45, 5 }
  0xf2   : > { %v2333_v22 = vrot.slane %v2331_v61, 4  ;;  %v2336_v55 = vrot.slane %v2334_v19, 5  ;;  %v3027_v62 = vunpack.c.l.b16 %v1971_v36  ;;  %v2350_v38 = vshll.u32 %v5139_v32, 16  ;;  %v4235_v19 = vld [vmem:[#allocation2 + $0xa8] sm:$0xff] }
  0xf3   : > { %2906 = vrot.lane.b32.xlu1 %v4230_v34, %s4398_s4  ;;  %v2244_v34 = vshll.u32 %v5100_v7, 16  ;;  %v2242_v37 = vrot.slane %v2241_v15, 4  ;;  %v2342_v58 = vrot.slane %v2340_v9, 5  ;;  %v3964_v41 = vrot.slane %v2434_v4, 9 }
  0xf4   : > { %v2337_v63 = vor.u32 %v2336_v55, %v2333_v22  ;;  %v2352_v61 = vrot.slane %v2350_v38, 5  ;;  %v2550_v36 = vrot.slane %v2548_v8, 4  ;;  %v2962_v15 = vpack.c.b16 %v5102_v28, %v5098_v57  ;;  %v2438_v55 = vld [vmem:[#allocation2 + $0xa8] sm:$0xe] }
  0xf5   : > { %2914 = vrot.lane.b32.xlu2 %v4234_v18, %s4398_s4  ;;  %v2246_v6 = vrot.slane %v2244_v34, 5  ;;  %v4232_v18 = vld [vmem:[#allocation2 + $0x84] sm:$0xff]  ;;  %v4215_v34 = vld [vmem:[#allocation2 + $0x6c] sm:$0xff]  ;;  %v2549_v7 = vsel %vm4859_vm14, %v3964_v41, %v2548_v8  ;;  %v5173_v57 = vpack.c.b16 %v3027_v62, %v3026_v33  ;;  %v3968_v33 = vrot.slane %v2438_v55, 9 }
  0xf6   : > { %v2338_v45 = vrot.slane %v2337_v63, 4  ;;  %v3274_v53 = vunpack.c.l.b16 %v2549_v7  ;;  %v5186_v62 = vld [vmem:[#allocation2 + $0x44] sm:$0x1] }
  0xf7   : > { %2904 = vrot.lane.b32.xlu0 %v4229_v27, %s4398_s4  ;;  %v2250_v27 = vrot.slane %v2248_v5, 4  ;;  %v2247_v5 = vsel %vm4542_vm11, %v2242_v37, %v2246_v6  ;;  %v2576_v37 = vrot.slane %v5121_v35, 5 }
  0xf8   : > { %v2343_v22 = vsel %vm4542_vm11, %v2338_v45, %v2342_v58 }
  0xf9   : > { %v2251_v31 = vor.u32 %v2250_v27, %v2246_v6  ;;  %v4220_v27 = vld [vmem:[#allocation2 + $0xa8] sm:$0xff]  ;;  %v2551_v6 = vrot.slane %v5130_v20, 5  ;;  %v5168_v20 = vpack.c.b16 %v3019_v16, %v3018_v49  ;;  %v1394_v49 = vld [vmem:[#allocation2 + $0x40] sm:$0xf] }
  0xfa   : > { %v1911_v55 = vrot.slane %v1394_v49, 5 }
  0xfb   : > { %2912 = vrot.lane.b32.xlu1 %v4233_v50, %s4398_s4  ;;  %v2252_v48 = vrot.slane %v2251_v31, 4  ;;  %v2346_v50 = vrot.slane %v2344_v42, 4  ;;  %v2966_v31 = vpack.c.b16 %v5132_v26, %v5123_v12  ;;  %v2733_v42 = vpop.permute.xlu0 %2732 }
  0xfc   : > { %v2743_v29 = vpop.permute.xlu2 %2742 }
  0xfd   : > { %2920 = vrot.lane.b32.xlu2 %v4237_v54, %s4398_s4  ;;  %v2257_v17 = vsel %vm4542_vm11, %v2252_v48, %v2256_v40  ;;  %v2347_v56 = vor.u32 %v2346_v50, %v2342_v58  ;;  %v4216_v40 = vld [vmem:[#allocation2 + $0x78] sm:$0xff]  ;;  %v5171_v50 = vsel %vm3338_vm15, %v4215_v34, %v2733_v42  ;;  %v5178_v26 = vsel %vm3338_vm15, %v4220_v27, %v2743_v29 }
  0xfe   : > { %v5153_v54 = vunpack.c.l.b16 %v2257_v17  ;;  %v1393_v48 = vld [vmem:[#allocation2 + $0x3c] sm:$0xf]  ;;  %v5182_v58 = vunpack.c.l.b16 %v2343_v22  ;;  %v2578_v34 = vrot.slane %v2576_v37, 4  ;;  %v2579_v17 = vrot.slane %v5139_v32, 5 }
  0xff   : > { %2910 = vrot.lane.b32.xlu0 %v4232_v18, %s4398_s4  ;;  %v5151_v18 = vunpack.c.l.b16 %v2247_v5  ;;  %v2348_v9 = vrot.slane %v2347_v56, 4  ;;  %v1530_v63 = vshrl.u32 %v1393_v48, 16  ;;  %v1533_v38 = vshll.u32 %v1393_v48, 16  ;;  %v1817_v5 = vld [vmem:[#allocation2 + $0xc] sm:$0xe] }
 0x100   : > { %v1539_v27 = vshll.u32 %v1394_v49, 16  ;;  %v5208_v42 = vsel %vm4859_vm14, %v3968_v33, %v2576_v37  ;;  %v1821_v22 = vld [vmem:[#allocation2 + $0x3c] sm:$0xe]  ;;  %v5212_v48 = vsel %vm4859_vm14, %v2578_v34, %v2579_v17  ;;  %v1994_v37 = vld [vmem:[#allocation2 + $0x18] sm:$0xf]  ;;  %v1913_v33 = vrot.slane %v1911_v55, 4 }
 0x101   : > { %v2353_v12 = vsel %vm4542_vm11, %v2348_v9, %v2352_v61  ;;  %v3218_v35 = vpack.c.b16 %v5153_v54, %v5151_v18  ;;  %v1532_v56 = vrot.slane %v1530_v63, 4  ;;  %v1535_v41 = vrot.slane %v1533_v38, 5  ;;  %v5227_v38 = vld [vmem:[#allocation2 + $0x1c] sm:$0xf] }
 0x102   : > { %v5197_v8 = vunpack.c.l.b16 %v2353_v12  ;;  %v1543_v61 = vshrl.u32 %v1394_v49, 16  ;;  %v3940_v9 = vrot.slane %v1817_v5, 9  ;;  %v1914_v63 = vrot.slane %v5186_v62, 5 }
 0x103   : > { %2918 = vrot.lane.b32.xlu1 %v4236_v39, %s4398_s4  ;;  %v2552_v39 = vsel %vm4859_vm14, %v2550_v36, %v2551_v6  ;;  %v1536_v7 = vor.u32 %v1535_v41, %v1532_v56  ;;  %v1883_v36 = vrot.slane %v5004_v14, 5  ;;  %v1886_v6 = vrot.slane %v5012_v0, 5 }
 0x104   : > { %v2735_v28 = vpop.permute.xlu1 %2734  ;;  %v2797_v16 = vpop.permute.xlu2 %2796  ;;  %v3275_v45 = vunpack.c.l.b16 %v2552_v39  ;;  %v3222_v32 = vpack.c.b16 %v5197_v8, %v5182_v58  ;;  %v3944_v0 = vrot.slane %v1821_v22, 9  ;;  %v3283_v8 = vunpack.c.l.b16 %v5212_v48 }
 0x105   : > { %2994 = vrot.lane.b32.xlu2 %v2966_v31, %s4399_s5  ;;  %v5192_v29 = vsel %vm3387_vm0, %v5071_v21, %v2797_v16  ;;  %v5195_v4 = vsel %vm3338_vm15, %v4216_v40, %v2735_v28  ;;  %v1541_v21 = vrot.slane %v1539_v27, 5  ;;  %v4246_v31 = vld [vmem:[#allocation2 + $0x78] sm:$0xff]  ;;  %v1545_v40 = vrot.slane %v1543_v61, 4 }
 0x106   : > { %v1537_v14 = vrot.slane %v1536_v7, 4  ;;  %v1885_v28 = vrot.slane %v1883_v36, 4  ;;  %v5214_v12 = vpack.c.b16 %v3275_v45, %v3274_v53  ;;  %v5218_v58 = vsel %vm4859_vm14, %v3940_v9, %v1883_v36  ;;  %v2026_v45 = vld [vmem:[#allocation2 + $0x20] sm:$0x1]  ;;  %v5248_v9 = vld [vmem:[#allocation2 + $0x4c] sm:$0xf] }
 0x107   : > { %2916 = vrot.lane.b32.xlu0 %v4235_v19, %s4398_s4  ;;  %v1549_v19 = vshll.u32 %v5186_v62, 16  ;;  %v3282_v53 = vunpack.c.l.b16 %v5208_v42  ;;  %v5238_v5 = vsel %vm4859_vm14, %v3944_v0, %v1911_v55  ;;  %v3002_v17 = vunpack.c.l.b16 %v5218_v58  ;;  %v5259_v55 = vld [vmem:[#allocation2 + $0x50] sm:$0x1] }
 0x108   : > { %v1542_v39 = vsel %vm4542_vm11, %v1537_v14, %v1541_v21  ;;  %v5224_v49 = vsel %vm4859_vm14, %v1885_v28, %v1886_v6  ;;  %v2043_v56 = vshrl.u32 %v1994_v37, 16  ;;  %v2046_v41 = vshll.u32 %v1994_v37, 16 }
 0x109   : > { %v1551_v16 = vrot.slane %v1549_v19, 5  ;;  %v5240_v62 = vunpack.c.l.b16 %v1542_v39  ;;  %v3003_v27 = vunpack.c.l.b16 %v5224_v49  ;;  %v2052_v61 = vshll.u32 %v5227_v38, 16 }
 0x10a   : > { %v2056_v19 = vshrl.u32 %v5227_v38, 16  ;;  %v3010_v36 = vunpack.c.l.b16 %v5238_v5  ;;  %v2045_v6 = vrot.slane %v2043_v56, 4  ;;  %v2062_v22 = vshll.u32 %v2026_v45, 16  ;;  %v2426_v56 = vld [vmem:[#allocation2 + $0x18] sm:$0xe] }
 0x10b   : > { %2986 = vrot.lane.b32.xlu1 %v2962_v15, %s4399_s5  ;;  %v1546_v15 = vor.u32 %v1545_v40, %v1541_v21  ;;  %v1915_v21 = vsel %vm4859_vm14, %v1913_v33, %v1914_v63  ;;  %v2054_v42 = vrot.slane %v2052_v61, 5  ;;  %v2139_v14 = vshrl.u32 %v2002_v23, 16 }
 0x10c   : > { %v2058_v40 = vrot.slane %v2056_v19, 4  ;;  %v2148_v28 = vshll.u32 %v5248_v9, 16  ;;  %v2152_v37 = vshrl.u32 %v5248_v9, 16  ;;  %v3956_v61 = vrot.slane %v2426_v56, 9 }
 0x10d   : > { %3162 = vrot.lane.b32.xlu2 %v4246_v31, %s4400_s6  ;;  %v1547_v34 = vrot.slane %v1546_v15, 4  ;;  %v2048_v31 = vrot.slane %v2046_v41, 5  ;;  %v2141_v39 = vrot.slane %v2139_v14, 4  ;;  %v2492_v41 = vrot.slane %v5227_v38, 5 }
 0x10e   : > { %v2059_v15 = vor.u32 %v2058_v40, %v2054_v42  ;;  %v2150_v33 = vrot.slane %v2148_v28, 5  ;;  %v2154_v5 = vrot.slane %v2152_v37, 4  ;;  %v2495_v19 = vrot.slane %v2026_v45, 5  ;;  %v2739_v28 = vpop.permute.xlu0 %2738 }
 0x10f   : > { %2970 = vrot.lane.b32.xlu0 %v2954_v47, %s4399_s5  ;;  %v2803_v24 = vpop.permute.xlu2 %2802  ;;  %v1552_v47 = vsel %vm4542_vm11, %v1547_v34, %v1551_v16  ;;  %v2049_v0 = vor.u32 %v2048_v31, %v2045_v6  ;;  %v2064_v16 = vrot.slane %v2062_v22, 5  ;;  %v3302_v31 = vpack.c.b16 %v3283_v8, %v3282_v53 }
 0x110   : > { %v5252_v7 = vsel %vm3387_vm0, %v5030_v30, %v2803_v24  ;;  %v2931_v48 = vunpack.c.l.b16 %v1552_v47  ;;  %v2142_v30 = vshll.u32 %v2002_v23, 16  ;;  %v2060_v34 = vrot.slane %v2059_v15, 4  ;;  %v4218_v23 = vld [vmem:[#allocation2 + $0x90] sm:$0xff]  ;;  %v4219_v15 = vld [vmem:[#allocation2 + $0x9c] sm:$0xff] }
 0x111   : > { %v2050_v63 = vrot.slane %v2049_v0, 4  ;;  %v3011_v24 = vunpack.c.l.b16 %v1915_v21  ;;  %v2494_v22 = vrot.slane %v2492_v41, 4  ;;  %v4250_v21 = vld [vmem:[#allocation2 + $0xa8] sm:$0xff]  ;;  %v5283_v45 = vsel %vm4859_vm14, %v3956_v61, %v2492_v41 }
 0x112   : > { %v2144_v49 = vrot.slane %v2142_v30, 5  ;;  %v2065_v14 = vsel %vm4542_vm11, %v2060_v34, %v2064_v16  ;;  %v2958_v53 = vpack.c.b16 %v2931_v48, %v5240_v62  ;;  %v5290_v0 = vsel %vm3338_vm15, %v4218_v23, %v2739_v28  ;;  %v1403_v62 = vld [vmem:[#allocation2 + $0x78] sm:$0xf] }
 0x113   : > { %3074 = vrot.lane.b32.xlu1 %v5173_v57, %s4401_s7  ;;  %v2158_v57 = vshll.u32 %v5259_v55, 16  ;;  %v2055_v40 = vsel %vm4542_vm11, %v2050_v63, %v2054_v42  ;;  %v2430_v42 = vld [vmem:[#allocation2 + $0x48] sm:$0xe]  ;;  %v5294_v18 = vpack.c.b16 %v3003_v27, %v3002_v17  ;;  %v5296_v54 = vpack.c.b16 %v3011_v24, %v3010_v36  ;;  %v5312_v63 = vld [vmem:[#allocation2 + $0x80] sm:$0x1]  ;;  %v4238_v28 = vld [vmem:[#allocation2 + $0x18] sm:$0xff] }
 0x114   : > { %v2145_v47 = vor.u32 %v2144_v49, %v2141_v39  ;;  %v5300_v16 = vunpack.c.l.b16 %v2065_v14  ;;  %v3960_v39 = vrot.slane %v2430_v42, 9  ;;  %v2520_v49 = vrot.slane %v5248_v9, 5  ;;  %v1411_v24 = vld [vmem:[#allocation2 + $0xa8] sm:$0xf] }
 0x115   : > { %3250 = vrot.lane.b32.xlu2 %v3222_v32, %s4402_s8  ;;  %v2160_v30 = vrot.slane %v2158_v57, 5  ;;  %v5305_v57 = vld [vmem:[#allocation2 + $0x7c] sm:$0xf]  ;;  %v3258_v17 = vunpack.c.l.b16 %v5283_v45  ;;  %v2523_v36 = vrot.slane %v5259_v55, 5  ;;  %v1650_v34 = vshrl.u32 %v1403_v62, 16 }
 0x116   : > { %v2146_v38 = vrot.slane %v2145_v47, 4  ;;  %v5318_v9 = vsel %vm4859_vm14, %v3960_v39, %v2520_v49  ;;  %v1659_v23 = vshll.u32 %v5305_v57, 16  ;;  %v1663_v55 = vshrl.u32 %v5305_v57, 16  ;;  %v1826_v39 = vld [vmem:[#allocation2 + $0x78] sm:$0xe] }
 0x117   : > { %3066 = vrot.lane.b32.xlu0 %v5168_v20, %s4401_s7  ;;  %v2809_v6 = vpop.permute.xlu2 %2808  ;;  %v2155_v20 = vor.u32 %v2154_v5, %v2150_v33  ;;  %v1653_v5 = vshll.u32 %v1403_v62, 16  ;;  %v3266_v14 = vunpack.c.l.b16 %v5318_v9  ;;  %v1746_v42 = vshrl.u32 %v1411_v24, 16  ;;  %v5394_v45 = vld [vmem:[#allocation2 + $0x88] sm:$0xf] }
 0x118   : > { %v5272_v32 = vsel %vm3387_vm0, %v5107_v60, %v2809_v6  ;;  %v5287_v60 = vsel %vm4859_vm14, %v2494_v22, %v2495_v19  ;;  %v2151_v37 = vsel %vm4542_vm11, %v2146_v38, %v2150_v33  ;;  %v2522_v33 = vrot.slane %v2520_v49, 4 }
 0x119   : > { %v2156_v8 = vrot.slane %v2155_v20, 4  ;;  %v3259_v27 = vunpack.c.l.b16 %v5287_v60  ;;  %v5321_v41 = vunpack.c.l.b16 %v2151_v37  ;;  %v1652_v19 = vrot.slane %v1650_v34, 4  ;;  %v5328_v20 = vld [vmem:[#allocation2 + $0xac] sm:$0xf] }
 0x11a   : > { %v1655_v6 = vrot.slane %v1653_v5, 5  ;;  %v1661_v38 = vrot.slane %v1659_v23, 5  ;;  %v1759_v37 = vshrl.u32 %v5328_v20, 16  ;;  %v1748_v9 = vrot.slane %v1746_v42, 4 }
 0x11b   : > { %3242 = vrot.lane.b32.xlu1 %v3218_v35, %s4402_s8  ;;  %v5298_v35 = vunpack.c.l.b16 %v2055_v40  ;;  %v2161_v58 = vsel %vm4542_vm11, %v2156_v8, %v2160_v30  ;;  %v1669_v40 = vshll.u32 %v5312_v63, 16  ;;  %v1665_v30 = vrot.slane %v1663_v55, 4 }
 0x11c   : > { %v5325_v61 = vunpack.c.l.b16 %v2161_v58  ;;  %v1656_v8 = vor.u32 %v1655_v6, %v1652_v19  ;;  %v1761_v23 = vrot.slane %v1759_v37, 4  ;;  %v3949_v19 = vrot.slane %v1826_v39, 9  ;;  %v1830_v6 = vld [vmem:[#allocation2 + $0xa8] sm:$0xe]  ;;  %v2012_v39 = vld [vmem:[#allocation2 + $0x84] sm:$0xf] }
 0x11d   : > { %v2741_v48 = vpop.permute.xlu1 %2740  ;;  %2978 = vrot.lane.b32.xlu2 %v2958_v53, %s4399_s5  ;;  %v2524_v53 = vsel %vm4859_vm14, %v2522_v33, %v2523_v36  ;;  %v1666_v62 = vor.u32 %v1665_v30, %v1661_v38  ;;  %v3953_v37 = vrot.slane %v1830_v6, 9  ;;  %v2259_v60 = vshrl.u32 %v2012_v39, 16 }
 0x11e   : > { %v3380_v56 = vsel %vm3338_vm15, %v4219_v15, %v2741_v48  ;;  %v1749_v15 = vshll.u32 %v1411_v24, 16  ;;  %v1671_v48 = vrot.slane %v1669_v40, 5  ;;  %v1657_v58 = vrot.slane %v1656_v8, 4 }
 0x11f   : > { %3170 = vrot.lane.b32.xlu0 %v4250_v21, %s4400_s6  ;;  %v2815_v47 = vpop.permute.xlu2 %2814  ;;  %v5335_v21 = vld [vmem:[#allocation2 + $0xb0] sm:$0x1]  ;;  %v1667_v36 = vrot.slane %v1666_v62, 4  ;;  %v3267_v55 = vunpack.c.l.b16 %v2524_v53  ;;  %v1946_v8 = vrot.slane %v5305_v57, 5  ;;  %v3214_v57 = vpack.c.b16 %v5325_v61, %v5321_v41 }
 0x120   : > { %v5332_v22 = vsel %vm3387_vm0, %v5195_v4, %v2815_v47  ;;  %v1755_v4 = vshll.u32 %v5328_v20, 16  ;;  %v1751_v34 = vrot.slane %v1749_v15, 5  ;;  %v1662_v24 = vsel %vm4542_vm11, %v1657_v58, %v1661_v38 }
 0x121   : > { %v5354_v40 = vunpack.c.l.b16 %v1662_v24  ;;  %v1949_v38 = vrot.slane %v5312_v63, 5  ;;  %v5375_v63 = vsel %vm4859_vm14, %v3949_v19, %v1946_v8  ;;  %v1974_v41 = vrot.slane %v5328_v20, 5 }
 0x122   : > { %v1757_v33 = vrot.slane %v1755_v4, 5  ;;  %v1752_v47 = vor.u32 %v1751_v34, %v1748_v9  ;;  %v3020_v20 = vunpack.c.l.b16 %v5375_v63  ;;  %v2268_v19 = vshll.u32 %v5394_v45, 16  ;;  %v5487_v63 = vld [vmem:[#allocation2 + $0x20] sm:$0x1] }
 0x123   : > { %3330 = vrot.lane.b32.xlu1 %v3302_v31, %s4403_s9  ;;  %v1765_v31 = vshll.u32 %v5335_v21, 16  ;;  %v5405_v34 = vsel %vm4859_vm14, %v3953_v37, %v1974_v41  ;;  %v2272_v6 = vshrl.u32 %v5394_v45, 16  ;;  %v4242_v37 = vld [vmem:[#allocation2 + $0x48] sm:$0xff] }
 0x124   : > { %v1762_v30 = vor.u32 %v1761_v23, %v1757_v33  ;;  %v1753_v53 = vrot.slane %v1752_v47, 4  ;;  %v2261_v23 = vrot.slane %v2259_v60, 4 }
 0x125   : > { %v2795_v49 = vpop.permute.xlu1 %2794  ;;  %3146 = vrot.lane.b32.xlu2 %v4238_v28, %s4400_s6  ;;  %v1767_v15 = vrot.slane %v1765_v31, 5  ;;  %v5407_v31 = vld [vmem:[#allocation2 + $0x8c] sm:$0x1] }
 0x126   : > { %v5345_v5 = vsel %vm3387_vm0, %v5046_v59, %v2795_v49  ;;  %v1672_v59 = vsel %vm4542_vm11, %v1667_v36, %v1671_v48  ;;  %v3210_v48 = vpack.c.b16 %v5300_v16, %v5298_v35  ;;  %v1763_v4 = vrot.slane %v1762_v30, 4  ;;  %v2020_v36 = vld [vmem:[#allocation2 + $0xb4] sm:$0xf] }
 0x127   : > { %3322 = vrot.lane.b32.xlu0 %v5214_v12, %s4403_s9  ;;  %v2821_v12 = vpop.permute.xlu2 %2820  ;;  %v5359_v28 = vunpack.c.l.b16 %v1672_v59  ;;  %v1758_v49 = vsel %vm4542_vm11, %v1753_v53, %v1757_v33  ;;  %v5381_v35 = vpack.c.b16 %v3259_v27, %v3258_v17  ;;  %v5383_v16 = vpack.c.b16 %v3267_v55, %v3266_v14 }
 0x128   : > { %v5363_v62 = vsel %vm3387_vm0, %v3380_v56, %v2821_v12  ;;  %v1948_v56 = vrot.slane %v1946_v8, 4  ;;  %v1768_v58 = vsel %vm4542_vm11, %v1763_v4, %v1767_v15  ;;  %v2262_v17 = vshll.u32 %v2012_v39, 16  ;;  %v5420_v12 = vld [vmem:[#allocation2 + $0xb8] sm:$0xf]  ;;  %v5430_v4 = vld [vmem:[#allocation2 + $0xbc] sm:$0x1] }
 0x129   : > { %v5357_v42 = vpop.permute.xlu0 %2744  ;;  %v5400_v14 = vunpack.c.l.b16 %v1758_v49  ;;  %v1976_v33 = vrot.slane %v1974_v41, 4  ;;  %v5413_v24 = vunpack.c.l.b16 %v1768_v58  ;;  %v3028_v30 = vunpack.c.l.b16 %v5405_v34  ;;  %v2435_v41 = vld [vmem:[#allocation2 + $0x84] sm:$0xe] }
 0x12a   : > { %v5392_v9 = vsel %vm4859_vm14, %v1948_v56, %v1949_v38  ;;  %v2264_v55 = vrot.slane %v2262_v17, 5  ;;  %v2278_v8 = vshll.u32 %v5407_v31, 16  ;;  %v2270_v15 = vrot.slane %v2268_v19, 5 }
 0x12b   : > { %3058 = vrot.lane.b32.xlu1 %v5296_v54, %s4401_s7  ;;  %v2963_v54 = vpack.c.b16 %v5359_v28, %v5354_v40  ;;  %v3021_v47 = vunpack.c.l.b16 %v5392_v9  ;;  %v2274_v38 = vrot.slane %v2272_v6, 4  ;;  %v2364_v58 = vshll.u32 %v5420_v12, 16 }
 0x12c   : > { %v2280_v49 = vrot.slane %v2278_v8, 5  ;;  %v2374_v17 = vshll.u32 %v5430_v4, 16  ;;  %v2555_v34 = vrot.slane %v5394_v45, 5 }
 0x12d   : > { %v2801_v61 = vpop.permute.xlu1 %2800  ;;  %3234 = vrot.lane.b32.xlu2 %v3214_v57, %s4402_s8  ;;  %v2366_v6 = vrot.slane %v2364_v58, 5 }
 0x12e   : > { %v5398_v27 = vsel %vm3387_vm0, %v5086_v43, %v2801_v61  ;;  %v1977_v43 = vrot.slane %v5335_v21, 5  ;;  %v2355_v21 = vshrl.u32 %v2020_v36, 16  ;;  %v2358_v61 = vshll.u32 %v2020_v36, 16 }
 0x12f   : > { %3050 = vrot.lane.b32.xlu0 %v5294_v18, %s4401_s7  ;;  %v2891_v40 = vpop.permute.xlu2 %2890  ;;  %v2265_v18 = vor.u32 %v2264_v55, %v2261_v23  ;;  %v2439_v55 = vld [vmem:[#allocation2 + $0xb4] sm:$0xe]  ;;  %v2557_v8 = vrot.slane %v2555_v34, 4 }
 0x130   : > { %v5428_v53 = vsel %vm3420_vm1, %v5345_v5, %v2891_v40  ;;  %v1978_v39 = vsel %vm4859_vm14, %v1976_v33, %v1977_v43  ;;  %v2357_v56 = vrot.slane %v2355_v21, 4  ;;  %v2368_v5 = vshrl.u32 %v5420_v12, 16 }
 0x131   : > { %v2799_v59 = vpop.permute.xlu0 %2798  ;;  %v2266_v57 = vrot.slane %v2265_v18, 4  ;;  %v3029_v43 = vunpack.c.l.b16 %v1978_v39  ;;  %v2360_v36 = vrot.slane %v2358_v61, 5  ;;  %v2376_v40 = vrot.slane %v2374_v17, 5 }
 0x132   : > { %v5424_v28 = vsel %vm3387_vm0, %v5066_v25, %v2799_v59  ;;  %v2275_v25 = vor.u32 %v2274_v38, %v2270_v15  ;;  %v2370_v59 = vrot.slane %v2368_v5, 4  ;;  %v3043_v5 = vpack.c.b16 %v3021_v47, %v3020_v20  ;;  %v1395_v20 = vld [vmem:[#allocation2 + $0x48] sm:$0xf] }
 0x133   : > { %3226 = vrot.lane.b32.xlu1 %v3210_v48, %s4402_s8  ;;  %v2271_v60 = vsel %vm4542_vm11, %v2266_v57, %v2270_v15  ;;  %v3965_v48 = vrot.slane %v2435_v41, 9  ;;  %v2361_v18 = vor.u32 %v2360_v36, %v2357_v56  ;;  %v1387_v57 = vld [vmem:[#allocation2 + $0x18] sm:$0xf]  ;;  %v3047_v61 = vpack.c.b16 %v3029_v43, %v3028_v30 }
 0x134   : > { %v2276_v23 = vrot.slane %v2275_v25, 4  ;;  %v5447_v19 = vunpack.c.l.b16 %v2271_v60  ;;  %v2371_v39 = vor.u32 %v2370_v59, %v2366_v6  ;;  %v2967_v25 = vpack.c.b16 %v5413_v24, %v5400_v14 }
 0x135   : > { %v2807_v9 = vpop.permute.xlu1 %2806  ;;  %2988 = vrot.lane.b32.xlu2 %v2963_v54, %s4399_s5  ;;  %v5456_v54 = vsel %vm4859_vm14, %v3965_v48, %v2555_v34  ;;  %v1458_v60 = vshrl.u32 %v1387_v57, 16  ;;  %v1461_v17 = vshll.u32 %v1387_v57, 16  ;;  %v2586_v43 = vrot.slane %v5430_v4, 5 }
 0x136   : > { %v5443_v33 = vsel %vm3387_vm0, %v5096_v52, %v2807_v9  ;;  %v2281_v45 = vsel %vm4542_vm11, %v2276_v23, %v2280_v49  ;;  %v2558_v52 = vrot.slane %v5407_v31, 5  ;;  %v2362_v31 = vrot.slane %v2361_v18, 4  ;;  %v5478_v9 = vld [vmem:[#allocation2 + $0x1c] sm:$0xf] }
 0x137   : > { %3154 = vrot.lane.b32.xlu0 %v4242_v37, %s4400_s6  ;;  %v2897_v15 = vpop.permute.xlu2 %2896  ;;  %v5452_v38 = vunpack.c.l.b16 %v2281_v45  ;;  %v3969_v37 = vrot.slane %v2439_v55, 9  ;;  %v2372_v58 = vrot.slane %v2371_v39, 4  ;;  %v1460_v23 = vrot.slane %v1458_v60, 4 }
 0x138   : > { %v5464_v49 = vsel %vm3420_vm1, %v5398_v27, %v2897_v15  ;;  %v5468_v56 = vsel %vm4859_vm14, %v2557_v8, %v2558_v52  ;;  %v3276_v27 = vunpack.c.l.b16 %v5456_v54  ;;  %v2367_v14 = vsel %vm4542_vm11, %v2362_v31, %v2366_v6  ;;  %v5511_v15 = vld [vmem:[#allocation2 + $0x50] sm:$0x1] }
 0x139   : > { %v2805_v21 = vpop.permute.xlu0 %2804  ;;  %v2377_v24 = vsel %vm4542_vm11, %v2372_v58, %v2376_v40  ;;  %v3277_v30 = vunpack.c.l.b16 %v5468_v56  ;;  %v1463_v36 = vrot.slane %v1461_v17, 5  ;;  %v1467_v55 = vshll.u32 %v5478_v9, 16  ;;  %v5508_v40 = vld [vmem:[#allocation2 + $0x4c] sm:$0xf]  ;;  %v5573_v56 = vld [vmem:[#allocation2 + $0x28] sm:$0xf] }
 0x13a   : > { %v5460_v41 = vsel %vm3387_vm0, %v5037_v44, %v2805_v21  ;;  %v2583_v44 = vrot.slane %v5420_v12, 5  ;;  %v5505_v6 = vunpack.c.l.b16 %v2377_v24  ;;  %v1477_v59 = vshll.u32 %v5487_v63, 16 }
 0x13b   : > { %3314 = vrot.lane.b32.xlu1 %v5383_v16, %s4403_s9  ;;  %v3219_v16 = vpack.c.b16 %v5452_v38, %v5447_v19  ;;  %v1471_v19 = vshrl.u32 %v5478_v9, 16  ;;  %v1554_v4 = vshrl.u32 %v1395_v20, 16  ;;  %v1464_v8 = vor.u32 %v1463_v36, %v1460_v23  ;;  %v1818_v38 = vld [vmem:[#allocation2 + $0x18] sm:$0xe] }
 0x13c   : > { %v5495_v12 = vsel %vm4859_vm14, %v3969_v37, %v2583_v44  ;;  %v2585_v34 = vrot.slane %v2583_v44, 4  ;;  %v1469_v52 = vrot.slane %v1467_v55, 5  ;;  %v1479_v31 = vrot.slane %v1477_v59, 5  ;;  %v4251_v59 = vld [vmem:[#allocation2 + $0xb4] sm:$0xff] }
 0x13d   : > { %v2813_v48 = vpop.permute.xlu1 %2812  ;;  %3076 = vrot.lane.b32.xlu2 %v3047_v61, %s4401_s7  ;;  %v1473_v21 = vrot.slane %v1471_v19, 4  ;;  %v1465_v61 = vrot.slane %v1464_v8, 4  ;;  %v1556_v44 = vrot.slane %v1554_v4, 4  ;;  %v1557_v60 = vshll.u32 %v1395_v20, 16  ;;  %v1822_v19 = vld [vmem:[#allocation2 + $0x48] sm:$0xe] }
 0x13e   : > { %v5491_v47 = vsel %vm3387_vm0, %v5171_v50, %v2813_v48  ;;  %v5503_v50 = vunpack.c.l.b16 %v2367_v14  ;;  %v2587_v57 = vsel %vm4859_vm14, %v2585_v34, %v2586_v43  ;;  %v1563_v17 = vshll.u32 %v5508_v40, 16 }
 0x13f   : > { %3306 = vrot.lane.b32.xlu0 %v5381_v35, %s4403_s9  ;;  %v2903_v18 = vpop.permute.xlu2 %2902  ;;  %v3284_v35 = vunpack.c.l.b16 %v5495_v12  ;;  %v1474_v58 = vor.u32 %v1473_v21, %v1469_v52  ;;  %v1567_v48 = vshrl.u32 %v5508_v40, 16  ;;  %v3941_v14 = vrot.slane %v1818_v38, 9 }
 0x140   : > { %v5519_v37 = vsel %vm3420_vm1, %v5443_v33, %v2903_v18  ;;  %v1470_v33 = vsel %vm4542_vm11, %v1465_v61, %v1469_v52  ;;  %v1559_v34 = vrot.slane %v1557_v60, 5  ;;  %v1890_v43 = vrot.slane %v5478_v9, 5 }
 0x141   : > { %v2811_v45 = vpop.permute.xlu0 %2810  ;;  %v1475_v12 = vrot.slane %v1474_v58, 4  ;;  %v3285_v20 = vunpack.c.l.b16 %v2587_v57  ;;  %v1565_v36 = vrot.slane %v1563_v17, 5  ;;  %v1569_v55 = vrot.slane %v1567_v48, 4  ;;  %v1996_v17 = vld [vmem:[#allocation2 + $0x24] sm:$0xf] }
 0x142   : > { %v5515_v39 = vsel %vm3387_vm0, %v5040_v46, %v2811_v45  ;;  %v1573_v46 = vshll.u32 %v5511_v15, 16  ;;  %v5538_v45 = vunpack.c.l.b16 %v1470_v33  ;;  %v1560_v9 = vor.u32 %v1559_v34, %v1556_v44  ;;  %v4247_v48 = vld [vmem:[#allocation2 + $0x84] sm:$0xff] }
 0x143   : > { %3068 = vrot.lane.b32.xlu1 %v3043_v5, %s4401_s7  ;;  %v4221_v5 = vld [vmem:[#allocation2 + $0xb4] sm:$0xff]  ;;  %v1480_v4 = vsel %vm4542_vm11, %v1475_v12, %v1479_v31  ;;  %v1570_v8 = vor.u32 %v1569_v55, %v1565_v36  ;;  %v1892_v52 = vrot.slane %v1890_v43, 4  ;;  %v1893_v21 = vrot.slane %v5487_v63, 5  ;;  %v5577_v12 = vld [vmem:[#allocation2 + $0x2c] sm:$0x1] }
 0x144   : > { %v1575_v18 = vrot.slane %v1573_v46, 5  ;;  %v1561_v61 = vrot.slane %v1560_v9, 4  ;;  %v1918_v58 = vrot.slane %v5508_v40, 5  ;;  %v3386_v31 = vsel %vm3338_vm15, %v4221_v5, %v5357_v42 }
 0x145   : > { %v2819_v24 = vpop.permute.xlu1 %2818  ;;  %3244 = vrot.lane.b32.xlu2 %v3219_v16, %s4402_s8  ;;  %v3945_v16 = vrot.slane %v1822_v19, 9  ;;  %v1571_v63 = vrot.slane %v1570_v8, 4  ;;  %v3299_v40 = vpack.c.b16 %v3277_v30, %v3276_v27  ;;  %v3303_v46 = vpack.c.b16 %v3285_v20, %v3284_v35 }
 0x146   : > { %v5532_v23 = vsel %vm3387_vm0, %v5290_v0, %v2819_v24  ;;  %v1891_v0 = vsel %vm4859_vm14, %v3941_v14, %v1890_v43  ;;  %v1566_v42 = vsel %vm4542_vm11, %v1561_v61, %v1565_v36  ;;  %v1920_v33 = vrot.slane %v1918_v58, 4  ;;  %v5585_v36 = vld [vmem:[#allocation2 + $0x58] sm:$0xf] }
 0x147   : > { %2996 = vrot.lane.b32.xlu0 %v2967_v25, %s4399_s5  ;;  %v2909_v57 = vpop.permute.xlu2 %2908  ;;  %v5543_v25 = vunpack.c.l.b16 %v1480_v4  ;;  %v1576_v14 = vsel %vm4542_vm11, %v1571_v63, %v1575_v18  ;;  %v3004_v24 = vunpack.c.l.b16 %v1891_v0  ;;  %v5571_v54 = vsel %vm4859_vm14, %v3945_v16, %v1918_v58 }
 0x148   : > { %v5554_v60 = vsel %vm3420_vm1, %v5491_v47, %v2909_v57  ;;  %v3223_v47 = vpack.c.b16 %v5505_v6, %v5503_v50  ;;  %v2067_v34 = vshrl.u32 %v1996_v17, 16  ;;  %v2004_v50 = vld [vmem:[#allocation2 + $0x54] sm:$0xf]  ;;  %v5582_v43 = vunpack.c.l.b16 %v1566_v42 }
 0x149   : > { %v2817_v38 = vpop.permute.xlu0 %2816  ;;  %v2955_v30 = vpack.c.b16 %v5543_v25, %v5538_v45  ;;  %v1921_v5 = vrot.slane %v5511_v15, 5  ;;  %v2070_v20 = vshll.u32 %v1996_v17, 16  ;;  %v5589_v55 = vunpack.c.l.b16 %v1576_v14  ;;  %v5602_v17 = vld [vmem:[#allocation2 + $0x5c] sm:$0x1] }
 0x14a   : > { %v5550_v44 = vsel %vm3387_vm0, %v5061_v11, %v2817_v38  ;;  %v1894_v11 = vsel %vm4859_vm14, %v1892_v52, %v1893_v21  ;;  %v3012_v19 = vunpack.c.l.b16 %v5571_v54  ;;  %v2076_v4 = vshll.u32 %v5573_v56, 16  ;;  %v5674_v25 = vld [vmem:[#allocation2 + $0xbc] sm:$0x1] }
 0x14b   : > { %3172 = vrot.lane.b32.xlu1 %v4251_v59, %s4400_s6  ;;  %v3005_v35 = vunpack.c.l.b16 %v1894_v11  ;;  %v2069_v59 = vrot.slane %v2067_v34, 4  ;;  %v2072_v9 = vrot.slane %v2070_v20, 5  ;;  %v2080_v18 = vshrl.u32 %v5573_v56, 16 }
 0x14c   : > { %v2086_v8 = vshll.u32 %v5577_v12, 16  ;;  %v2163_v15 = vshrl.u32 %v2004_v50, 16  ;;  %v2078_v38 = vrot.slane %v2076_v4, 5  ;;  %v2166_v57 = vshll.u32 %v2004_v50, 16 }
 0x14d   : > { %v2825_v27 = vpop.permute.xlu1 %2824  ;;  %3332 = vrot.lane.b32.xlu2 %v3303_v46, %s4403_s9  ;;  %v3035_v21 = vpack.c.b16 %v3005_v35, %v3004_v24  ;;  %v2172_v61 = vshll.u32 %v5585_v36, 16  ;;  %v1922_v58 = vsel %vm4859_vm14, %v1920_v33, %v1921_v5  ;;  %v2082_v63 = vrot.slane %v2080_v18, 4 }
 0x14e   : > { %v5580_v6 = vsel %vm3387_vm0, %v3386_v31, %v2825_v27  ;;  %v2073_v31 = vor.u32 %v2072_v9, %v2069_v59  ;;  %v2959_v46 = vpack.c.b16 %v5589_v55, %v5582_v43  ;;  %v2088_v42 = vrot.slane %v2086_v8, 5  ;;  %v2431_v59 = vld [vmem:[#allocation2 + $0x54] sm:$0xe] }
 0x14f   : > { %3164 = vrot.lane.b32.xlu0 %v4247_v48, %s4400_s6  ;;  %v2915_v52 = vpop.permute.xlu2 %2914  ;;  %v2427_v48 = vld [vmem:[#allocation2 + $0x24] sm:$0xe]  ;;  %v2165_v11 = vrot.slane %v2163_v15, 4  ;;  %v2168_v14 = vrot.slane %v2166_v57, 5  ;;  %v2083_v54 = vor.u32 %v2082_v63, %v2078_v38  ;;  %v2176_v27 = vshrl.u32 %v5585_v36, 16 }
 0x150   : > { %v2074_v24 = vrot.slane %v2073_v31, 4  ;;  %v2182_v34 = vshll.u32 %v5602_v17, 16  ;;  %v3957_v50 = vrot.slane %v2427_v48, 9  ;;  %v2499_v5 = vrot.slane %v5573_v56, 5 }
 0x151   : > { %v2823_v0 = vpop.permute.xlu0 %2822  ;;  %v2169_v33 = vor.u32 %v2168_v14, %v2165_v11  ;;  %v2084_v20 = vrot.slane %v2083_v54, 4  ;;  %v2178_v55 = vrot.slane %v2176_v27, 4  ;;  %v3013_v4 = vunpack.c.l.b16 %v1922_v58  ;;  %v5638_v11 = vld [vmem:[#allocation2 + $0x88] sm:$0xf] }
 0x152   : > { %v5598_v16 = vsel %vm3387_vm0, %v5178_v26, %v2823_v0  ;;  %v2174_v26 = vrot.slane %v2172_v61, 5  ;;  %v2079_v43 = vsel %vm4542_vm11, %v2074_v24, %v2078_v38  ;;  %v2502_v56 = vrot.slane %v5577_v12, 5  ;;  %v4243_v24 = vld [vmem:[#allocation2 + $0x54] sm:$0xff] }
 0x153   : > { %3324 = vrot.lane.b32.xlu1 %v3299_v40, %s4403_s9  ;;  %v5618_v9 = vunpack.c.l.b16 %v2079_v43  ;;  %v2170_v18 = vrot.slane %v2169_v33, 4  ;;  %v2500_v15 = vsel %vm4859_vm14, %v3957_v50, %v2499_v5  ;;  %v2501_v0 = vrot.slane %v2499_v5, 4  ;;  %v1413_v33 = vld [vmem:[#allocation2 + $0xb4] sm:$0xf] }
 0x154   : > { %v2179_v8 = vor.u32 %v2178_v55, %v2174_v26  ;;  %v2527_v58 = vrot.slane %v5585_v36, 5  ;;  %v2184_v48 = vrot.slane %v2182_v34, 5  ;;  %v5642_v14 = vsel %vm3420_vm1, %v5532_v23, %v2915_v52  ;;  %v5654_v52 = vld [vmem:[#allocation2 + $0x8c] sm:$0x1]  ;;  %v5664_v55 = vld [vmem:[#allocation2 + $0xb8] sm:$0xf] }
 0x155   : > { %v2895_v35 = vpop.permute.xlu1 %2894  ;;  %3052 = vrot.lane.b32.xlu2 %v3035_v21, %s4401_s7  ;;  %v3961_v21 = vrot.slane %v2431_v59, 9  ;;  %v3039_v36 = vpack.c.b16 %v3013_v4, %v3012_v19  ;;  %v1683_v50 = vshll.u32 %v5638_v11, 16  ;;  %v4239_v59 = vld [vmem:[#allocation2 + $0x24] sm:$0xff] }
 0x156   : > { %v5612_v40 = vsel %vm3420_vm1, %v5424_v28, %v2895_v35  ;;  %v2089_v28 = vsel %vm4542_vm11, %v2084_v20, %v2088_v42  ;;  %v2180_v63 = vrot.slane %v2179_v8, 4  ;;  %v1405_v42 = vld [vmem:[#allocation2 + $0x84] sm:$0xf]  ;;  %v2529_v54 = vrot.slane %v2527_v58, 4 }
 0x157   : > { %3252 = vrot.lane.b32.xlu0 %v3223_v47, %s4402_s8  ;;  %v2921_v57 = vpop.permute.xlu2 %2920  ;;  %v5625_v61 = vunpack.c.l.b16 %v2089_v28  ;;  %v2175_v47 = vsel %vm4542_vm11, %v2170_v18, %v2174_v26  ;;  %v2528_v27 = vsel %vm4859_vm14, %v3961_v21, %v2527_v58  ;;  %v2530_v35 = vrot.slane %v5602_v17, 5 }
 0x158   : > { %v5636_v31 = vsel %vm3420_vm1, %v5580_v6, %v2921_v57  ;;  %v5647_v26 = vunpack.c.l.b16 %v2175_v47  ;;  %v3260_v6 = vunpack.c.l.b16 %v2500_v15  ;;  %v1674_v19 = vshrl.u32 %v1405_v42, 16 }
 0x159   : > { %v2893_v38 = vpop.permute.xlu0 %2892  ;;  %v3211_v23 = vpack.c.b16 %v5625_v61, %v5618_v9  ;;  %v2185_v43 = vsel %vm4542_vm11, %v2180_v63, %v2184_v48  ;;  %v1687_v17 = vshrl.u32 %v5638_v11, 16  ;;  %v3268_v4 = vunpack.c.l.b16 %v2528_v27  ;;  %v4205_v9 = vld [vmem:[%s6372_s1 + $0x18] sm:$0xff] }
 0x15a   : > { %v5632_v12 = vsel %vm3420_vm1, %v5192_v29, %v2893_v38  ;;  %v2503_v29 = vsel %vm4859_vm14, %v2501_v0, %v2502_v56  ;;  %v1676_v18 = vrot.slane %v1674_v19, 4  ;;  %v1685_v28 = vrot.slane %v1683_v50, 5 }
 0x15b   : > { %2980 = vrot.lane.b32.xlu1 %v2959_v46, %s4399_s5  ;;  %v1677_v46 = vshll.u32 %v1405_v42, 16  ;;  %v3261_v20 = vunpack.c.l.b16 %v2503_v29  ;;  %v1689_v8 = vrot.slane %v1687_v17, 4  ;;  %v1693_v15 = vshll.u32 %v5654_v52, 16  ;;  %v1831_v17 = vld [vmem:[#allocation2 + $0xb4] sm:$0xe] }
 0x15c   : > { %v1770_v0 = vshrl.u32 %v1413_v33, 16  ;;  %v3189_v47 = vunpack.c.l.b16 %v2185_v43  ;;  %v1779_v21 = vshll.u32 %v5664_v55, 16 }
 0x15d   : > { %v2901_v34 = vpop.permute.xlu1 %2900  ;;  %3156 = vrot.lane.b32.xlu2 %v4243_v24, %s4400_s6  ;;  %v1679_v56 = vrot.slane %v1677_v46, 5  ;;  %v3291_v63 = vpack.c.b16 %v3261_v20, %v3260_v6  ;;  %v1690_v48 = vor.u32 %v1689_v8, %v1685_v28  ;;  %v1695_v42 = vrot.slane %v1693_v15, 5  ;;  %v1827_v24 = vld [vmem:[#allocation2 + $0x84] sm:$0xe] }
 0x15e   : > { %v5659_v5 = vsel %vm3420_vm1, %v5460_v41, %v2901_v34  ;;  %v2531_v41 = vsel %vm4859_vm14, %v2529_v54, %v2530_v35  ;;  %v1772_v27 = vrot.slane %v1770_v0, 4  ;;  %v1781_v19 = vrot.slane %v1779_v21, 5 }
 0x15f   : > { %2972 = vrot.lane.b32.xlu0 %v2955_v30, %s4399_s5  ;;  %v2995_v57 = vpop.permute.xlu2 %2994  ;;  %v1680_v45 = vor.u32 %v1679_v56, %v1676_v18  ;;  %v1773_v30 = vshll.u32 %v1413_v33, 16  ;;  %v3269_v29 = vunpack.c.l.b16 %v2531_v41  ;;  %v1691_v34 = vrot.slane %v1690_v48, 4 }
 0x160   : > { %v1783_v33 = vshrl.u32 %v5664_v55, 16  ;;  %v1789_v46 = vshll.u32 %v5674_v25, 16  ;;  %v3950_v43 = vrot.slane %v1827_v24, 9  ;;  %v1953_v20 = vrot.slane %v5638_v11, 5 }
 0x161   : > { %v2899_v38 = vpop.permute.xlu0 %2898  ;;  %v1681_v54 = vrot.slane %v1680_v45, 4  ;;  %v1775_v35 = vrot.slane %v1773_v30, 5  ;;  %v1696_v41 = vsel %vm4542_vm11, %v1691_v34, %v1695_v42  ;;  %v1956_v56 = vrot.slane %v5654_v52, 5  ;;  %v332_v45 = vld [vmem:[%s6372_s1 + $0x20] sm:$0xf] }
 0x162   : > { %v5679_v58 = vsel %vm3420_vm1, %v5252_v7, %v2899_v38  ;;  %v1785_v18 = vrot.slane %v1783_v33, 4  ;;  %v5695_v8 = vpack.c.b16 %v3269_v29, %v3268_v4  ;;  %v5699_v15 = vunpack.c.l.b16 %v1696_v41  ;;  %v5736_v34 = vld [vmem:[#allocation2 + $0x94] sm:$0xf] }
 0x163   : > { %3148 = vrot.lane.b32.xlu1 %v4239_v59, %s4400_s6  ;;  %v1686_v7 = vsel %vm4542_vm11, %v1681_v54, %v1685_v28  ;;  %v1776_v6 = vor.u32 %v1775_v35, %v1772_v27  ;;  %v3215_v59 = vpack.c.b16 %v3189_v47, %v5647_v26  ;;  %v1791_v38 = vrot.slane %v1789_v46, 5 }
 0x164   : > { %v5697_v28 = vunpack.c.l.b16 %v1686_v7  ;;  %v1786_v0 = vor.u32 %v1785_v18, %v1781_v19  ;;  %v1955_v26 = vrot.slane %v1953_v20, 4  ;;  %v3954_v47 = vrot.slane %v1831_v17, 9  ;;  %v286_v18 = vld [vmem:[#allocation2 + $0xc8] sm:$0x1] }
 0x165   : > { %v5684_v50 = vpop.permute.xlu1 %2906  ;;  %3308 = vrot.lane.b32.xlu2 %v3291_v63, %s4403_s9  ;;  %v1777_v11 = vrot.slane %v1776_v6, 4  ;;  %v5710_v4 = vsel %vm4859_vm14, %v3950_v43, %v1953_v20  ;;  %v1981_v21 = vrot.slane %v5664_v55, 5  ;;  %v1984_v63 = vrot.slane %v5674_v25, 5  ;;  %v5741_v43 = vld [vmem:[#allocation2 + $0x98] sm:$0x1] }
 0x166   : > { %v5720_v42 = vsel %vm3453_vm2, %v5642_v14, %v2995_v57  ;;  %v1787_v24 = vrot.slane %v1786_v0, 4  ;;  %v5724_v29 = vsel %vm4859_vm14, %v1955_v26, %v1956_v56  ;;  %v3638_v27 = vunpack.c.l.b16 %v332_v45  ;;  %v2022_v56 = vld [vmem:[#allocation2 + $0xc0] sm:$0xf]  ;;  %v5756_v45 = vld [vmem:[#allocation2 + $0xc4] sm:$0xf] }
 0x167   : > { %3060 = vrot.lane.b32.xlu0 %v3039_v36, %s4401_s7  ;;  %v5704_v30 = vpop.permute.xlu2 %3162  ;;  %v1782_v36 = vsel %vm4542_vm11, %v1777_v11, %v1781_v19  ;;  %v5729_v55 = vsel %vm4859_vm14, %v3954_v47, %v1981_v21  ;;  %v1983_v25 = vrot.slane %v1981_v21, 4  ;;  %v2964_v35 = vpack.c.b16 %v5699_v15, %v5697_v28 }
 0x168   : > { %v2950_v54 = vunpack.c.l.b16 %v1782_v36  ;;  %v1792_v14 = vsel %vm4542_vm11, %v1787_v24, %v1791_v38  ;;  %v3022_v57 = vunpack.c.l.b16 %v5710_v4  ;;  %v3023_v46 = vunpack.c.l.b16 %v5724_v29  ;;  %v2436_v24 = vld [vmem:[#allocation2 + $0x90] sm:$0xe] }
 0x169   : > { %v2905_v52 = vpop.permute.xlu0 %2904  ;;  %v2951_v33 = vunpack.c.l.b16 %v1792_v14  ;;  %v1985_v7 = vsel %vm4859_vm14, %v1983_v25, %v1984_v63  ;;  %v3643_v6 = vpack.c.b16 %v3638_v27, %v3638_v27  ;;  %v3030_v17 = vunpack.c.l.b16 %v5729_v55 }
 0x16a   : > { %v5716_v48 = vsel %vm3420_vm1, %v5272_v32, %v2905_v52  ;;  %v2014_v32 = vld [vmem:[#allocation2 + $0x90] sm:$0xf]  ;;  %v2292_v11 = vshll.u32 %v5736_v34, 16  ;;  %v2296_v0 = vshrl.u32 %v5736_v34, 16  ;;  %v2302_v47 = vshll.u32 %v5741_v43, 16 }
 0x16b   : > { %3236 = vrot.lane.b32.xlu1 %v3215_v59, %s4402_s8  ;;  %v2283_v59 = vshrl.u32 %v2014_v32, 16  ;;  %v2286_v41 = vshll.u32 %v2014_v32, 16  ;;  %v2968_v28 = vpack.c.b16 %v2951_v33, %v2950_v54  ;;  %v3683_v15 = vsel %vm3681_vm4, %v3643_v6, 0 }
 0x16c   : > { %4256 = vmatpush.bf16.msra.mxu2 %v3683_v15  ;;  %4257 = vmatpush.bf16.msra.mxu3 %v3683_v15  ;;  %v2294_v52 = vrot.slane %v2292_v11, 5  ;;  %v2298_v36 = vrot.slane %v2296_v0, 4  ;;  %v287_v21 = vsel %vm4483_vm5, 0, %v286_v18  ;;  %v2379_v63 = vshrl.u32 %v2022_v56, 16 }
 0x16d   : > { %v2913_v19 = vpop.permute.xlu1 %2912  ;;  %v2285_v38 = vrot.slane %v2283_v59, 4  ;;  %v2288_v26 = vrot.slane %v2286_v41, 5  ;;  %2998 = vrot.lane.b32.xlu2 %v2968_v28, %s4399_s5  ;;  %3688 = vmatpush.bf16.msra.mxu0 %v3683_v15  ;;  %v2304_v25 = vrot.slane %v2302_v47, 5  ;;  %288 = vst [vmem:[#allocation2 + $0xc8] sm:$0x1] %v287_v21  ;;  %v2382_v27 = vshll.u32 %v2022_v56, 16 }
 0x16e   : > { %v5745_v20 = vsel %vm3420_vm1, %v5550_v44, %v2913_v19  ;;  %v3031_v44 = vunpack.c.l.b16 %v1985_v7  ;;  %4255 = vmatpush.bf16.msra.mxu1 %v3683_v15  ;;  %v2299_v32 = vor.u32 %v2298_v36, %v2294_v52  ;;  %v2381_v14 = vrot.slane %v2379_v63, 4  ;;  %v4204_v41 = vld [vmem:[%s6372_s1 + $0x10] sm:$0xff]  ;;  %v2440_v47 = vld [vmem:[#allocation2 + $0xc0] sm:$0xe] }
 0x16f   : > { %3228 = vrot.lane.b32.xlu0 %v3211_v23, %s4402_s8  ;;  %v5762_v23 = vpop.permute.xlu2 %3250  ;;  %v2289_v55 = vor.u32 %v2288_v26, %v2285_v38  ;;  %v2388_v19 = vshll.u32 %v5756_v45, 16  ;;  %v2392_v33 = vshrl.u32 %v5756_v45, 16  ;;  %v2384_v6 = vrot.slane %v2382_v27, 5  ;;  %v4248_v56 = vld [vmem:[#allocation2 + $0x90] sm:$0xff]  ;;  %v1389_v27 = vld [vmem:[#allocation2 + $0x24] sm:$0xf] }
 0x170   : > { %4259 = vmatpush.bf16.msra.mxu2 %v4205_v9  ;;  %v3966_v59 = vrot.slane %v2436_v24, 9  ;;  %4260 = vmatpush.bf16.msra.mxu3 %v4205_v9  ;;  %v2565_v11 = vrot.slane %v5741_v43, 5  ;;  %v3048_v38 = vpack.c.b16 %v3031_v44, %v3030_v17  ;;  %v3044_v63 = vpack.c.b16 %v3023_v46, %v3022_v57  ;;  %v5818_v46 = vld [vmem:[#allocation2 + $0x28] sm:$0xf] }
 0x171   : > { %v2911_v61 = vpop.permute.xlu0 %2910  ;;  %v2290_v7 = vrot.slane %v2289_v55, 4  ;;  %v2390_v28 = vrot.slane %v2388_v19, 5  ;;  %v2394_v15 = vrot.slane %v2392_v33, 4  ;;  %3689 = vmatpush.bf16.msra.mxu0 %v4205_v9  ;;  %v2385_v26 = vor.u32 %v2384_v6, %v2381_v14  ;;  %v5820_v14 = vld [vmem:[#allocation2 + $0x2c] sm:$0x1] }
 0x172   : > { %v5768_v54 = vsel %vm3420_vm1, %v5332_v22, %v2911_v61  ;;  %v2562_v22 = vrot.slane %v5736_v34, 5  ;;  %4258 = vmatpush.bf16.msra.mxu1 %v4205_v9  ;;  %v3970_v55 = vrot.slane %v2440_v47, 9  ;;  %v1485_v6 = vshll.u32 %v1389_v27, 16 }
 0x173   : > { %2990 = vrot.lane.b32.xlu1 %v2964_v35, %s4399_s5  ;;  %v2300_v35 = vrot.slane %v2299_v32, 4  ;;  %v2295_v34 = vsel %vm4542_vm11, %v2290_v7, %v2294_v52  ;;  %v2395_v36 = vor.u32 %v2394_v15, %v2390_v28  ;;  %v2386_v9 = vrot.slane %v2385_v26, 4  ;;  %v5848_v26 = vld [vmem:[#allocation2 + $0x5c] sm:$0x1] }
 0x174   : > { %v2563_v43 = vsel %vm4859_vm14, %v3966_v59, %v2562_v22  ;;  %v2564_v21 = vrot.slane %v2562_v22, 4  ;;  %v5793_v17 = vunpack.c.l.b16 %v2295_v34  ;;  %4262 = vmatpush.bf16.msra.mxu2 %v4204_v41  ;;  %4263 = vmatpush.bf16.msra.mxu3 %v4204_v41  ;;  %v1482_v7 = vshrl.u32 %v1389_v27, 16  ;;  %v1397_v59 = vld [vmem:[#allocation2 + $0x54] sm:$0xf] }
 0x175   : > { %v2919_v18 = vpop.permute.xlu1 %2918  ;;  %v2305_v61 = vsel %vm4542_vm11, %v2300_v35, %v2304_v25  ;;  %3166 = vrot.lane.b32.xlu2 %v4248_v56, %s4400_s6  ;;  %v2590_v25 = vrot.slane %v5756_v45, 5  ;;  %3690 = vmatpush.bf16.msra.mxu0 %v4204_v41  ;;  %v5816_v29 = vrot.slane %v2395_v36, 4  ;;  %v3278_v57 = vunpack.c.l.b16 %v2563_v43 }
 0x176   : > { %v5780_v0 = vsel %vm3420_vm1, %v5598_v16, %v2919_v18  ;;  %v3438_v16 = vsel %vm3420_vm1, %v5515_v39, %v5684_v50  ;;  %v5795_v44 = vunpack.c.l.b16 %v2305_v61  ;;  %v768_v50 = vld [vmem:[#allocation2 + $0xc8] sm:$0x1]  ;;  %v2566_v24 = vsel %vm4859_vm14, %v2564_v21, %v2565_v11  ;;  %4261 = vmatpush.bf16.msra.mxu1 %v4204_v41  ;;  %v1819_v21 = vld [vmem:[#allocation2 + $0x24] sm:$0xe] }
 0x177   : > { %3316 = vrot.lane.b32.xlu0 %v5695_v8, %s4403_s9  ;;  %v4203_v8 = vld [vmem:[%s6372_s1 + $0x8] sm:$0xff]  ;;  %v2979_v39 = vpop.permute.xlu2 %2978  ;;  %v769_v4 = vsel %vm4476_vm3, %v607_v13, %v768_v50  ;;  %v2391_v51 = vsel %vm4542_vm11, %v2386_v9, %v2390_v28  ;;  %v5831_v13 = vsel %vm4859_vm14, %v3970_v55, %v2590_v25  ;;  %v2592_v33 = vrot.slane %v2590_v25, 4  ;;  %v5843_v28 = vld [vmem:[#allocation2 + $0x58] sm:$0xf] }
 0x178   : > { %v5825_v45 = vsel %vm3453_vm2, %v5679_v58, %v2979_v39  ;;  %770 = vst [vmem:[#allocation2 + $0xc8] sm:$0x1] %v769_v4  ;;  %v3220_v19 = vpack.c.b16 %v5795_v44, %v5793_v17  ;;  %4265 = vmatpush.bf16.msra.mxu2 %v4203_v8  ;;  %4266 = vmatpush.bf16.msra.mxu3 %v4203_v8  ;;  %v4202_v58 = vld [vmem:[%s6372_s1] sm:$0xff]  ;;  %v5838_v41 = vunpack.c.l.b16 %v2391_v51  ;;  %v1491_v18 = vshll.u32 %v5818_v46, 16 }
 0x179   : > { %v2917_v52 = vpop.permute.xlu0 %2916  ;;  %v1495_v56 = vshrl.u32 %v5818_v46, 16  ;;  %v1501_v35 = vshll.u32 %v5820_v14, 16  ;;  %3691 = vmatpush.bf16.msra.mxu0 %v4203_v8  ;;  %v3286_v11 = vunpack.c.l.b16 %v5831_v13  ;;  %v1487_v34 = vrot.slane %v1485_v6, 5  ;;  %v4252_v51 = vld [vmem:[#allocation2 + $0xc0] sm:$0xff] }
 0x17a   : > { %v5810_v32 = vsel %vm3420_vm1, %v5363_v62, %v2917_v52  ;;  %v3279_v62 = vunpack.c.l.b16 %v2566_v24  ;;  %4264 = vmatpush.bf16.msra.mxu1 %v4203_v8  ;;  %v1493_v61 = vrot.slane %v1491_v18, 5  ;;  %v1578_v43 = vshrl.u32 %v1397_v59, 16 }
 0x17b   : > { %3078 = vrot.lane.b32.xlu1 %v3048_v38, %s4401_s7  ;;  %v1484_v38 = vrot.slane %v1482_v7, 4  ;;  %v1497_v36 = vrot.slane %v1495_v56, 4  ;;  %v1581_v44 = vshll.u32 %v1397_v59, 16  ;;  %v1587_v9 = vshll.u32 %v5843_v28, 16 }
 0x17c   : > { %v5845_v15 = vpack.c.b16 %v3279_v62, %v3278_v57  ;;  %v1591_v52 = vshrl.u32 %v5843_v28, 16  ;;  %4268 = vmatpush.bf16.msra.mxu2 %v4202_v58  ;;  %4269 = vmatpush.bf16.msra.mxu3 %v4202_v58  ;;  %v1503_v50 = vrot.slane %v1501_v35, 5  ;;  %v1597_v24 = vshll.u32 %v5848_v26, 16 }
 0x17d   : > { %v2987_v22 = vpop.permute.xlu1 %2986  ;;  %v1488_v17 = vor.u32 %v1487_v34, %v1484_v38  ;;  %3692 = vmatpush.bf16.msra.mxu0 %v4202_v58  ;;  %v1583_v27 = vrot.slane %v1581_v44, 5  ;;  %v1589_v4 = vrot.slane %v1587_v9, 5  ;;  %v3942_v57 = vrot.slane %v1819_v21, 9  ;;  %v1823_v44 = vld [vmem:[#allocation2 + $0x54] sm:$0xe] }
 0x17e   : > { %v5852_v47 = vsel %vm3453_vm2, %v3438_v16, %v2987_v22  ;;  %v1580_v16 = vrot.slane %v1578_v43, 4  ;;  %4267 = vmatpush.bf16.msra.mxu1 %v4202_v58  ;;  %v1593_v6 = vrot.slane %v1591_v52, 4  ;;  %v1897_v56 = vrot.slane %v5818_v46, 5 }
 0x17f   : > { %3070 = vrot.lane.b32.xlu0 %v3044_v63, %s4401_s7  ;;  %v5856_v8 = vpop.permute.xlu2 %3146  ;;  %v1498_v63 = vor.u32 %v1497_v36, %v1493_v61  ;;  %v2040_v55 = vld [vmem:[#allocation2 + $0xc8] sm:$0x1]  ;;  %v1489_v25 = vrot.slane %v1488_v17, 4  ;;  %v1599_v34 = vrot.slane %v1597_v24, 5 }
 0x180   : > { %v2398_v62 = vshll.u32 %v2040_v55, 16  ;;  %v2593_v13 = vrot.slane %v2040_v55, 5  ;;  %v1584_v18 = vor.u32 %v1583_v27, %v1580_v16  ;;  %v1899_v17 = vrot.slane %v1897_v56, 4 }
 0x181   : > { %v2971_v39 = vpop.permute.xlu0 %2970  ;;  %v1499_v7 = vrot.slane %v1498_v63, 4  ;;  %v1494_v22 = vsel %vm4542_vm11, %v1489_v25, %v1493_v61  ;;  %v1594_v61 = vor.u32 %v1593_v6, %v1589_v4  ;;  %v1999_v6 = vld [vmem:[#allocation2 + $0x34] sm:$0xf] }
 0x182   : > { %v5862_v59 = vsel %vm3453_vm2, %v5428_v53, %v2971_v39  ;;  %v2400_v35 = vrot.slane %v2398_v62, 5  ;;  %v2594_v58 = vsel %vm4859_vm14, %v2592_v33, %v2593_v13  ;;  %v5871_v43 = vunpack.c.l.b16 %v1494_v22 }
 0x183   : > { %3246 = vrot.lane.b32.xlu1 %v3220_v19, %s4402_s8  ;;  %v1504_v19 = vsel %vm4542_vm11, %v1499_v7, %v1503_v50  ;;  %v3287_v36 = vunpack.c.l.b16 %v2594_v58  ;;  %v1585_v21 = vrot.slane %v1584_v18, 4  ;;  %v1898_v33 = vsel %vm4859_vm14, %v3942_v57, %v1897_v56  ;;  %v2006_v58 = vld [vmem:[#allocation2 + $0x60] sm:$0xf] }
 0x184   : > { %v5873_v53 = vunpack.c.l.b16 %v1504_v19  ;;  %v2401_v46 = vsel %vm4542_vm11, %v5816_v29, %v2400_v35  ;;  %v1595_v24 = vrot.slane %v1594_v61, 4  ;;  %v1900_v29 = vrot.slane %v5820_v14, 5  ;;  %v5907_v35 = vld [vmem:[#allocation2 + $0x38] sm:$0x1] }
 0x185   : > { %v3075_v38 = vpop.permute.xlu1 %3074  ;;  %v3207_v9 = vunpack.c.l.b16 %v2401_v46  ;;  %v3304_v39 = vpack.c.b16 %v3287_v36, %v3286_v11  ;;  %v1590_v63 = vsel %vm4542_vm11, %v1585_v21, %v1589_v4  ;;  %v3006_v25 = vunpack.c.l.b16 %v1898_v33  ;;  %v1998_v11 = vld [vmem:[#allocation2 + $0x30] sm:$0xf] }
 0x186   : > { %v3512_v52 = vsel %vm3486_vm6, %v5720_v42, %v3075_v38  ;;  %v5887_v55 = vunpack.c.l.b16 %v1590_v63  ;;  %v1925_v42 = vrot.slane %v5843_v28, 5  ;;  %v2956_v4 = vpack.c.b16 %v5873_v53, %v5871_v43  ;;  %v5915_v43 = vld [vmem:[#allocation2 + $0x64] sm:$0xf] }
 0x187   : > { %3174 = vrot.lane.b32.xlu0 %v4252_v51, %s4400_s6  ;;  %v5885_v16 = vpop.permute.xlu2 %3234  ;;  %v3224_v57 = vpack.c.b16 %v3207_v9, %v5838_v41  ;;  %v3946_v51 = vrot.slane %v1823_v44, 9  ;;  %v1600_v62 = vsel %vm4542_vm11, %v1595_v24, %v1599_v34  ;;  %v1901_v14 = vsel %vm4859_vm14, %v1899_v17, %v1900_v29 }
 0x188   : > { %v1928_v13 = vrot.slane %v5848_v26, 5  ;;  %v2935_v41 = vunpack.c.l.b16 %v1600_v62  ;;  %v1927_v7 = vrot.slane %v1925_v42, 4  ;;  %v2091_v38 = vshrl.u32 %v1998_v11, 16 }
 0x189   : > { %v3067_v50 = vpop.permute.xlu0 %3066  ;;  %3254 = vrot.lane.b32.xlu2 %v3224_v57, %s4402_s8  ;;  %v1926_v28 = vsel %vm4859_vm14, %v3946_v51, %v1925_v42  ;;  %v2094_v21 = vshll.u32 %v1998_v11, 16  ;;  %v2100_v46 = vshll.u32 %v1999_v6, 16  ;;  %v2104_v61 = vshrl.u32 %v1999_v6, 16  ;;  %v2428_v51 = vld [vmem:[#allocation2 + $0x30] sm:$0xe] }
 0x18a   : > { %v3504_v27 = vsel %vm3486_vm6, %v5852_v47, %v3067_v50  ;;  %v3007_v47 = vunpack.c.l.b16 %v1901_v14  ;;  %v3014_v56 = vunpack.c.l.b16 %v1926_v28  ;;  %v2960_v19 = vpack.c.b16 %v2935_v41, %v5887_v55  ;;  %v5920_v55 = vld [vmem:[#allocation2 + $0x68] sm:$0x1] }
 0x18b   : > { %3334 = vrot.lane.b32.xlu1 %v3304_v39, %s4403_s9  ;;  %v3537_v18 = vsel %vm3519_vm7, %v3504_v27, %v5704_v30  ;;  %v1929_v36 = vsel %vm4859_vm14, %v1927_v7, %v1928_v13  ;;  %v2093_v53 = vrot.slane %v2091_v38, 4  ;;  %v2110_v33 = vshll.u32 %v5907_v35, 16 }
 0x18c   : > { %v3036_v34 = vpack.c.b16 %v3007_v47, %v3006_v25  ;;  %v3015_v30 = vunpack.c.l.b16 %v1929_v36  ;;  %v2187_v17 = vshrl.u32 %v2006_v58, 16  ;;  %v2190_v44 = vshll.u32 %v2006_v58, 16 }
 0x18d   : > { %v3243_v22 = vpop.permute.xlu1 %3242  ;;  %v2096_v50 = vrot.slane %v2094_v21, 5  ;;  %v2102_v24 = vrot.slane %v2100_v46, 5  ;;  %v2196_v29 = vshll.u32 %v5915_v43, 16  ;;  %v2106_v27 = vrot.slane %v2104_v61, 4 }
 0x18e   : > { %v5910_v26 = vsel %vm3552_vm8, %v3537_v18, %v3243_v22  ;;  %v3040_v39 = vpack.c.b16 %v3015_v30, %v3014_v56  ;;  %v2112_v57 = vrot.slane %v2110_v33, 5  ;;  %v2189_v62 = vrot.slane %v2187_v17, 4 }
 0x18f   : > { %3326 = vrot.lane.b32.xlu0 %v5845_v15, %s4403_s9  ;;  %v2989_v63 = vpop.permute.xlu2 %2988  ;;  %v2097_v11 = vor.u32 %v2096_v50, %v2093_v53  ;;  %v2192_v14 = vrot.slane %v2190_v44, 5  ;;  %v2107_v13 = vor.u32 %v2106_v27, %v2102_v24  ;;  %v2198_v41 = vrot.slane %v2196_v29, 5  ;;  %v1407_v50 = vld [vmem:[#allocation2 + $0x90] sm:$0xf] }
 0x190   : > { %v5926_v25 = vsel %vm3453_vm2, %v5554_v60, %v2989_v63  ;;  %v2206_v60 = vshll.u32 %v5920_v55, 16  ;;  %v3958_v22 = vrot.slane %v2428_v51, 9  ;;  %v2506_v18 = vrot.slane %v1999_v6, 5 }
 0x191   : > { %v3171_v9 = vpop.permute.xlu0 %3170  ;;  %2974 = vrot.lane.b32.xlu2 %v2956_v4, %s4399_s5  ;;  %v2098_v28 = vrot.slane %v2097_v11, 4  ;;  %v2193_v7 = vor.u32 %v2192_v14, %v2189_v62  ;;  %v2108_v38 = vrot.slane %v2107_v13, 4  ;;  %v4244_v4 = vld [vmem:[#allocation2 + $0x60] sm:$0xff]  ;;  %v2509_v33 = vrot.slane %v5907_v35, 5  ;;  %v4240_v35 = vld [vmem:[#allocation2 + $0x30] sm:$0xff] }
 0x192   : > { %v3545_v15 = vsel %vm3519_vm7, %v3512_v52, %v3171_v9  ;;  %v2200_v52 = vshrl.u32 %v5915_v43, 16  ;;  %v2208_v58 = vrot.slane %v2206_v60, 5  ;;  %v2507_v53 = vsel %vm4859_vm14, %v3958_v22, %v2506_v18  ;;  %v5969_v22 = vld [vmem:[#allocation2 + $0x98] sm:$0x1] }
 0x193   : > { %3054 = vrot.lane.b32.xlu1 %v3036_v34, %s4401_s7  ;;  %v3578_v42 = vsel %vm3552_vm8, %v3545_v15, %v5762_v23  ;;  %v2432_v34 = vld [vmem:[#allocation2 + $0x60] sm:$0xe]  ;;  %v2103_v36 = vsel %vm4542_vm11, %v2098_v28, %v2102_v24  ;;  %v2194_v30 = vrot.slane %v2193_v7, 4  ;;  %v2508_v21 = vrot.slane %v2506_v18, 4  ;;  %v5948_v24 = vld [vmem:[#allocation2 + $0x94] sm:$0xf] }
 0x194   : > { %v2202_v23 = vrot.slane %v2200_v52, 4  ;;  %v2113_v6 = vsel %vm4542_vm11, %v2108_v38, %v2112_v57  ;;  %v5943_v46 = vunpack.c.l.b16 %v2103_v36  ;;  %v3262_v9 = vunpack.c.l.b16 %v2507_v53 }
 0x195   : > { %v3331_v47 = vpop.permute.xlu1 %3330  ;;  %v3183_v17 = vunpack.c.l.b16 %v2113_v6  ;;  %v2199_v44 = vsel %vm4542_vm11, %v2194_v30, %v2198_v41  ;;  %v3962_v63 = vrot.slane %v2432_v34, 9  ;;  %v2510_v57 = vsel %vm4859_vm14, %v2508_v21, %v2509_v33 }
 0x196   : > { %v3611_v56 = vsel %vm3585_vm9, %v3578_v42, %v3331_v47  ;;  %v2203_v61 = vor.u32 %v2202_v23, %v2198_v41  ;;  %v5952_v27 = vunpack.c.l.b16 %v2199_v44  ;;  %v3263_v42 = vunpack.c.l.b16 %v2510_v57  ;;  %v5973_v23 = vld [vmem:[#allocation2 + $0xc4] sm:$0xf] }
 0x197   : > { %2982 = vrot.lane.b32.xlu0 %v2960_v19, %s4399_s5  ;;  %4192 = vmatmul.msk.bf16.vlgmr.msra.gmra.mxu3 %vm3648_vm10, %v3611_v56  ;;  %v3212_v51 = vpack.c.b16 %v3183_v17, %v5943_v46  ;;  %v2534_v11 = vrot.slane %v5915_v43, 5  ;;  %v2537_v62 = vrot.slane %v5920_v55, 5  ;;  %v1698_v13 = vshrl.u32 %v1407_v50, 16  ;;  %v1415_v55 = vld [vmem:[#allocation2 + $0xc0] sm:$0xf] }
 0x198   : > { %v2204_v15 = vrot.slane %v2203_v61, 4  ;;  %v1701_v41 = vshll.u32 %v1407_v50, 16  ;;  %v1707_v52 = vshll.u32 %v5948_v24, 16  ;;  %v3292_v28 = vpack.c.b16 %v3263_v42, %v3262_v9  ;;  %v5981_v61 = vld [vmem:[#allocation2 + $0xc8] sm:$0x1] }
 0x199   : > { %v3323_v19 = vpop.permute.xlu0 %3322  ;;  %3062 = vrot.lane.b32.xlu2 %v3040_v39, %s4401_s7  ;;  %v2535_v7 = vsel %vm4859_vm14, %v3962_v63, %v2534_v11  ;;  %v2536_v43 = vrot.slane %v2534_v11, 4  ;;  %v1700_v56 = vrot.slane %v1698_v13, 4  ;;  %v1711_v36 = vshrl.u32 %v5948_v24, 16 }
 0x19a   : > { %v3603_v29 = vsel %vm3585_vm9, %v5910_v26, %v3323_v19  ;;  %v5962_v26 = vpop.permute.xlu2 %3076  ;;  %v2209_v14 = vsel %vm4542_vm11, %v2204_v15, %v2208_v58  ;;  %v3270_v18 = vunpack.c.l.b16 %v2535_v7  ;;  %v1703_v38 = vrot.slane %v1701_v41, 5 }
 0x19b   : > { %4188 = vmatmul.msk.bf16.vlgmr.msra.gmra.mxu2 %vm3648_vm10, %v3603_v29  ;;  %3158 = vrot.lane.b32.xlu1 %v4244_v4, %s4400_s6  ;;  %v3191_v47 = vunpack.c.l.b16 %v2209_v14  ;;  %v2538_v34 = vsel %vm4859_vm14, %v2536_v43, %v2537_v62  ;;  %v1709_v4 = vrot.slane %v1707_v52, 5  ;;  %v1717_v21 = vshll.u32 %v5969_v22, 16  ;;  %v1828_v29 = vld [vmem:[#allocation2 + $0x90] sm:$0xe]  ;;  %v1832_v14 = vld [vmem:[#allocation2 + $0xc0] sm:$0xe] }
 0x19c   : > { %v3271_v30 = vunpack.c.l.b16 %v2538_v34  ;;  %v1704_v53 = vor.u32 %v1703_v38, %v1700_v56  ;;  %v1713_v46 = vrot.slane %v1711_v36, 4  ;;  %v1797_v33 = vshll.u32 %v1415_v55, 16 }
 0x19d   : > { %v3059_v60 = vpop.permute.xlu1 %3058  ;;  %v3216_v58 = vpack.c.b16 %v3191_v47, %v5952_v27  ;;  %v1803_v19 = vshll.u32 %v5973_v23, 16  ;;  %v1807_v17 = vshrl.u32 %v5973_v23, 16  ;;  %v1719_v50 = vrot.slane %v1717_v21, 5 }
 0x19e   : > { %v3496_v39 = vsel %vm3486_vm6, %v5825_v45, %v3059_v60  ;;  %v1794_v45 = vshrl.u32 %v1415_v55, 16  ;;  %v3296_v9 = vpack.c.b16 %v3271_v30, %v3270_v18  ;;  %v1705_v63 = vrot.slane %v1704_v53, 4 }
 0x19f   : > { %3150 = vrot.lane.b32.xlu0 %v4240_v35, %s4400_s6  ;;  %v1714_v27 = vor.u32 %v1713_v46, %v1709_v4  ;;  %v1799_v35 = vrot.slane %v1797_v33, 5  ;;  %v1805_v11 = vrot.slane %v1803_v19, 5  ;;  %v1809_v62 = vrot.slane %v1807_v17, 4  ;;  %v2016_v17 = vld [vmem:[#allocation2 + $0x9c] sm:$0xf] }
 0x1a0   : > { %v1796_v57 = vrot.slane %v1794_v45, 4  ;;  %v1710_v42 = vsel %vm4542_vm11, %v1705_v63, %v1709_v4  ;;  %v3951_v47 = vrot.slane %v1828_v29, 9  ;;  %v1960_v43 = vrot.slane %v5948_v24, 5 }
 0x1a1   : > { %v3051_v6 = vpop.permute.xlu0 %3050  ;;  %3230 = vrot.lane.b32.xlu2 %v3212_v51, %s4402_s8  ;;  %v1715_v41 = vrot.slane %v1714_v27, 4  ;;  %v2944_v52 = vunpack.c.l.b16 %v1710_v42  ;;  %v1810_v7 = vor.u32 %v1809_v62, %v1805_v11  ;;  %v1963_v56 = vrot.slane %v5969_v22, 5 }
 0x1a2   : > { %v3488_v44 = vsel %vm3486_vm6, %v5862_v59, %v3051_v6  ;;  %v1813_v59 = vshll.u32 %v5981_v61, 16  ;;  %v1800_v60 = vor.u32 %v1799_v35, %v1796_v57  ;;  %v3955_v38 = vrot.slane %v1832_v14, 9  ;;  %v233_v6 = vld [vmem:[#allocation2 + $0xcc] sm:$0x1]  ;;  %v2037_v57 = vld [vmem:[#allocation2 + $0xa4] sm:$0x1] }
 0x1a3   : > { %3310 = vrot.lane.b32.xlu1 %v3292_v28, %s4403_s9  ;;  %v3521_v15 = vsel %vm3519_vm7, %v3488_v44, %v5856_v8  ;;  %v5997_v28 = vpop.permute.xlu2 %3244  ;;  %v1720_v55 = vsel %vm4542_vm11, %v1715_v41, %v1719_v50  ;;  %v1811_v4 = vrot.slane %v1810_v7, 4  ;;  %v1961_v36 = vsel %vm4859_vm14, %v3951_v47, %v1960_v43  ;;  %v289_v35 = vld [vmem:[#allocation2 + $0xd4] sm:$0x1] }
 0x1a4   : > { %v1815_v51 = vrot.slane %v1813_v59, 5  ;;  %v1801_v18 = vrot.slane %v1800_v60, 4  ;;  %v2945_v34 = vunpack.c.l.b16 %v1720_v55  ;;  %v1962_v30 = vrot.slane %v1960_v43, 4 }
 0x1a5   : > { %v3227_v13 = vpop.permute.xlu1 %3226  ;;  %v3024_v24 = vunpack.c.l.b16 %v1961_v36  ;;  %v1991_v45 = vrot.slane %v5981_v61, 5  ;;  %v234_v27 = vsel %vm4476_vm3, 0, %v233_v6  ;;  %v2307_v59 = vshrl.u32 %v2016_v17, 16 }
 0x1a6   : > { %v5995_v8 = vsel %vm3552_vm8, %v3521_v15, %v3227_v13  ;;  %v1806_v21 = vsel %vm4542_vm11, %v1801_v18, %v1805_v11  ;;  %v2965_v22 = vpack.c.b16 %v2945_v34, %v2944_v52  ;;  %v1816_v33 = vsel %vm4542_vm11, %v1811_v4, %v1815_v51  ;;  %235 = vst [vmem:[#allocation2 + $0xcc] sm:$0x1] %v234_v27  ;;  %v6024_v13 = vld [vmem:[#allocation2 + $0xd0] sm:$0xf]  ;;  %v2437_v51 = vld [vmem:[#allocation2 + $0x9c] sm:$0xe] }
 0x1a7   : > { %3238 = vrot.lane.b32.xlu0 %v3216_v58, %s4402_s8  ;;  %v1988_v58 = vrot.slane %v5973_v23, 5  ;;  %v2952_v19 = vunpack.c.l.b16 %v1806_v21  ;;  %v2953_v44 = vunpack.c.l.b16 %v1816_v33  ;;  %v1964_v63 = vsel %vm4859_vm14, %v1962_v30, %v1963_v56  ;;  %v2017_v23 = vld [vmem:[#allocation2 + $0xa0] sm:$0xf]  ;;  %v2441_v34 = vld [vmem:[#allocation2 + $0xcc] sm:$0xe] }
 0x1a8   : > { %v3025_v61 = vunpack.c.l.b16 %v1964_v63  ;;  %v2310_v14 = vshll.u32 %v2016_v17, 16  ;;  %v2309_v1 = vrot.slane %v2307_v59, 4  ;;  %v2320_v47 = vshrl.u32 %v2017_v23, 16 }
 0x1a9   : > { %v3155_v53 = vpop.permute.xlu0 %3154  ;;  %v1989_v50 = vsel %vm4859_vm14, %v3955_v38, %v1988_v58  ;;  %v1990_v29 = vrot.slane %v1988_v58, 4  ;;  %3318 = vrot.lane.b32.xlu2 %v3296_v9, %s4403_s9  ;;  %v2969_v42 = vpack.c.b16 %v2953_v44, %v2952_v19  ;;  %v2326_v7 = vshll.u32 %v2037_v57, 16 }
 0x1aa   : > { %v3529_v46 = vsel %vm3519_vm7, %v3496_v39, %v3155_v53  ;;  %v3032_v15 = vunpack.c.l.b16 %v1989_v50  ;;  %v3045_v9 = vpack.c.b16 %v3025_v61, %v3024_v24  ;;  %v2312_v60 = vrot.slane %v2310_v14, 5 }
 0x1ab   : > { %v3562_v39 = vsel %vm3552_vm8, %v3529_v46, %v5885_v16  ;;  %v1992_v62 = vsel %vm4859_vm14, %v1990_v29, %v1991_v45  ;;  %v2316_v16 = vshll.u32 %v2017_v23, 16  ;;  %3000 = vrot.lane.b32.xlu1 %v2969_v42, %s4399_s5  ;;  %v6029_v43 = vpop.permute.xlu2 %3332  ;;  %v290_v56 = vsel %vm4483_vm5, 0, %v289_v35 }
 0x1ac   : > { %v3033_v41 = vunpack.c.l.b16 %v1992_v62  ;;  %v2412_v38 = vshll.u32 %v6024_v13, 16  ;;  %v2313_v36 = vor.u32 %v2312_v60, %v2309_v1  ;;  %v2322_v30 = vrot.slane %v2320_v47, 4  ;;  %291 = vst [vmem:[#allocation2 + $0xd4] sm:$0x1] %v290_v56  ;;  %v1391_v1 = vld [vmem:[#allocation2 + $0x30] sm:$0xf] }
 0x1ad   : > { %v3315_v11 = vpop.permute.xlu1 %3314  ;;  %v2318_v18 = vrot.slane %v2316_v16, 5  ;;  %v2328_v53 = vrot.slane %v2326_v7, 5  ;;  %v2416_v21 = vshrl.u32 %v6024_v13, 16  ;;  %v3967_v45 = vrot.slane %v2437_v51, 9  ;;  %v2024_v17 = vld [vmem:[#allocation2 + $0xcc] sm:$0xf] }
 0x1ae   : > { %v3595_v52 = vsel %vm3585_vm9, %v3562_v39, %v3315_v11  ;;  %v3049_v55 = vpack.c.b16 %v3033_v41, %v3032_v15  ;;  %v6038_v58 = vrot.slane %v2412_v38, 5  ;;  %v2569_v6 = vrot.slane %v2017_v23, 5 }
 0x1af   : > { %2992 = vrot.lane.b32.xlu0 %v2965_v22, %s4399_s5  ;;  %4184 = vmatmul.msk.bf16.vlgmr.msra.gmra.mxu1 %vm3648_vm10, %v3595_v52  ;;  %v2314_v46 = vrot.slane %v2313_v36, 4  ;;  %v2323_v22 = vor.u32 %v2322_v30, %v2318_v18  ;;  %v2418_v33 = vrot.slane %v2416_v21, 4  ;;  %v2572_v19 = vrot.slane %v2037_v57, 5  ;;  %v6066_v30 = vld [vmem:[#allocation2 + $0x38] sm:$0x1] }
 0x1b0   : > { %v2570_v44 = vsel %vm4859_vm14, %v3967_v45, %v2569_v6  ;;  %v2571_v63 = vrot.slane %v2569_v6, 4  ;;  %v3971_v50 = vrot.slane %v2441_v34, 9  ;;  %v2403_v15 = vshrl.u32 %v2024_v17, 16 }
 0x1b1   : > { %v3307_v4 = vpop.permute.xlu0 %3306  ;;  %3072 = vrot.lane.b32.xlu2 %v3045_v9, %s4401_s7  ;;  %v2319_v23 = vsel %vm4542_vm11, %v2314_v46, %v2318_v18  ;;  %v2324_v61 = vrot.slane %v2323_v22, 4  ;;  %v2406_v39 = vshll.u32 %v2024_v17, 16  ;;  %v2419_v35 = vor.u32 %v2418_v33, %v6038_v58  ;;  %v6060_v18 = vld [vmem:[#allocation2 + $0x34] sm:$0xf] }
 0x1b2   : > { %v3587_v24 = vsel %vm3585_vm9, %v5995_v8, %v3307_v4  ;;  %v2597_v8 = vrot.slane %v6024_v13, 5  ;;  %v3200_v57 = vunpack.c.l.b16 %v2319_v23  ;;  %v2573_v42 = vsel %vm4859_vm14, %v2571_v63, %v2572_v19  ;;  %v4253_v13 = vld [vmem:[#allocation2 + $0xcc] sm:$0xff]  ;;  %v6082_v23 = vld [vmem:[#allocation2 + $0x64] sm:$0xf] }
 0x1b3   : > { %4180 = vmatmul.msk.bf16.vlgmr.msra.gmra.mxu0 %vm3648_vm10, %v3587_v24  ;;  %3168 = vrot.lane.b32.xlu1 %v4249_v2, %s4400_s6  ;;  %v2329_v11 = vsel %vm4542_vm11, %v2324_v61, %v2328_v53  ;;  %v2405_v62 = vrot.slane %v2403_v15, 4  ;;  %v2408_v59 = vrot.slane %v2406_v39, 5  ;;  %v3280_v14 = vunpack.c.l.b16 %v2570_v44  ;;  %v6064_v38 = vpop.permute.xlu2 %3052  ;;  %v1399_v44 = vld [vmem:[#allocation2 + $0x60] sm:$0xf] }
 0x1b4   : > { %v3201_v9 = vunpack.c.l.b16 %v2329_v11  ;;  %v2420_v41 = vrot.slane %v2419_v35, 4  ;;  %v3281_v52 = vunpack.c.l.b16 %v2573_v42  ;;  %v2598_v16 = vsel %vm4859_vm14, %v3971_v50, %v2597_v8 }
 0x1b5   : > { %v3069_v29 = vpop.permute.xlu1 %3068  ;;  %v2409_v47 = vor.u32 %v2408_v59, %v2405_v62  ;;  %v2599_v51 = vrot.slane %v2597_v8, 4  ;;  %v3288_v36 = vunpack.c.l.b16 %v2598_v16  ;;  %v1506_v2 = vshrl.u32 %v1391_v1, 16 }
 0x1b6   : > { %v6049_v27 = vsel %vm3486_vm6, %v5926_v25, %v3069_v29  ;;  %v2041_v25 = vld [vmem:[#allocation2 + $0xd4] sm:$0x1]  ;;  %v3221_v34 = vpack.c.b16 %v3201_v9, %v3200_v57  ;;  %v3301_v4 = vpack.c.b16 %v3281_v52, %v3280_v14  ;;  %v1515_v46 = vshll.u32 %v6060_v18, 16  ;;  %v6085_v57 = vld [vmem:[#allocation2 + $0x68] sm:$0x1] }
 0x1b7   : > { %3080 = vrot.lane.b32.xlu0 %v3049_v55, %s4401_s7  ;;  %v2422_v7 = vshll.u32 %v2041_v25, 16  ;;  %v2600_v55 = vrot.slane %v2041_v25, 5  ;;  %v2410_v53 = vrot.slane %v2409_v47, 4  ;;  %v1525_v17 = vshll.u32 %v6066_v30, 16 }
 0x1b8   : > { %v1508_v61 = vrot.slane %v1506_v2, 4  ;;  %v1517_v15 = vrot.slane %v1515_v46, 5  ;;  %v1602_v11 = vshrl.u32 %v1399_v44, 16  ;;  %v1605_v62 = vshll.u32 %v1399_v44, 16 }
 0x1b9   : > { %v2997_v60 = vpop.permute.xlu0 %2996  ;;  %v2424_v21 = vrot.slane %v2422_v7, 5  ;;  %v2601_v45 = vsel %vm4859_vm14, %v2599_v51, %v2600_v55  ;;  %3176 = vrot.lane.b32.xlu2 %v4253_v13, %s4400_s6  ;;  %v2415_v22 = vsel %vm4542_vm11, %v2410_v53, %v6038_v58  ;;  %v1527_v42 = vrot.slane %v1525_v17, 5 }
 0x1ba   : > { %v3481_v56 = vsel %vm3453_vm2, %v5810_v32, %v2997_v60  ;;  %v3289_v6 = vunpack.c.l.b16 %v2601_v45  ;;  %v1509_v32 = vshll.u32 %v1391_v1, 16  ;;  %v3208_v63 = vunpack.c.l.b16 %v2415_v22 }
 0x1bb   : > { %v3514_v24 = vsel %vm3486_vm6, %v3481_v56, %v5962_v26  ;;  %v2425_v33 = vsel %vm4542_vm11, %v2420_v41, %v2424_v21  ;;  %v1519_v26 = vshrl.u32 %v6060_v18, 16  ;;  %v1611_v9 = vshll.u32 %v6082_v23, 16  ;;  %v1820_v41 = vld [vmem:[#allocation2 + $0x30] sm:$0xe]  ;;  %v6094_v56 = vpop.permute.xlu2 %3156 }
 0x1bc   : > { %v3209_v50 = vunpack.c.l.b16 %v2425_v33  ;;  %v3305_v29 = vpack.c.b16 %v3289_v6, %v3288_v36  ;;  %v1511_v58 = vrot.slane %v1509_v32, 5  ;;  %v1615_v25 = vshrl.u32 %v6082_v23, 16  ;;  %v1824_v32 = vld [vmem:[#allocation2 + $0x60] sm:$0xe] }
 0x1bd   : > { %v3173_v19 = vpop.permute.xlu1 %3172  ;;  %v1521_v39 = vrot.slane %v1519_v26, 4  ;;  %v1604_v16 = vrot.slane %v1602_v11, 4  ;;  %v1607_v1 = vrot.slane %v1605_v62, 5  ;;  %v1621_v60 = vshll.u32 %v6085_v57, 16 }
 0x1be   : > { %v3547_v8 = vsel %vm3519_vm7, %v3514_v24, %v3173_v19  ;;  %v3225_v35 = vpack.c.b16 %v3209_v50, %v3208_v63  ;;  %v1512_v14 = vor.u32 %v1511_v58, %v1508_v61  ;;  %v1613_v51 = vrot.slane %v1611_v9, 5  ;;  %v2000_v61 = vld [vmem:[#allocation2 + $0x3c] sm:$0xf] }
 0x1bf   : > { %3248 = vrot.lane.b32.xlu0 %v3221_v34, %s4402_s8  ;;  %v1522_v13 = vor.u32 %v1521_v39, %v1517_v15  ;;  %v1617_v55 = vrot.slane %v1615_v25, 4  ;;  %v1608_v34 = vor.u32 %v1607_v1, %v1604_v16  ;;  %v1623_v36 = vrot.slane %v1621_v60, 5  ;;  %v2029_v25 = vld [vmem:[#allocation2 + $0x44] sm:$0x1]  ;;  %v2429_v16 = vld [vmem:[#allocation2 + $0x3c] sm:$0xe] }
 0x1c0   : > { %3256 = vrot.lane.b32.xlu1 %v3225_v35, %s4402_s8  ;;  %v1513_v47 = vrot.slane %v1512_v14, 4  ;;  %v3943_v53 = vrot.slane %v1820_v41, 9  ;;  %v1904_v21 = vrot.slane %v6060_v18, 5  ;;  %v1907_v2 = vrot.slane %v6066_v30, 5 }
 0x1c1   : > { %v3165_v59 = vpop.permute.xlu0 %3164  ;;  %v1523_v7 = vrot.slane %v1522_v13, 4  ;;  %3328 = vrot.lane.b32.xlu2 %v3301_v4, %s4403_s9  ;;  %v1618_v45 = vor.u32 %v1617_v55, %v1613_v51  ;;  %v1609_v22 = vrot.slane %v1608_v34, 4  ;;  %v3947_v50 = vrot.slane %v1824_v32, 9  ;;  %v2433_v32 = vld [vmem:[#allocation2 + $0x6c] sm:$0xe] }
 0x1c2   : > { %v3539_v52 = vsel %vm3519_vm7, %v6049_v27, %v3165_v59  ;;  %v1518_v27 = vsel %vm4542_vm11, %v1513_v47, %v1517_v15  ;;  %v1905_v33 = vsel %vm4859_vm14, %v3943_v53, %v1904_v21  ;;  %v1906_v19 = vrot.slane %v1904_v21, 4  ;;  %v2001_v59 = vld [vmem:[#allocation2 + $0x40] sm:$0xf] }
 0x1c3   : > { %v1528_v24 = vsel %vm4542_vm11, %v1523_v7, %v1527_v42  ;;  %v2928_v46 = vunpack.c.l.b16 %v1518_v27  ;;  %v1619_v18 = vrot.slane %v1618_v45, 4  ;;  %v3008_v26 = vunpack.c.l.b16 %v1905_v33  ;;  %v6129_v7 = vpop.permute.xlu2 %3308  ;;  %v2033_v33 = vld [vmem:[#allocation2 + $0x74] sm:$0x1] }
 0x1c4   : > { %v2929_v4 = vunpack.c.l.b16 %v1528_v24  ;;  %v3572_v17 = vsel %vm3552_vm8, %v3539_v52, %v5997_v28  ;;  %v1614_v63 = vsel %vm4542_vm11, %v1609_v22, %v1613_v51  ;;  %v1932_v28 = vrot.slane %v6082_v23, 5  ;;  %v2009_v24 = vld [vmem:[#allocation2 + $0x70] sm:$0xf] }
 0x1c5   : > { %v3325_v6 = vpop.permute.xlu1 %3324  ;;  %v1624_v15 = vsel %vm4542_vm11, %v1619_v18, %v1623_v36  ;;  %v2936_v39 = vunpack.c.l.b16 %v1614_v63  ;;  %v1935_v62 = vrot.slane %v6085_v57, 5  ;;  %v2115_v41 = vshrl.u32 %v2000_v61, 16  ;;  %v4245_v63 = vld [vmem:[#allocation2 + $0x6c] sm:$0xff] }
 0x1c6   : > { %v2957_v44 = vpack.c.b16 %v2929_v4, %v2928_v46  ;;  %v3605_v30 = vsel %vm3585_vm9, %v3572_v17, %v3325_v6  ;;  %v2937_v42 = vunpack.c.l.b16 %v1624_v15  ;;  %v1933_v13 = vsel %vm4859_vm14, %v3947_v50, %v1932_v28  ;;  %v4241_v17 = vld [vmem:[#allocation2 + $0x3c] sm:$0xff] }
 0x1c7   : > { %3336 = vrot.lane.b32.xlu0 %v3305_v29, %s4403_s9  ;;  %v1908_v29 = vsel %vm4859_vm14, %v1906_v19, %v1907_v2  ;;  %4189 = vmatmul.msk.bf16.gmra.mxu2 %vm3648_vm10, %v3605_v30  ;;  %v1934_v9 = vrot.slane %v1932_v28, 4  ;;  %v3016_v23 = vunpack.c.l.b16 %v1933_v13  ;;  %v2117_v60 = vrot.slane %v2115_v41, 4 }
 0x1c8   : > { %2976 = vrot.lane.b32.xlu1 %v2957_v44, %s4399_s5  ;;  %v3009_v11 = vunpack.c.l.b16 %v1908_v29  ;;  %v2961_v52 = vpack.c.b16 %v2937_v42, %v2936_v39  ;;  %v2118_v47 = vshll.u32 %v2000_v61, 16  ;;  %v2128_v55 = vshrl.u32 %v2001_v59, 16  ;;  %v2008_v44 = vld [vmem:[#allocation2 + $0x6c] sm:$0xf] }
 0x1c9   : > { %v3253_v58 = vpop.permute.xlu0 %3252  ;;  %v1936_v1 = vsel %vm4859_vm14, %v1934_v9, %v1935_v62  ;;  %v2134_v34 = vshll.u32 %v2029_v25, 16  ;;  %v3959_v21 = vrot.slane %v2429_v16, 9  ;;  %v2513_v27 = vrot.slane %v2001_v59, 5 }
 0x1ca   : > { %v3580_v35 = vsel %vm3552_vm8, %v3547_v8, %v3253_v58  ;;  %v3037_v8 = vpack.c.b16 %v3009_v11, %v3008_v26  ;;  %2984 = vrot.lane.b32.xlu2 %v2961_v52, %s4399_s5  ;;  %v3017_v51 = vunpack.c.l.b16 %v1936_v1  ;;  %v2120_v36 = vrot.slane %v2118_v47, 5  ;;  %s3921_s5 = sshll.u32 %s161_s29, 7 }
 0x1cb   : > { %v3613_v14 = vsel %vm3585_vm9, %v3580_v35, %v6029_v43  ;;  %v2124_v43 = vshll.u32 %v2001_v59, 16  ;;  %v2130_v6 = vrot.slane %v2128_v55, 4  ;;  %v2516_v2 = vrot.slane %v2029_v25, 5 }
 0x1cc   : > { %4193 = vmatmul.msk.bf16.gmra.mxu3 %vm3648_vm10, %v3613_v14  ;;  %v3041_v45 = vpack.c.b16 %v3017_v51, %v3016_v23  ;;  %v2121_v4 = vor.u32 %v2120_v36, %v2117_v60  ;;  %v2515_v22 = vrot.slane %v2513_v27, 4  ;;  %v2136_v19 = vrot.slane %v2134_v34, 5 }
 0x1cd   : > { %v6126_v57 = vpop.permute.xlu1 %2980  ;;  %v2126_v53 = vrot.slane %v2124_v43, 5  ;;  %v2541_v26 = vrot.slane %v2009_v24, 5  ;;  %v2514_v50 = vsel %vm4859_vm14, %v3959_v21, %v2513_v27  ;;  %v3963_v58 = vrot.slane %v2433_v32, 9 }
 0x1ce   : > { %v2122_v30 = vrot.slane %v2121_v4, 4  ;;  %v2517_v61 = vsel %vm4859_vm14, %v2515_v22, %v2516_v2  ;;  %v2544_v29 = vrot.slane %v2033_v33, 5  ;;  %v2211_v42 = vshrl.u32 %v2008_v44, 16 }
 0x1cf   : > { %3056 = vrot.lane.b32.xlu0 %v3037_v8, %s4401_s7  ;;  %v2131_v18 = vor.u32 %v2130_v6, %v2126_v53  ;;  %v2543_v39 = vrot.slane %v2541_v26, 4  ;;  %v2214_v11 = vshll.u32 %v2008_v44, 16  ;;  %v3264_v14 = vunpack.c.l.b16 %v2514_v50  ;;  %v2999_v8 = vpop.permute.xlu2 %2998 }
 0x1d0   : > { %3064 = vrot.lane.b32.xlu1 %v3041_v45, %s4401_s7  ;;  %v2127_v28 = vsel %vm4542_vm11, %v2122_v30, %v2126_v53  ;;  %v3265_v13 = vunpack.c.l.b16 %v2517_v61  ;;  %v2542_v25 = vsel %vm4859_vm14, %v3963_v58, %v2541_v26  ;;  %v2213_v41 = vrot.slane %v2211_v42, 4  ;;  %s4254_s7 = sshll.u32 %s4446_s16, 7  ;;  %s3840_s16 = scalar_lea.sflag [#allocation4], %s161_s29 }
 0x1d1   : > { %v2973_v46 = vpop.permute.xlu0 %2972  ;;  %v2132_v15 = vrot.slane %v2131_v18, 4  ;;  %v3184_v59 = vunpack.c.l.b16 %v2127_v28  ;;  %v2216_v52 = vrot.slane %v2214_v11, 5  ;;  %v2545_v23 = vsel %vm4859_vm14, %v2543_v39, %v2544_v29  ;;  %s3851_s11 = scalar_lea.hbm %s6374_s3, %s4254_s7 }
 0x1d2   : > { %3152 = vrot.lane.b32.xlu2 %v4241_v17, %s4400_s6  ;;  %v2220_v16 = vshll.u32 %v2009_v24, 16  ;;  %v2224_v1 = vshrl.u32 %v2009_v24, 16  ;;  %v2230_v60 = vshll.u32 %v2033_v33, 16  ;;  %v3293_v36 = vpack.c.b16 %v3265_v13, %v3264_v14  ;;  %s3854_s19 = sshll.u32 %s3851_s11, 4  ;;  %s3855_s19 = int_to_ptr.hbm [resolvable:$true] %s3854_s19 }
 0x1d3   : > { %v2137_v62 = vsel %vm4542_vm11, %v2132_v15, %v2136_v19  ;;  %v2217_v51 = vor.u32 %v2216_v52, %v2213_v41  ;;  %v3272_v53 = vunpack.c.l.b16 %v2542_v25  ;;  %v3273_v21 = vunpack.c.l.b16 %v2545_v23  ;;  %s4345_s20 = sshra.s32 %s3855_s19, 4  ;;  %s4346_s20 = int_to_ptr.hbm [resolvable:$true] %s4345_s20 }
 0x1d4   : > { %v3185_v9 = vunpack.c.l.b16 %v2137_v62  ;;  %v2222_v55 = vrot.slane %v2220_v16, 5  ;;  %v2226_v34 = vrot.slane %v2224_v1, 4  ;;  %v2232_v6 = vrot.slane %v2230_v60, 5  ;;  %s4347_s24 = scalar_lea.hbm %s4346_s20, 128  ;;  %p4352_p0 = scmp.lt.s32.totalorder %s4346_s20, %s6374_s3 }
 0x1d5   : > { %v3149_v35 = vpop.permute.xlu1 %3148  ;;  %v2218_v27 = vrot.slane %v2217_v51, 4  ;;  %v3457_v10 = vsel %vm3453_vm2, %v5632_v12, %v2973_v46  ;;  %v3297_v4 = vpack.c.b16 %v3273_v21, %v3272_v53  ;;  %v3483_v28 = vsel %vm3453_vm2, %v5780_v0, %v2999_v8  ;;  %p4348_p11 = scmp.ne.s32.totalorder %s4346_s20, %s4347_s24  ;;  %p4353_p1 = scmp.lt.s32.totalorder %s4351_s27, %s4347_s24 }
 0x1d6   : > { %v3213_v43 = vpack.c.b16 %v3185_v9, %v3184_v59  ;;  %v2227_v45 = vor.u32 %v2226_v34, %v2222_v55  ;;  %v3490_v33 = vsel %vm3486_vm6, %v3457_v10, %v6064_v38  ;;  %v3465_v38 = vsel %vm3453_vm2, %v5659_v5, %v6126_v57 }
 0x1d7   : > { %3160 = vrot.lane.b32.xlu0 %v4245_v63, %s4400_s6  ;;  %v2223_v24 = vsel %vm4542_vm11, %v2218_v27, %v2222_v55  ;;  %v3523_v19 = vsel %vm3519_vm7, %v3490_v33, %v3149_v35  ;;  %v3167_v12 = vpop.permute.xlu2 %3166  ;;  %vm3806_vm3 = vcmask 257024   ;;  %s6211_s6 = scalar_lea.vmem [#allocation3], %s3921_s5  ;;  %p4349_p12 = pnand %p4348_p11, %p4463_p5 }
 0x1d8   : > { %3232 = vrot.lane.b32.xlu1 %v3213_v43, %s4402_s8  ;;  %v2228_v32 = vrot.slane %v2227_v45, 4  ;;  %v3192_v22 = vunpack.c.l.b16 %v2223_v24  ;;  %v6202_v45 = vld [vmem:[%s6373_s2] ss:$0 sm:$0xff]  ;;  %s3852_s17 = sshll.u32 %s6211_s6, 4  ;;  %p4354_p2 = por %p4353_p1, %p4352_p0  ;;  %s3853_s17 = int_to_ptr.vmem [resolvable:$true] %s3852_s17 }
 0x1d9   : > { %v3061_v47 = vpop.permute.xlu0 %3060  ;;  %p4350_p13 = pneg %p4349_p12 }
 0x1da   : > { %v2233_v18 = vsel %vm4542_vm11, %v2228_v32, %v2232_v6  ;;  %v3498_v3 = vsel %vm3486_vm6, %v3465_v38, %v3061_v47 }
 0x1db   : > { %v3193_v17 = vunpack.c.l.b16 %v2233_v18  ;;  %v3531_v50 = vsel %vm3519_vm7, %v3498_v3, %v6094_v56  ;;  %p4355_p3 = pnand %p4354_p2, %p4350_p13 }
 0x1dd   : > { %v3237_v2 = vpop.permute.xlu1 %3236  ;;  %v3217_v63 = vpack.c.b16 %v3193_v17, %v3192_v22 }
 0x1de   : > { %v3564_v61 = vsel %vm3552_vm8, %v3531_v50, %v3237_v2 }
 0x1df   : > { %3312 = vrot.lane.b32.xlu0 %v3293_v36, %s4403_s9  ;;  %3240 = vrot.lane.b32.xlu2 %v3217_v63, %s4402_s8 }
 0x1e0   : > { %3320 = vrot.lane.b32.xlu1 %v3297_v4, %s4403_s9 }
 0x1e1   : > { %v3229_v26 = vpop.permute.xlu0 %3228 }
 0x1e2   : > { %v3556_v46 = vsel %vm3552_vm8, %v3523_v19, %v3229_v26 }
 0x1e3   : > { %v3589_v44 = vsel %vm3585_vm9, %v3556_v46, %v6129_v7  ;;  %v3255_v15 = vpop.permute.xlu2 %3254 }
 0x1e4   : > { %4181 = vmatmul.msk.bf16.gmra.mxu0 %vm3648_vm10, %v3589_v44 }
 0x1e5   : > { %v2991_v30 = vpop.permute.xlu1 %2990 }
 0x1e6   : > { %v3475_v11 = vsel %vm3453_vm2, %v5768_v54, %v2991_v30 }
 0x1e9   : > { %v3317_v58 = vpop.permute.xlu0 %3316 }
 0x1ea   : > { %v3597_v7 = vsel %vm3585_vm9, %v3564_v61, %v3317_v58 }
 0x1eb   : > { %4185 = vmatmul.msk.bf16.gmra.mxu1 %vm3648_vm10, %v3597_v7  ;;  %v2975_v29 = vpop.permute.xlu2 %2974 }
 0x1ec   : > { %v3459_v1 = vsel %vm3453_vm2, %v5612_v40, %v2975_v29 }
 0x1ed   : > { %v3079_v39 = vpop.permute.xlu1 %3078 }
 0x1ee   : > { %v3516_v35 = vsel %vm3486_vm6, %v3483_v28, %v3079_v39 }
 0x1f1   : > { %v3071_v5 = vpop.permute.xlu0 %3070 }
 0x1f2   : > { %v3508_v62 = vsel %vm3486_vm6, %v3475_v11, %v3071_v5 }
 0x1f3   : > { %v3063_v9 = vpop.permute.xlu2 %3062  ;;  %v3541_v0 = vsel %vm3519_vm7, %v3508_v62, %v3167_v12 }
 0x1f5   : > { %v3247_v57 = vpop.permute.xlu1 %3246 }
 0x1f6   : > { %v3574_v25 = vsel %vm3552_vm8, %v3541_v0, %v3247_v57 }
 0x1f9   : > { %v3175_v42 = vpop.permute.xlu0 %3174 }
 0x1fa   : > { %v3549_v56 = vsel %vm3519_vm7, %v3516_v35, %v3175_v42 }
 0x1fb   : > { %v3582_v14 = vsel %vm3552_vm8, %v3549_v56, %v3255_v15  ;;  %v3231_v23 = vpop.permute.xlu2 %3230 }
 0x1fd   : > { %v3335_v59 = vpop.permute.xlu1 %3334 }
 0x1fe   : > { %v3615_v13 = vsel %vm3585_vm9, %v3582_v14, %v3335_v59 }
 0x1ff   : > { %4194 = vmatmul.msk.bf16.gmra.mxu3 %vm3648_vm10, %v3615_v13 }
 0x201   : > { %v3327_v41 = vpop.permute.xlu0 %3326 }
 0x202   : > { %v3607_v52 = vsel %vm3585_vm9, %v3574_v25, %v3327_v41 }
 0x203   : > { %4190 = vmatmul.msk.bf16.gmra.mxu2 %vm3648_vm10, %v3607_v52  ;;  %v3319_v51 = vpop.permute.xlu2 %3318 }
 0x205   : > { %v3055_v54 = vpop.permute.xlu1 %3054 }
 0x206   : > { %v3492_v60 = vsel %vm3486_vm6, %v3459_v1, %v3055_v54 }
 0x209   : > { %v2983_v8 = vpop.permute.xlu0 %2982 }
 0x20a   : > { %v3467_v55 = vsel %vm3453_vm2, %v5519_v37, %v2983_v8 }
 0x20b   : > { %v3500_v21 = vsel %vm3486_vm6, %v3467_v55, %v3063_v9  ;;  %v3073_v32 = vpop.permute.xlu2 %3072 }
 0x20d   : > { %v3159_v16 = vpop.permute.xlu1 %3158 }
 0x20e   : > { %v3533_v40 = vsel %vm3519_vm7, %v3500_v21, %v3159_v16 }
 0x211   : > { %v3151_v47 = vpop.permute.xlu0 %3150 }
 0x212   : > { %v3525_v43 = vsel %vm3519_vm7, %v3492_v60, %v3151_v47 }
 0x213   : > { %v3558_v36 = vsel %vm3552_vm8, %v3525_v43, %v3231_v23  ;;  %v3177_v63 = vpop.permute.xlu2 %3176 }
 0x215   : > { %v3311_v34 = vpop.permute.xlu1 %3310 }
 0x216   : > { %v3591_v53 = vsel %vm3585_vm9, %v3558_v36, %v3311_v34 }
 0x217   : > { %4182 = vmatmul.msk.bf16.gmra.mxu0 %vm3648_vm10, %v3591_v53 }
 0x219   : > { %v3239_v27 = vpop.permute.xlu0 %3238 }
 0x21a   : > { %v3566_v37 = vsel %vm3552_vm8, %v3533_v40, %v3239_v27  ;;  %v3754_v6 = vpop.f32.mrf.mxu3 }
 0x21b   : > { %v3599_v10 = vsel %vm3585_vm9, %v3566_v37, %v3319_v51  ;;  %v3755_v2 = vadd.f32 %v6202_v45, %v3754_v6  ;;  %v3329_v28 = vpop.permute.xlu2 %3328 }
 0x21c   : > { %4186 = vmatmul.msk.bf16.gmra.mxu1 %vm3648_vm10, %v3599_v10 }
 0x21d   : > { %v3798_v24 = vpack.c.bf16 %v3755_v2, %v3755_v2  ;;  %v3001_v19 = vpop.permute.xlu1 %3000 }
 0x21e   : > { %v3734_v4 = vpop.f32.mrf.mxu2  ;;  %v3485_v56 = vsel %vm3453_vm2, %v5636_v31, %v3001_v19 }
 0x21f   : > { %v3735_v22 = vadd.f32 %v6202_v45, %v3734_v4  ;;  %3831 = vst.msk [vmem:[%s6211_s6 + $0x60] sm:$0xf] %vm3806_vm3, %v3798_v24 }
 0x221   : > { %v3790_v33 = vpack.c.bf16 %v3735_v22, %v3735_v22  ;;  %v2993_v18 = vpop.permute.xlu0 %2992 }
 0x222   : > { %v3756_v26 = vpop.f32.mrf.mxu3  ;;  %v3477_v50 = vsel %vm3453_vm2, %v5745_v20, %v2993_v18 }
 0x223   : > { %3823 = vst.msk [vmem:[%s6211_s6 + $0x40] sm:$0xf] %vm3806_vm3, %v3790_v33  ;;  %v3757_v17 = vadd.f32 %v6202_v45, %v3756_v26  ;;  %v3510_v7 = vsel %vm3486_vm6, %v3477_v50, %v3073_v32 }
 0x224   : > { %v2985_v23 = vpop.permute.xlu2 %2984 }
 0x225   : > { %v3799_v12 = vpack.c.bf16 %v3757_v17, %v3757_v17  ;;  %v3169_v30 = vpop.permute.xlu1 %3168  ;;  %v3469_v40 = vsel %vm3453_vm2, %v5716_v48, %v2985_v23 }
 0x226   : > { %v3736_v46 = vpop.f32.mrf.mxu2  ;;  %v3543_v5 = vsel %vm3519_vm7, %v3510_v7, %v3169_v30 }
 0x227   : > { %v3737_v44 = vadd.f32 %v6202_v45, %v3736_v46  ;;  %3832 = vst.msk [vmem:[%s6211_s6 + $0x64] sm:$0xf] %vm3806_vm3, %v3799_v12 }
 0x229   : > { %v3791_v38 = vpack.c.bf16 %v3737_v44, %v3737_v44  ;;  %v3081_v3 = vpop.permute.xlu0 %3080 }
 0x22a   : > { %v3518_v62 = vsel %vm3486_vm6, %v3485_v56, %v3081_v3 }
 0x22b   : > { %3824 = vst.msk [vmem:[%s6211_s6 + $0x44] sm:$0xf] %vm3806_vm3, %v3791_v38  ;;  %v3551_v13 = vsel %vm3519_vm7, %v3518_v62, %v3177_v63 }
 0x22c   : > { %v3714_v61 = vpop.f32.mrf.mxu1  ;;  %v3153_v60 = vpop.permute.xlu2 %3152 }
 0x22d   : > { %v3715_v58 = vadd.f32 %v6202_v45, %v3714_v61 }
 0x22f   : > { %v3782_v39 = vpack.c.bf16 %v3715_v58, %v3715_v58 }
 0x230   : > { %v3694_v15 = vpop.f32.mrf.mxu0 }
 0x231   : > { %v3695_v57 = vadd.f32 %v6202_v45, %v3694_v15  ;;  %v3249_v29 = vpop.permute.xlu0 %3248  ;;  %3815 = vst.msk [vmem:[%s6211_s6 + $0x20] sm:$0xf] %vm3806_vm3, %v3782_v39 }
 0x232   : > { %v3576_v35 = vsel %vm3552_vm8, %v3543_v5, %v3249_v29  ;;  %v3257_v11 = vpop.permute.xlu1 %3256 }
 0x233   : > { %v3774_v42 = vpack.c.bf16 %v3695_v57, %v3695_v57  ;;  %v3609_v20 = vsel %vm3585_vm9, %v3576_v35, %v3329_v28  ;;  %v3584_v25 = vsel %vm3552_vm8, %v3551_v13, %v3257_v11 }
 0x234   : > { %4191 = vmatmul.msk.bf16.gmra.mxu2 %vm3648_vm10, %v3609_v20  ;;  %v3716_v59 = vpop.f32.mrf.mxu1 }
 0x235   : > { %3807 = vst.msk [vmem:[%s6211_s6] sm:$0xf] %vm3806_vm3, %v3774_v42  ;;  %v3717_v14 = vadd.f32 %v6202_v45, %v3716_v59 }
 0x237   : > { %v3783_v0 = vpack.c.bf16 %v3717_v14, %v3717_v14 }
 0x238   : > { %v3696_v9 = vpop.f32.mrf.mxu0 }
 0x239   : > { %v3697_v41 = vadd.f32 %v6202_v45, %v3696_v9  ;;  %v3337_v31 = vpop.permute.xlu0 %3336  ;;  %3816 = vst.msk [vmem:[%s6211_s6 + $0x24] sm:$0xf] %vm3806_vm3, %v3783_v0  ;;  %v3241_v24 = vpop.permute.xlu2 %3240 }
 0x23a   : > { %v3617_v52 = vsel %vm3585_vm9, %v3584_v25, %v3337_v31  ;;  %v2977_v8 = vpop.permute.xlu1 %2976 }
 0x23b   : > { %v3775_v54 = vpack.c.bf16 %v3697_v41, %v3697_v41  ;;  %4195 = vmatmul.msk.bf16.gmra.mxu3 %vm3648_vm10, %v3617_v52  ;;  %v3461_v43 = vsel %vm3453_vm2, %v5464_v49, %v2977_v8 }
 0x23d   : > { %3808 = vst.msk [vmem:[%s6211_s6 + $0x4] sm:$0xf] %vm3806_vm3, %v3775_v54 }
 0x241   : > { %v3057_v16 = vpop.permute.xlu0 %3056 }
 0x242   : > { %v3065_v1 = vpop.permute.xlu1 %3064  ;;  %v3494_v55 = vsel %vm3486_vm6, %v3461_v43, %v3057_v16 }
 0x243   : > { %v3527_v27 = vsel %vm3519_vm7, %v3494_v55, %v3153_v60  ;;  %v3502_v6 = vsel %vm3486_vm6, %v3469_v40, %v3065_v1 }
 0x249   : > { %v3161_v47 = vpop.permute.xlu0 %3160 }
 0x24a   : > { %v3739_v51 = vpop.f32.mrf.mxu2  ;;  %v3233_v34 = vpop.permute.xlu1 %3232  ;;  %v3535_v2 = vsel %vm3519_vm7, %v3502_v6, %v3161_v47 }
 0x24b   : > { %v3740_v36 = vadd.f32 %v6202_v45, %v3739_v51  ;;  %v3560_v49 = vsel %vm3552_vm8, %v3527_v27, %v3233_v34  ;;  %v3568_v22 = vsel %vm3552_vm8, %v3535_v2, %v3241_v24 }
 0x24d   : > { %v3792_v21 = vpack.c.bf16 %v3740_v36, %v3740_v36 }
 0x24f   : > { %v3759_v53 = vpop.f32.mrf.mxu3  ;;  %3825 = vst.msk [vmem:[%s6211_s6 + $0x48] sm:$0xf] %vm3806_vm3, %v3792_v21 }
 0x250   : > { %v3760_v37 = vadd.f32 %v6202_v45, %v3759_v53 }
 0x251   : > { %v3313_v10 = vpop.permute.xlu0 %3312 }
 0x252   : > { %v3800_v32 = vpack.c.bf16 %v3760_v37, %v3760_v37  ;;  %v3593_v4 = vsel %vm3585_vm9, %v3560_v49, %v3313_v10  ;;  %v3741_v48 = vpop.f32.mrf.mxu2  ;;  %v3321_v33 = vpop.permute.xlu1 %3320 }
 0x253   : > { %4183 = vmatmul.msk.bf16.gmra.mxu0 %vm3648_vm10, %v3593_v4  ;;  %v3742_v18 = vadd.f32 %v6202_v45, %v3741_v48  ;;  %v3601_v19 = vsel %vm3585_vm9, %v3568_v22, %v3321_v33 }
 0x254   : > { %3833 = vst.msk [vmem:[%s6211_s6 + $0x68] sm:$0xf] %vm3806_vm3, %v3800_v32  ;;  %4187 = vmatmul.msk.bf16.gmra.mxu1 %vm3648_vm10, %v3601_v19 }
 0x255   : > { %v3793_v17 = vpack.c.bf16 %v3742_v18, %v3742_v18 }
 0x257   : > { %v3761_v26 = vpop.f32.mrf.mxu3  ;;  %3826 = vst.msk [vmem:[%s6211_s6 + $0x4c] sm:$0xf] %vm3806_vm3, %v3793_v17 }
 0x258   : > { %v3762_v12 = vadd.f32 %v6202_v45, %v3761_v26 }
 0x25a   : > { %v3801_v46 = vpack.c.bf16 %v3762_v12, %v3762_v12 }
 0x25c   : > { %3834 = vst.msk [vmem:[%s6211_s6 + $0x6c] sm:$0xf] %vm3806_vm3, %v3801_v46 }
 0x261   : > { %v3699_v44 = vpop.f32.mrf.mxu0 }
 0x262   : > { %v3700_v63 = vadd.f32 %v6202_v45, %v3699_v44 }
 0x264   : > { %v3776_v38 = vpack.c.bf16 %v3700_v63, %v3700_v63 }
 0x266   : > { %3809 = vst.msk [vmem:[%s6211_s6 + $0x8] sm:$0xf] %vm3806_vm3, %v3776_v38 }
 0x268   : > { %v3719_v3 = vpop.f32.mrf.mxu1 }
 0x269   : > { %v3720_v30 = vadd.f32 %v6202_v45, %v3719_v3  ;;  %v3701_v50 = vpop.f32.mrf.mxu0 }
 0x26a   : > { %v3702_v61 = vadd.f32 %v6202_v45, %v3701_v50 }
 0x26b   : > { %v3784_v58 = vpack.c.bf16 %v3720_v30, %v3720_v30 }
 0x26c   : > { %v3777_v7 = vpack.c.bf16 %v3702_v61, %v3702_v61 }
 0x26d   : > { %3817 = vst.msk [vmem:[%s6211_s6 + $0x28] sm:$0xf] %vm3806_vm3, %v3784_v58 }
 0x26e   : > { %3810 = vst.msk [vmem:[%s6211_s6 + $0xc] sm:$0xf] %vm3806_vm3, %v3777_v7 }
 0x270   : > { %v3721_v15 = vpop.f32.mrf.mxu1 }
 0x271   : > { %v3722_v39 = vadd.f32 %v6202_v45, %v3721_v15 }
 0x273   : > { %v3785_v5 = vpack.c.bf16 %v3722_v39, %v3722_v39 }
 0x275   : > { %3818 = vst.msk [vmem:[%s6211_s6 + $0x2c] sm:$0xf] %vm3806_vm3, %v3785_v5 }
 0x282   : > { %v3764_v57 = vpop.f32.mrf.mxu3 }
 0x283   : > { %v3765_v29 = vadd.f32 %v6202_v45, %v3764_v57 }
 0x285   : > { %v3802_v28 = vpack.c.bf16 %v3765_v29, %v3765_v29 }
 0x286   : > { %v3744_v35 = vpop.f32.mrf.mxu2 }
 0x287   : > { %v3745_v42 = vadd.f32 %v6202_v45, %v3744_v35  ;;  %3835 = vst.msk [vmem:[%s6211_s6 + $0x70] sm:$0xf] %vm3806_vm3, %v3802_v28 }
 0x289   : > { %v3794_v20 = vpack.c.bf16 %v3745_v42, %v3745_v42 }
 0x28a   : > { %v3766_v56 = vpop.f32.mrf.mxu3 }
 0x28b   : > { %3827 = vst.msk [vmem:[%s6211_s6 + $0x50] sm:$0xf] %vm3806_vm3, %v3794_v20  ;;  %v3767_v11 = vadd.f32 %v6202_v45, %v3766_v56 }
 0x28d   : > { %v3803_v62 = vpack.c.bf16 %v3767_v11, %v3767_v11 }
 0x28e   : > { %v3746_v59 = vpop.f32.mrf.mxu2 }
 0x28f   : > { %v3747_v14 = vadd.f32 %v6202_v45, %v3746_v59  ;;  %3836 = vst.msk [vmem:[%s6211_s6 + $0x74] sm:$0xf] %vm3806_vm3, %v3803_v62 }
 0x291   : > { %v3795_v13 = vpack.c.bf16 %v3747_v14, %v3747_v14 }
 0x293   : > { %3828 = vst.msk [vmem:[%s6211_s6 + $0x54] sm:$0xf] %vm3806_vm3, %v3795_v13 }
 0x294   : > { %v3704_v9 = vpop.f32.mrf.mxu0 }
 0x295   : > { %v3705_v0 = vadd.f32 %v6202_v45, %v3704_v9 }
 0x297   : > { %v3778_v25 = vpack.c.bf16 %v3705_v0, %v3705_v0 }
 0x299   : > { %v3724_v41 = vpop.f32.mrf.mxu1  ;;  %3811 = vst.msk [vmem:[%s6211_s6 + $0x10] sm:$0xf] %vm3806_vm3, %v3778_v25 }
 0x29a   : > { %v3725_v31 = vadd.f32 %v6202_v45, %v3724_v41 }
 0x29c   : > { %v3786_v52 = vpack.c.bf16 %v3725_v31, %v3725_v31  ;;  %v3706_v54 = vpop.f32.mrf.mxu0 }
 0x29d   : > { %v3707_v8 = vadd.f32 %v6202_v45, %v3706_v54 }
 0x29e   : > { %3819 = vst.msk [vmem:[%s6211_s6 + $0x30] sm:$0xf] %vm3806_vm3, %v3786_v52 }
 0x29f   : > { %v3779_v23 = vpack.c.bf16 %v3707_v8, %v3707_v8 }
 0x2a1   : > { %v3726_v16 = vpop.f32.mrf.mxu1  ;;  %3812 = vst.msk [vmem:[%s6211_s6 + $0x14] sm:$0xf] %vm3806_vm3, %v3779_v23 }
 0x2a2   : > { %v3727_v1 = vadd.f32 %v6202_v45, %v3726_v16 }
 0x2a4   : > { %v3787_v60 = vpack.c.bf16 %v3727_v1, %v3727_v1 }
 0x2a6   : > { %3820 = vst.msk [vmem:[%s6211_s6 + $0x34] sm:$0xf] %vm3806_vm3, %v3787_v60 }
 0x2b7   : > { %v3749_v47 = vpop.f32.mrf.mxu2 }
 0x2b8   : > { %v3750_v43 = vadd.f32 %v6202_v45, %v3749_v47 }
 0x2ba   : > { %v3796_v51 = vpack.c.bf16 %v3750_v43, %v3750_v43 }
 0x2bc   : > { %3829 = vst.msk [vmem:[%s6211_s6 + $0x58] sm:$0xf] %vm3806_vm3, %v3796_v51 }
 0x2be   : > { %v3769_v55 = vpop.f32.mrf.mxu3 }
 0x2bf   : > { %v3770_v34 = vadd.f32 %v6202_v45, %v3769_v55  ;;  %v3751_v36 = vpop.f32.mrf.mxu2 }
 0x2c0   : > { %v3752_v53 = vadd.f32 %v6202_v45, %v3751_v36 }
 0x2c1   : > { %v3804_v21 = vpack.c.bf16 %v3770_v34, %v3770_v34 }
 0x2c2   : > { %v3797_v40 = vpack.c.bf16 %v3752_v53, %v3752_v53 }
 0x2c3   : > { %3837 = vst.msk [vmem:[%s6211_s6 + $0x78] sm:$0xf] %vm3806_vm3, %v3804_v21 }
 0x2c4   : > { %3830 = vst.msk [vmem:[%s6211_s6 + $0x5c] sm:$0xf] %vm3806_vm3, %v3797_v40 }
 0x2c6   : > { %v3771_v27 = vpop.f32.mrf.mxu3 }
 0x2c7   : > { %v3772_v37 = vadd.f32 %v6202_v45, %v3771_v27 }
 0x2c9   : > { %v3805_v6 = vpack.c.bf16 %v3772_v37, %v3772_v37 }
 0x2cb   : > { %3838 = vst.msk [vmem:[%s6211_s6 + $0x7c] sm:$0xf] %vm3806_vm3, %v3805_v6 }
 0x2d0   : > { %v3709_v49 = vpop.f32.mrf.mxu0 }
 0x2d1   : > { %v3710_v10 = vadd.f32 %v6202_v45, %v3709_v49  ;;  %v3729_v24 = vpop.f32.mrf.mxu1 }
 0x2d2   : > { %v3730_v32 = vadd.f32 %v6202_v45, %v3729_v24 }
 0x2d3   : > { %v3780_v2 = vpack.c.bf16 %v3710_v10, %v3710_v10 }
 0x2d4   : > { %v3788_v4 = vpack.c.bf16 %v3730_v32, %v3730_v32 }
 0x2d5   : > { %3813 = vst.msk [vmem:[%s6211_s6 + $0x18] sm:$0xf] %vm3806_vm3, %v3780_v2 }
 0x2d6   : > { %3821 = vst.msk [vmem:[%s6211_s6 + $0x38] sm:$0xf] %vm3806_vm3, %v3788_v4 }
 0x2d8   : > { %v3711_v48 = vpop.f32.mrf.mxu0 }
 0x2d9   : > { %v3712_v22 = vadd.f32 %v6202_v45, %v3711_v48  ;;  %v3731_v18 = vpop.f32.mrf.mxu1 }
 0x2da   : > { %v3732_v19 = vadd.f32 %v6202_v45, %v3731_v18 }
 0x2db   : > { %v3781_v33 = vpack.c.bf16 %v3712_v22, %v3712_v22 }
 0x2dc   : > { %v3789_v26 = vpack.c.bf16 %v3732_v19, %v3732_v19 }
 0x2dd   : > { %3814 = vst.msk [vmem:[%s6211_s6 + $0x1c] sm:$0xf] %vm3806_vm3, %v3781_v33 }
 0x2de   : > { %3822 = vst.msk [vmem:[%s6211_s6 + $0x3c] sm:$0xf] %vm3806_vm3, %v3789_v26 }
 0x2df   : > { %4358 = shalt.err (!%p4355_p3)
}
 0x2e0   : > { %s4404_s29 = smov 4  }
 0x2e1   : > { %4270 = dma.vmem_to_hbm [thread:$0]  (%p4463_p5), %s3853_s17, 2048, %s3855_s19, %s3840_s16, %s4403_s9, %s4403_s9, %s4404_s29  }
 0x2e2 PF: > { %p4276_p4 = scmp.ge.s32.totalorder %s4393_s15, 2  ;;  %s3869_s4 = sand.u32 1, %s4381_s12  }
 0x2e3   : > { %s3870_s5 = scalar_lea.sflag [#allocation4], %s3869_s4 }
 0x2e4   : > { %p4273_p7 = pnand %p4276_p4, %p4467_p6 }
 0x2e6   : > { %p4274_p8 = pneg %p4273_p7 }
 0x2e8   : > { %4376 = dma.done.wait (%p4274_p8), %s3870_s5, 2048  }
 0x2e9   : > { %4378 = vsyncadd (%p4274_p8), %s3870_s5, 4294965248  ;;  %p13_p9 = scmp.ge.s32.totalorder %s4450_s18, 4   ;;  %s6389_s12 = smov %s4385_s13 }
 0x2ea   : > { %s6390_s13 = smov %s4389_s14  ;;  %s6391_s14 = smov %s4461_s21 }
 0x2eb   : > { %s6392_s15 = smov %s4450_s18  ;;  %15 = sbr.rel (!%p13_p9) target bundleno = 3 (0x3), region = 70 }
 0x2f0   :  { %3876 = vsyncpa [#allocation4], 1 }
 0x2f1   :  { %3878 = vsyncpa [#allocation4 + $0x1], 1 }

</bundles_post_ra>
